<compile_context>
chip_gen: v6e
topology: v6e:2x2x1
jax: 0.10.0
libtpu: 0.0.40
codegen_flags: <defaults>
</compile_context>

<pallas_src>
import functools

import jax
import jax.numpy as jnp
from jax import lax
from jax.experimental import pallas as pl
from jax.experimental.pallas import tpu as pltpu

_LANE = 128


def _round_up(v, m):
    return ((v + m - 1) // m) * m


def _vmem_limit_bytes():
    """Generation-aware VMEM request (~3/4 of per-core physical capacity)."""
    cap = 64 * 1024 * 1024                       # conservative default (v7x/TC)
    try:
        cap = int(pltpu.get_tpu_info().vmem_capacity_bytes)
    except Exception:
        pass
    return min(cap * 3 // 4, 100 * 1024 * 1024)


# ----------------------------------------------------------------------------
# Fused Pallas kernel: conv1 -> BN -> ReLU -> conv2 -> BN -> ReLU -> maxpool2x2
# ----------------------------------------------------------------------------
def fused_down2_kernel(x_ref, w1_ref, s1_ref, b1_ref, w2_ref, s2_ref, b2_ref,
                       o_ref, idx_ref, *, h, w, c1_real):
    """One batch element per grid step.

    x_ref  : (1, H, W, K1P)      bf16  conv1 input, im2col'd (lane = tap*Cin+c)
    w1_ref : (K1P, C1P)          bf16  tap-packed conv1 weight
    w2_ref : (K2P, C2P)          bf16  tap-packed conv2 weight
    s*/b*  : (1, C*P)            f32   folded eval-mode BN scale / bias
    o_ref  : (1, H/2, W/2, C2P)  f32   pooled output
    idx_ref: (1, H/2, W/2, C2P)  i32   argmax (flat h*W + w, first-max wins)
    """
    k1p = x_ref.shape[-1]
    k2p, c2p = w2_ref.shape
    hh, wh = h // 2, w // 2

    # ---- conv1 + BN + ReLU: one K<=128 MXU matmul (M = H*W) ----------------
    x1 = x_ref[0].reshape(h * w, k1p)                          # bf16
    acc1 = jnp.dot(x1, w1_ref[...], preferred_element_type=jnp.float32)
    y1 = jnp.maximum(acc1 * s1_ref[...] + b1_ref[...], 0.0)    # f32 (H*W, C1P)

    # ---- in-kernel tap-packed im2col for conv2 (9 * c1_real <= K2P) --------
    # Keep only the real channels; halo pad and tap gather stay in f32 vregs.
    y1r = y1[:, :c1_real].reshape(h, w, c1_real)
    zr = jnp.zeros((1, w, c1_real), jnp.float32)
    y1p = jnp.concatenate([zr, y1r, zr], axis=0)               # (H+2, W, c1)
    zc = jnp.zeros((h + 2, 1, c1_real), jnp.float32)
    y1p = jnp.concatenate([zc, y1p, zc], axis=1)               # (H+2, W+2, c1)
    slabs = [y1p[ky:ky + h, kx:kx + w, :]
             for ky in range(3) for kx in range(3)]            # 9 x (H, W, c1)
    pad_k = k2p - 9 * c1_real
    if pad_k:
        slabs.append(jnp.zeros((h, w, pad_k), jnp.float32))
    x2 = jnp.concatenate(slabs, axis=-1)                       # (H, W, K2P) f32
    x2 = x2.astype(jnp.bfloat16).reshape(h * w, k2p)           # one cast to bf16

    # ---- conv2 + BN + ReLU: one K<=128 MXU matmul ---------------------------
    acc2 = jnp.dot(x2, w2_ref[...], preferred_element_type=jnp.float32)
    y2 = jnp.maximum(acc2 * s2_ref[...] + b2_ref[...], 0.0)    # f32 (H*W, C2P)

    # ---- fused 2x2/2 max-pool with argmax, entirely in vregs ----------------
    # PyTorch scan order (0,0),(0,1),(1,0),(1,1); first maximum wins via '>'.
    y4 = y2.reshape(hh, 2, wh, 2, c2p)
    col0 = y4[:, :, :, 0, :]                                   # (hh, 2, wh, C)
    col1 = y4[:, :, :, 1, :]
    m1 = col1 > col0                                           # ties keep left col
    cv = jnp.where(m1, col1, col0)
    dx = m1.astype(jnp.int32)
    row0, row1 = cv[:, 0], cv[:, 1]                            # (hh, wh, C)
    m2 = row1 > row0                                           # ties keep top row
    best = jnp.where(m2, row1, row0)
    dy = m2.astype(jnp.int32)
    dxw = jnp.where(m2, dx[:, 1], dx[:, 0])

    hi = lax.broadcasted_iota(jnp.int32, (hh, wh, c2p), 0)
    wi = lax.broadcasted_iota(jnp.int32, (hh, wh, c2p), 1)
    o_ref[0] = best.astype(o_ref.dtype)
    idx_ref[0] = ((2 * hi + dy) * w + (2 * wi + dxw)).astype(jnp.int32)


# ----------------------------------------------------------------------------
# pallas_call wrapper
# ----------------------------------------------------------------------------
def fused_segnet_down2(x_i2c, params, *, h, w, c1_real):
    n = x_i2c.shape[0]
    k1p = x_i2c.shape[-1]
    k1p_w, c1p = params["w1"].shape
    k2p, c2p = params["w2"].shape
    assert k1p == k1p_w
    hh, wh = h // 2, w // 2

    vmem_limit = _vmem_limit_bytes()
    # Rough per-step VMEM footprint of the whole-image-resident strategy.
    est = (2 * h * w * k1p * 2                       # im2col input (2 buffers)
           + 2 * (k1p * c1p + k2p * c2p) * 2         # weights
           + 2 * hh * wh * c2p * (4 + 4)             # outputs (2 buffers)
           + 10 * h * w * c2p * 4)                   # f32 live working set
    # TODO(synk): add a halo row-tiled / manual-DMA (memory_space=pl.ANY +
    # make_async_copy) path for resolutions whose working set exceeds VMEM
    # (matters on v7x's 64 MiB/TC at real SegNet resolutions).
    assert est <= vmem_limit, (
        f"image too large for whole-image-resident fused kernel "
        f"(need ~{est} B, VMEM budget {vmem_limit} B)")

    kern = functools.partial(fused_down2_kernel, h=h, w=w, c1_real=c1_real)
    flops = 2 * n * h * w * (k1p * c1p + k2p * c2p)
    bytes_acc = (int(x_i2c.size) * 2 + (k1p * c1p + k2p * c2p) * 2
                 + n * hh * wh * c2p * 8)
    const2 = lambda i: (0, 0)

    return pl.pallas_call(
        kern,
        out_shape=(jax.ShapeDtypeStruct((n, hh, wh, c2p), jnp.float32),
                   jax.ShapeDtypeStruct((n, hh, wh, c2p), jnp.int32)),
        grid=(n,),
        in_specs=[
            pl.BlockSpec((1, h, w, k1p), lambda i: (i, 0, 0, 0)),
            pl.BlockSpec((k1p, c1p), const2),      # constant index -> fetched once
            pl.BlockSpec((1, c1p), const2),
            pl.BlockSpec((1, c1p), const2),
            pl.BlockSpec((k2p, c2p), const2),
            pl.BlockSpec((1, c2p), const2),
            pl.BlockSpec((1, c2p), const2),
        ],
        out_specs=(pl.BlockSpec((1, hh, wh, c2p), lambda i: (i, 0, 0, 0)),
                   pl.BlockSpec((1, hh, wh, c2p), lambda i: (i, 0, 0, 0))),
        compiler_params=pltpu.CompilerParams(
            dimension_semantics=("parallel",),
            vmem_limit_bytes=vmem_limit),
        cost_estimate=pl.CostEstimate(flops=int(flops), transcendentals=0,
                                      bytes_accessed=int(bytes_acc)),
    )(x_i2c, params["w1"], params["s1"], params["b1"],
      params["w2"], params["s2"], params["b2"])


# ----------------------------------------------------------------------------
# Forward pass (matches SegNetDown2.forward)
# ----------------------------------------------------------------------------
def segnet_down2_forward(x_nchw, params, out_size):
    n, cin, h, w = x_nchw.shape
    assert h % 2 == 0 and w % 2 == 0, "maxpool 2x2/2 needs even H and W"
    k1p = params["w1"].shape[0]
    assert 9 * cin <= k1p and 9 * out_size <= params["w2"].shape[0]

    # boundary glue (plain XLA): NCHW -> NHWC, bf16, 1-px halo, HBM im2col with
    # taps packed into lanes (lane = (3*ky+kx)*Cin + c), zero-padded to K1P.
    x = jnp.transpose(x_nchw, (0, 2, 3, 1)).astype(jnp.bfloat16)
    xp = jnp.pad(x, ((0, 0), (1, 1), (1, 1), (0, 0)))
    taps = [xp[:, ky:ky + h, kx:kx + w, :] for ky in range(3) for kx in range(3)]
    x_i2c = jnp.concatenate(taps, axis=-1)                    # (N, H, W, 9*Cin)
    x_i2c = jnp.pad(x_i2c, ((0, 0), (0, 0), (0, 0), (0, k1p - 9 * cin)))

    pooled, idx = fused_segnet_down2(x_i2c, params, h=h, w=w, c1_real=out_size)

    unpooled_shape = (n, out_size, h, w)                      # torch.Size order
    # boundary glue: drop padded channels, NHWC -> NCHW
    pooled_nchw = jnp.transpose(pooled[..., :out_size], (0, 3, 1, 2))
    idx_nchw = jnp.transpose(idx[..., :out_size], (0, 3, 1, 2))
    return pooled_nchw, idx_nchw, unpooled_shape


# ----------------------------------------------------------------------------
# Deterministic parameter construction (eval-mode BN folded, tap-packed, padded)
# ----------------------------------------------------------------------------
def init_params(key, in_size, out_size, k1_pad, c1_pad, k2_pad, c2_pad):
    keys = jax.random.split(key, 12)

    def make_layer(ks, cin, cout, k_pad, c_pad):
        kw, kb, kg, kbe, km, kv = ks
        w = 0.1 * jax.random.normal(kw, (3, 3, cin, cout), jnp.float32)
        conv_b = 0.1 * jax.random.normal(kb, (cout,), jnp.float32)
        gamma = 1.0 + 0.1 * jax.random.normal(kg, (cout,), jnp.float32)
        beta = 0.1 * jax.random.normal(kbe, (cout,), jnp.float32)
        mean = 0.1 * jax.random.normal(km, (cout,), jnp.float32)
        var = 1.0 + 0.1 * jnp.abs(jax.random.normal(kv, (cout,), jnp.float32))
        eps = 1e-5
        scale = gamma / jnp.sqrt(var + eps)
        bias = beta + (conv_b - mean) * scale
        # Tap-packed (K, Cout) weight: row = (3*ky+kx)*Cin + c, zero padded.
        w_p = jnp.zeros((k_pad, c_pad), jnp.float32)
        w_p = w_p.at[:9 * cin, :cout].set(w.reshape(9 * cin, cout))
        w_p = w_p.astype(jnp.bfloat16)
        # padded scale 1 / bias 0 -> padded output channels are exactly 0.
        scale_p = jnp.ones((1, c_pad), jnp.float32).at[0, :cout].set(scale)
        bias_p = jnp.zeros((1, c_pad), jnp.float32).at[0, :cout].set(bias)
        return w_p, scale_p, bias_p

    w1, s1, b1 = make_layer(keys[0:6], in_size, out_size, k1_pad, c1_pad)
    w2, s2, b2 = make_layer(keys[6:12], out_size, out_size, k2_pad, c2_pad)
    return {"w1": w1, "s1": s1, "b1": b1, "w2": w2, "s2": s2, "b2": b2}


# ----------------------------------------------------------------------------
if __name__ == "__main__":
    key = jax.random.PRNGKey(0)
    k_x, k_p = jax.random.split(key)

    in_size, out_size = 4, 8
    N, H, W = 2, 16, 16
    K1P = _round_up(9 * in_size, _LANE)
    C1P = _round_up(out_size, _LANE)
    K2P = _round_up(9 * out_size, _LANE)
    C2P = _round_up(out_size, _LANE)

    x = jax.random.normal(k_x, (N, in_size, H, W), jnp.float32)   # NCHW like PyTorch
    params = init_params(k_p, in_size, out_size, K1P, C1P, K2P, C2P)

    fwd = jax.jit(functools.partial(segnet_down2_forward, params=params,
                                    out_size=out_size))
    pooled, indices, unpooled_shape = fwd(x)
    pooled = jax.block_until_ready(pooled)
    indices = jax.block_until_ready(indices)
    unpooled_shape = tuple(int(d) for d in unpooled_shape)

    assert pooled.shape == (N, out_size, H // 2, W // 2)
    assert pooled.dtype == jnp.float32
    assert indices.shape == (N, out_size, H // 2, W // 2)
    assert indices.dtype == jnp.int32          # PyTorch returns int64 (documented)
    assert unpooled_shape == (N, out_size, H, W)

    # ---- correctness check vs a bf16-matched pure-JAX reference ------------
    def _ref_conv(x_nhwc, w_packed, s, b, cin, cout):
        w4 = w_packed[:9 * cin, :cout].reshape(3, 3, cin, cout)
        y = lax.conv_general_dilated(
            x_nhwc.astype(jnp.bfloat16), w4, (1, 1), "SAME",
            dimension_numbers=("NHWC", "HWIO", "NHWC"),
            preferred_element_type=jnp.float32)
        return jnp.maximum(y * s[0, :cout] + b[0, :cout], 0.0)

    x_nhwc = jnp.transpose(x, (0, 2, 3, 1))
    r1 = _ref_conv(x_nhwc, params["w1"], params["s1"], params["b1"],
                   in_size, out_size).astype(jnp.bfloat16)
    r2 = _ref_conv(r1, params["w2"], params["s2"], params["b2"],
                   out_size, out_size)                          # (N,H,W,out) f32
    ref_pool = r2.reshape(N, H // 2, 2, W // 2, 2, out_size).max(axis=(2, 4))
    ref_pool_nchw = jnp.transpose(ref_pool, (0, 3, 1, 2))
    assert bool(jnp.allclose(pooled, ref_pool_nchw, rtol=2e-2, atol=2e-2))

    rows, cols = indices // W, indices % W
    assert bool(jnp.all(rows // 2 == jnp.arange(H // 2)[None, None, :, None]))
    assert bool(jnp.all(cols // 2 == jnp.arange(W // 2)[None, None, None, :]))
    r2_flat = jnp.transpose(r2, (0, 3, 1, 2)).reshape(N, out_size, H * W)
    gathered = jnp.take_along_axis(
        r2_flat, indices.reshape(N, out_size, -1), axis=2).reshape(indices.shape)
    assert bool(jnp.allclose(gathered, pooled, rtol=2e-2, atol=2e-2))

    print("KERNEL_OK")
</pallas_src>

<mosaic_0001>
module attributes {stable_mosaic.version = 11 : i64} {
  func.func @fused_down2_kernel(%arg0: i32, %arg1: memref<1x16x16x128xbf16, #tpu.memory_space<vmem>>, %arg2: memref<128x128xbf16, #tpu.memory_space<vmem>>, %arg3: memref<1x128xf32, #tpu.memory_space<vmem>>, %arg4: memref<1x128xf32, #tpu.memory_space<vmem>>, %arg5: memref<128x128xbf16, #tpu.memory_space<vmem>>, %arg6: memref<1x128xf32, #tpu.memory_space<vmem>>, %arg7: memref<1x128xf32, #tpu.memory_space<vmem>>, %arg8: memref<1x8x8x128xf32, #tpu.memory_space<vmem>>, %arg9: memref<1x8x8x128xi32, #tpu.memory_space<vmem>>) attributes {dimension_semantics = [#tpu.dimension_semantics<parallel>], iteration_bounds = array<i64: 2>, scalar_prefetch = 0 : i64, scratch_operands = 0 : i64, tpu.core_type = #tpu.core_type<tc>, window_params = [{transform_indices = @transform_0, window_bounds = array<i64: 1, 16, 16, 128>}, {pipeline_mode = #tpu.pipeline_mode<synchronous>, transform_indices = @transform_1, window_bounds = array<i64: 128, 128>}, {pipeline_mode = #tpu.pipeline_mode<synchronous>, transform_indices = @transform_2, window_bounds = array<i64: 1, 128>}, {pipeline_mode = #tpu.pipeline_mode<synchronous>, transform_indices = @transform_3, window_bounds = array<i64: 1, 128>}, {pipeline_mode = #tpu.pipeline_mode<synchronous>, transform_indices = @transform_4, window_bounds = array<i64: 128, 128>}, {pipeline_mode = #tpu.pipeline_mode<synchronous>, transform_indices = @transform_5, window_bounds = array<i64: 1, 128>}, {pipeline_mode = #tpu.pipeline_mode<synchronous>, transform_indices = @transform_6, window_bounds = array<i64: 1, 128>}, {transform_indices = @transform_7, window_bounds = array<i64: 1, 8, 8, 128>}, {transform_indices = @transform_8, window_bounds = array<i64: 1, 8, 8, 128>}]} {
    %c0 = arith.constant 0 : index
    %c0_0 = arith.constant 0 : index
    %c0_1 = arith.constant 0 : index
    %c0_2 = arith.constant 0 : index
    %0 = vector.load %arg1[%c0, %c0_0, %c0_1, %c0_2] : memref<1x16x16x128xbf16, #tpu.memory_space<vmem>>, vector<1x16x16x128xbf16>
    %1 = vector.shape_cast %0 : vector<1x16x16x128xbf16> to vector<16x16x128xbf16>
    %2 = vector.shape_cast %1 : vector<16x16x128xbf16> to vector<256x128xbf16>
    %c0_3 = arith.constant 0 : index
    %c0_4 = arith.constant 0 : index
    %3 = vector.load %arg2[%c0_3, %c0_4] : memref<128x128xbf16, #tpu.memory_space<vmem>>, vector<128x128xbf16>
    %cst = arith.constant dense<0.000000e+00> : vector<256x128xf32>
    %4 = tpu.matmul %2, %3, %cst {dimension_numbers = #tpu.dot_dimension_numbers<[1], [0], [0], [1], [0, 0, 1, 1], [], []>} : vector<256x128xbf16>, vector<128x128xbf16>, vector<256x128xf32> -> vector<256x128xf32>
    %c0_5 = arith.constant 0 : index
    %c0_6 = arith.constant 0 : index
    %5 = vector.load %arg3[%c0_5, %c0_6] : memref<1x128xf32, #tpu.memory_space<vmem>>, vector<1x128xf32>
    %6 = vector.broadcast %5 : vector<1x128xf32> to vector<256x128xf32>
    %7 = arith.mulf %4, %6 : vector<256x128xf32>
    %c0_7 = arith.constant 0 : index
    %c0_8 = arith.constant 0 : index
    %8 = vector.load %arg4[%c0_7, %c0_8] : memref<1x128xf32, #tpu.memory_space<vmem>>, vector<1x128xf32>
    %9 = vector.broadcast %8 : vector<1x128xf32> to vector<256x128xf32>
    %10 = arith.addf %7, %9 : vector<256x128xf32>
    %cst_9 = arith.constant 0.000000e+00 : f32
    %11 = vector.broadcast %cst_9 : f32 to vector<256x128xf32>
    %12 = arith.maximumf %10, %11 : vector<256x128xf32>
    %13 = vector.extract_strided_slice %12 {offsets = [0, 0], sizes = [256, 8], strides = [1, 1]} : vector<256x128xf32> to vector<256x8xf32>
    %14 = vector.shape_cast %13 : vector<256x8xf32> to vector<16x16x8xf32>
    %cst_10 = arith.constant 0.000000e+00 : f32
    %15 = vector.broadcast %cst_10 : f32 to vector<1x16x8xf32>
    %16 = tpu.concatenate %15, %14, %15 in 0 : vector<1x16x8xf32>, vector<16x16x8xf32>, vector<1x16x8xf32> -> vector<18x16x8xf32>
    %cst_11 = arith.constant 0.000000e+00 : f32
    %17 = vector.broadcast %cst_11 : f32 to vector<18x1x8xf32>
    %18 = tpu.concatenate %17, %16, %17 in 1 : vector<18x1x8xf32>, vector<18x16x8xf32>, vector<18x1x8xf32> -> vector<18x18x8xf32>
    %19 = vector.extract_strided_slice %18 {offsets = [0, 0, 0], sizes = [16, 16, 8], strides = [1, 1, 1]} : vector<18x18x8xf32> to vector<16x16x8xf32>
    %20 = vector.extract_strided_slice %18 {offsets = [0, 1, 0], sizes = [16, 16, 8], strides = [1, 1, 1]} : vector<18x18x8xf32> to vector<16x16x8xf32>
    %21 = vector.extract_strided_slice %18 {offsets = [0, 2, 0], sizes = [16, 16, 8], strides = [1, 1, 1]} : vector<18x18x8xf32> to vector<16x16x8xf32>
    %22 = vector.extract_strided_slice %18 {offsets = [1, 0, 0], sizes = [16, 16, 8], strides = [1, 1, 1]} : vector<18x18x8xf32> to vector<16x16x8xf32>
    %23 = vector.extract_strided_slice %18 {offsets = [1, 1, 0], sizes = [16, 16, 8], strides = [1, 1, 1]} : vector<18x18x8xf32> to vector<16x16x8xf32>
    %24 = vector.extract_strided_slice %18 {offsets = [1, 2, 0], sizes = [16, 16, 8], strides = [1, 1, 1]} : vector<18x18x8xf32> to vector<16x16x8xf32>
    %25 = vector.extract_strided_slice %18 {offsets = [2, 0, 0], sizes = [16, 16, 8], strides = [1, 1, 1]} : vector<18x18x8xf32> to vector<16x16x8xf32>
    %26 = vector.extract_strided_slice %18 {offsets = [2, 1, 0], sizes = [16, 16, 8], strides = [1, 1, 1]} : vector<18x18x8xf32> to vector<16x16x8xf32>
    %27 = vector.extract_strided_slice %18 {offsets = [2, 2, 0], sizes = [16, 16, 8], strides = [1, 1, 1]} : vector<18x18x8xf32> to vector<16x16x8xf32>
    %cst_12 = arith.constant 0.000000e+00 : f32
    %28 = vector.broadcast %cst_12 : f32 to vector<16x16x56xf32>
    %29 = tpu.concatenate %19, %20, %21, %22, %23, %24, %25, %26, %27, %28 in 2 : vector<16x16x8xf32>, vector<16x16x8xf32>, vector<16x16x8xf32>, vector<16x16x8xf32>, vector<16x16x8xf32>, vector<16x16x8xf32>, vector<16x16x8xf32>, vector<16x16x8xf32>, vector<16x16x8xf32>, vector<16x16x56xf32> -> vector<16x16x128xf32>
    %30 = arith.truncf %29 : vector<16x16x128xf32> to vector<16x16x128xbf16>
    %31 = vector.shape_cast %30 : vector<16x16x128xbf16> to vector<256x128xbf16>
    %c0_13 = arith.constant 0 : index
    %c0_14 = arith.constant 0 : index
    %32 = vector.load %arg5[%c0_13, %c0_14] : memref<128x128xbf16, #tpu.memory_space<vmem>>, vector<128x128xbf16>
    %cst_15 = arith.constant dense<0.000000e+00> : vector<256x128xf32>
    %33 = tpu.matmul %31, %32, %cst_15 {dimension_numbers = #tpu.dot_dimension_numbers<[1], [0], [0], [1], [0, 0, 1, 1], [], []>} : vector<256x128xbf16>, vector<128x128xbf16>, vector<256x128xf32> -> vector<256x128xf32>
    %c0_16 = arith.constant 0 : index
    %c0_17 = arith.constant 0 : index
    %34 = vector.load %arg6[%c0_16, %c0_17] : memref<1x128xf32, #tpu.memory_space<vmem>>, vector<1x128xf32>
    %35 = vector.broadcast %34 : vector<1x128xf32> to vector<256x128xf32>
    %36 = arith.mulf %33, %35 : vector<256x128xf32>
    %c0_18 = arith.constant 0 : index
    %c0_19 = arith.constant 0 : index
    %37 = vector.load %arg7[%c0_18, %c0_19] : memref<1x128xf32, #tpu.memory_space<vmem>>, vector<1x128xf32>
    %38 = vector.broadcast %37 : vector<1x128xf32> to vector<256x128xf32>
    %39 = arith.addf %36, %38 : vector<256x128xf32>
    %cst_20 = arith.constant 0.000000e+00 : f32
    %40 = vector.broadcast %cst_20 : f32 to vector<256x128xf32>
    %41 = arith.maximumf %39, %40 : vector<256x128xf32>
    %42 = vector.shape_cast %41 : vector<256x128xf32> to vector<8x2x8x2x128xf32>
    %43 = vector.extract_strided_slice %42 {offsets = [0, 0, 0, 0, 0], sizes = [8, 2, 8, 1, 128], strides = [1, 1, 1, 1, 1]} : vector<8x2x8x2x128xf32> to vector<8x2x8x1x128xf32>
    %44 = vector.shape_cast %43 : vector<8x2x8x1x128xf32> to vector<8x2x8x128xf32>
    %45 = vector.extract_strided_slice %42 {offsets = [0, 0, 0, 1, 0], sizes = [8, 2, 8, 1, 128], strides = [1, 1, 1, 1, 1]} : vector<8x2x8x2x128xf32> to vector<8x2x8x1x128xf32>
    %46 = vector.shape_cast %45 : vector<8x2x8x1x128xf32> to vector<8x2x8x128xf32>
    %47 = arith.cmpf ogt, %46, %44 : vector<8x2x8x128xf32>
    %48 = arith.select %47, %46, %44 : vector<8x2x8x128xi1>, vector<8x2x8x128xf32>
    %49 = arith.extui %47 : vector<8x2x8x128xi1> to vector<8x2x8x128xi32>
    %50 = vector.extract_strided_slice %48 {offsets = [0, 0, 0, 0], sizes = [8, 1, 8, 128], strides = [1, 1, 1, 1]} : vector<8x2x8x128xf32> to vector<8x1x8x128xf32>
    %51 = vector.shape_cast %50 : vector<8x1x8x128xf32> to vector<8x8x128xf32>
    %52 = vector.extract_strided_slice %48 {offsets = [0, 1, 0, 0], sizes = [8, 1, 8, 128], strides = [1, 1, 1, 1]} : vector<8x2x8x128xf32> to vector<8x1x8x128xf32>
    %53 = vector.shape_cast %52 : vector<8x1x8x128xf32> to vector<8x8x128xf32>
    %54 = arith.cmpf ogt, %53, %51 : vector<8x8x128xf32>
    %55 = arith.select %54, %53, %51 : vector<8x8x128xi1>, vector<8x8x128xf32>
    %56 = arith.extui %54 : vector<8x8x128xi1> to vector<8x8x128xi32>
    %57 = vector.extract_strided_slice %49 {offsets = [0, 1, 0, 0], sizes = [8, 1, 8, 128], strides = [1, 1, 1, 1]} : vector<8x2x8x128xi32> to vector<8x1x8x128xi32>
    %58 = vector.shape_cast %57 : vector<8x1x8x128xi32> to vector<8x8x128xi32>
    %59 = vector.extract_strided_slice %49 {offsets = [0, 0, 0, 0], sizes = [8, 1, 8, 128], strides = [1, 1, 1, 1]} : vector<8x2x8x128xi32> to vector<8x1x8x128xi32>
    %60 = vector.shape_cast %59 : vector<8x1x8x128xi32> to vector<8x8x128xi32>
    %61 = arith.select %54, %58, %60 : vector<8x8x128xi1>, vector<8x8x128xi32>
    %62 = tpu.iota {dimensions = array<i32: 0>} : vector<8x8x128xi32>
    %63 = tpu.iota {dimensions = array<i32: 1>} : vector<8x8x128xi32>
    %c0_21 = arith.constant 0 : index
    %c0_22 = arith.constant 0 : index
    %c0_23 = arith.constant 0 : index
    %c0_24 = arith.constant 0 : index
    %64 = vector.load %arg8[%c0_21, %c0_22, %c0_23, %c0_24] : memref<1x8x8x128xf32, #tpu.memory_space<vmem>>, vector<1x8x8x128xf32>
    %65 = vector.shape_cast %64 : vector<1x8x8x128xf32> to vector<8x8x128xf32>
    %66 = vector.shape_cast %55 : vector<8x8x128xf32> to vector<1x8x8x128xf32>
    tpu.vector_store %arg8[%c0_21, %c0_22, %c0_23, %c0_24], %66 {strides = array<i32>} : memref<1x8x8x128xf32, #tpu.memory_space<vmem>>, vector<1x8x8x128xf32>,
    %c2_i32 = arith.constant 2 : i32
    %67 = vector.broadcast %c2_i32 : i32 to vector<8x8x128xi32>
    %68 = arith.muli %67, %62 : vector<8x8x128xi32>
    %69 = arith.addi %68, %56 : vector<8x8x128xi32>
    %c16_i32 = arith.constant 16 : i32
    %70 = vector.broadcast %c16_i32 : i32 to vector<8x8x128xi32>
    %71 = arith.muli %69, %70 : vector<8x8x128xi32>
    %c2_i32_25 = arith.constant 2 : i32
    %72 = vector.broadcast %c2_i32_25 : i32 to vector<8x8x128xi32>
    %73 = arith.muli %72, %63 : vector<8x8x128xi32>
    %74 = arith.addi %73, %61 : vector<8x8x128xi32>
    %75 = arith.addi %71, %74 : vector<8x8x128xi32>
    %c0_26 = arith.constant 0 : index
    %c0_27 = arith.constant 0 : index
    %c0_28 = arith.constant 0 : index
    %c0_29 = arith.constant 0 : index
    %76 = vector.load %arg9[%c0_26, %c0_27, %c0_28, %c0_29] : memref<1x8x8x128xi32, #tpu.memory_space<vmem>>, vector<1x8x8x128xi32>
    %77 = vector.shape_cast %76 : vector<1x8x8x128xi32> to vector<8x8x128xi32>
    %78 = vector.shape_cast %75 : vector<8x8x128xi32> to vector<1x8x8x128xi32>
    tpu.vector_store %arg9[%c0_26, %c0_27, %c0_28, %c0_29], %78 {strides = array<i32>} : memref<1x8x8x128xi32, #tpu.memory_space<vmem>>, vector<1x8x8x128xi32>,
    return
  }
  func.func @transform_0(%arg0: i32) -> (i32, i32, i32, i32) {
    %c0_i32 = arith.constant 0 : i32
    %c0_i32_0 = arith.constant 0 : i32
    %c0_i32_1 = arith.constant 0 : i32
    %c0_i32_2 = arith.constant 0 : i32
    return %arg0, %c0_i32, %c0_i32_0, %c0_i32_1 : i32, i32, i32, i32
  }
  func.func @transform_1(%arg0: i32) -> (i32, i32) {
    %c0_i32 = arith.constant 0 : i32
    %c0_i32_0 = arith.constant 0 : i32
    %c0_i32_1 = arith.constant 0 : i32
    return %c0_i32, %c0_i32_0 : i32, i32
  }
  func.func @transform_2(%arg0: i32) -> (i32, i32) {
    %c0_i32 = arith.constant 0 : i32
    %c0_i32_0 = arith.constant 0 : i32
    %c0_i32_1 = arith.constant 0 : i32
    return %c0_i32, %c0_i32_0 : i32, i32
  }
  func.func @transform_3(%arg0: i32) -> (i32, i32) {
    %c0_i32 = arith.constant 0 : i32
    %c0_i32_0 = arith.constant 0 : i32
    %c0_i32_1 = arith.constant 0 : i32
    return %c0_i32, %c0_i32_0 : i32, i32
  }
  func.func @transform_4(%arg0: i32) -> (i32, i32) {
    %c0_i32 = arith.constant 0 : i32
    %c0_i32_0 = arith.constant 0 : i32
    %c0_i32_1 = arith.constant 0 : i32
    return %c0_i32, %c0_i32_0 : i32, i32
  }
  func.func @transform_5(%arg0: i32) -> (i32, i32) {
    %c0_i32 = arith.constant 0 : i32
    %c0_i32_0 = arith.constant 0 : i32
    %c0_i32_1 = arith.constant 0 : i32
    return %c0_i32, %c0_i32_0 : i32, i32
  }
  func.func @transform_6(%arg0: i32) -> (i32, i32) {
    %c0_i32 = arith.constant 0 : i32
    %c0_i32_0 = arith.constant 0 : i32
    %c0_i32_1 = arith.constant 0 : i32
    return %c0_i32, %c0_i32_0 : i32, i32
  }
  func.func @transform_7(%arg0: i32) -> (i32, i32, i32, i32) {
    %c0_i32 = arith.constant 0 : i32
    %c0_i32_0 = arith.constant 0 : i32
    %c0_i32_1 = arith.constant 0 : i32
    %c0_i32_2 = arith.constant 0 : i32
    return %arg0, %c0_i32, %c0_i32_0, %c0_i32_1 : i32, i32, i32, i32
  }
  func.func @transform_8(%arg0: i32) -> (i32, i32, i32, i32) {
    %c0_i32 = arith.constant 0 : i32
    %c0_i32_0 = arith.constant 0 : i32
    %c0_i32_1 = arith.constant 0 : i32
    %c0_i32_2 = arith.constant 0 : i32
    return %arg0, %c0_i32, %c0_i32_0, %c0_i32_1 : i32, i32, i32, i32
  }
}

</mosaic_0001>

<bundles_post_ra>
// kernel: segnet_down2_forward.1
= control target key start
LH: loop header
LB: loop body
LE: loop exit
PB: predicated region body
PF: predicated region fallthrough
CT: control target
= control target key end

     0   :  { %s6667_s27 = smov 0   ;;  %s10178_s0 = inlined_call_operand.vmem [shape: bf16[2,16,16,128], index: 0, kind: input, shape index: {}]   ;;  %s10179_s1 = inlined_call_operand.vmem [shape: bf16[128,128], index: 1, kind: input, shape index: {}]   ;;  %s10180_s2 = inlined_call_operand.vmem [shape: f32[1,128], index: 2, kind: input, shape index: {}]   ;;  %s10181_s3 = inlined_call_operand.vmem [shape: f32[1,128], index: 3, kind: input, shape index: {}]   ;;  %s10182_s4 = inlined_call_operand.vmem [shape: bf16[128,128], index: 4, kind: input, shape index: {}]   ;;  %s10183_s5 = inlined_call_operand.vmem [shape: f32[1,128], index: 5, kind: input, shape index: {}]   ;;  %s10184_s6 = inlined_call_operand.vmem [shape: f32[1,128], index: 6, kind: input, shape index: {}]   ;;  %s10185_s7 = inlined_call_operand.vmem [shape: f32[2,8,8,128], index: 7, kind: output, shape index: {0}]   ;;  %s10186_s8 = inlined_call_operand.vmem [shape: s32[2,8,8,128], index: 8, kind: output, shape index: {1}]  }
   0x1 LB: > { %s5662_s28 = sadd.s32 4294967295, %s6609_s27   ;;  %p5666_p0 = scmp.ge.s32.totalorder %s6609_s27, 1  ;;  %s6609_s27 = sphi %s6667_s27, %s19_s27  }
   0x2   : > { %p265_p1 = scmp.lt.s32.totalorder %s6609_s27, 3 }
   0x4   : > { %p266_p2 = pnand %p5666_p0, %p265_p1 }
   0x6   : > { %269 = sbr.rel (%p266_p2) target bundleno = 1047 (0x417), region = 48 }
   0xb   : > { %v6565_v0 = vld [vmem:[%s10179_s1 + $0x38] sm:$0xff]   ;;  %p304_p3 = scmp.lt.s32.totalorder %s5662_s28, 1  ;;  %v6566_v1 = vld [vmem:[%s10179_s1 + $0x30] sm:$0xff]   ;;  %v6567_v2 = vld [vmem:[%s10179_s1 + $0x28] sm:$0xff]   ;;  %v6611_v22 = vmov 0.0   ;;  %vm816_vm0 = vcmask 1040384  }
   0xc   : > { %5810 = vmatprep.subr.bf16.mxu0 %v6565_v0  ;;  %v6568_v3 = vld [vmem:[%s10179_s1 + $0x20] sm:$0xff]   ;;  %v6569_v5 = vld [vmem:[%s10179_s1 + $0x18] sm:$0xff]   ;;  %v6570_v6 = vld [vmem:[%s10179_s1 + $0x10] sm:$0xff]   ;;  %v6721_v23 = vrot.slane %v6611_v22, 7  ;;  %vm982_vm1 = vcmask 1046528   ;;  %s6612_s29 = smov 8  }
   0xd   : > { %s10465_s28 = smov (!%p304_p3, %s5662_s28), 1  ;;  %5811 = vmatpush3.bf16.msra.mxu0 %v6565_v0  ;;  %v6571_v7 = vld [vmem:[%s10179_s1 + $0x8] sm:$0xff]   ;;  %v6572_v8 = vld [vmem:[%s10179_s1] sm:$0xff]   ;;  %vm1159_vm2 = vcmask 1045504   ;;  %s6613_s30 = smov 48   ;;  %vm1924_vm3 = vcmask 64512  }
   0xe   : > { %5812 = vmatprep.subr.bf16.mxu0 %v6566_v1  ;;  %s5759_s13 = sshll.u32 %s10465_s28, 7  ;;  %v6725_v24 = vsel %vm816_vm0, 0.0, %v6721_v23  ;;  %v933_v25 = vsel %vm816_vm0, %v6721_v23, 0.0  ;;  %v984_v27 = vrot.slane %v6721_v23, 1  ;;  %v1161_v34 = vrot.slane %v6721_v23, 2  ;;  %s6614_s9 = smov 16  }
   0xf   : > { %s6690_s16 = scalar_lea.vmem %s10178_s0, %s5759_s13  ;;  %v983_v26 = vrot.slane %v6725_v24, 1  ;;  %v986_v28 = vrot.slane %v933_v25, 1  ;;  %v1163_v32 = vrot.slane %v933_v25, 2  ;;  %v1160_v33 = vrot.slane %v6725_v24, 2  ;;  %v6753_v41 = vld [vmem:[%s10180_s2] ss:$0 sm:$0xff] }
  0x10   : > { %v6573_v4 = vld [vmem:[%s6690_s16] sm:$0xff]   ;;  %v6574_v9 = vld [vmem:[%s6690_s16 + $0x8] sm:$0xff]   ;;  %v6575_v10 = vld [vmem:[%s6690_s16 + $0x10] sm:$0xff]   ;;  %v5925_v37 = vpack.i.bf16 %v6721_v23, %v6725_v24  ;;  %s6615_s14 = smov 24   ;;  %s6616_s15 = smov 32   ;;  %vm1957_vm4 = vcmask 130048  }
  0x11   : > { %5813 = vmatpush3.bf16.msra.mxu0 %v6566_v1  ;;  %5826 = vmatprep.mubr.bf16.mxu0 %v6573_v4  ;;  %v6576_v11 = vld [vmem:[%s6690_s16 + $0x18] sm:$0xff]   ;;  %v6577_v12 = vld [vmem:[%s6690_s16 + $0x20] sm:$0xff]   ;;  %v6578_v13 = vld [vmem:[%s6690_s16 + $0x28] sm:$0xff]   ;;  %v985_v29 = vsel %vm982_vm1, %v983_v26, %v984_v27  ;;  %v987_v30 = vsel %vm982_vm1, %v984_v27, %v986_v28  ;;  %v1162_v35 = vsel %vm1159_vm2, %v1160_v33, %v1161_v34  ;;  %s6618_s19 = smov 40   ;;  %s6619_s20 = smov 64   ;;  %vm1990_vm5 = vcmask 195584  }
  0x12   : > { %5814 = vmatprep.subr.bf16.mxu0 %v6567_v2  ;;  %v6579_v14 = vld [vmem:[%s6690_s16 + $0x30] sm:$0xff]   ;;  %v6580_v15 = vld [vmem:[%s6690_s16 + $0x38] sm:$0xff]   ;;  %v6581_v16 = vld [vmem:[%s6690_s16 + $0x40] sm:$0xff]   ;;  %v6733_v31 = vpack.i.bf16 %v987_v30, %v985_v29  ;;  %v1164_v36 = vsel %vm1159_vm2, %v1161_v34, %v1163_v32  ;;  %5926 = vrot.lane.b32.xlu1 %v5925_v37, %s6613_s30  ;;  %vm2023_vm6 = vcmask 261120   ;;  %vm2056_vm7 = vcmask 326656  }
  0x13   : > { %v6582_v17 = vld [vmem:[%s6690_s16 + $0x48] sm:$0xff]   ;;  %v6583_v18 = vld [vmem:[%s6690_s16 + $0x50] sm:$0xff]   ;;  %v6584_v19 = vld [vmem:[%s6690_s16 + $0x58] sm:$0xff]   ;;  %v6743_v38 = vpack.i.bf16 %v1164_v36, %v1162_v35  ;;  %vm2089_vm8 = vcmask 392192   ;;  %vm2122_vm9 = vcmask 457728   ;;  %vm2155_vm10 = vcmask 523264  }
  0x14   : > { %v6585_v20 = vld [vmem:[%s6690_s16 + $0x60] sm:$0xff]   ;;  %v6586_v21 = vld [vmem:[%s6690_s16 + $0x68] sm:$0xff]   ;;  %5931 = vrot.lane.b32.xlu0 %v6733_v31, %s6612_s29  ;;  %v6587_v39 = vld [vmem:[%s6690_s16 + $0x70] sm:$0xff]   ;;  %vm2188_vm11 = vcmask 588800  }
  0x15   : > { %5815 = vmatpush3.bf16.msra.mxu0 %v6567_v2  ;;  %v6588_v40 = vld [vmem:[%s6690_s16 + $0x78] sm:$0xff]   ;;  %v6758_v43 = vld [vmem:[%s10181_s3] ss:$0 sm:$0xff]  ;;  %s6617_s16 = smov 56   ;;  %vm7188_vm12 = vmpackc.low %vm2188_vm11, %vm2188_vm11  ;;  %vm10195_vm11 = vcmask 1043459  }
  0x16   : > { %5816 = vmatprep.subr.bf16.mxu0 %v6568_v3 }
  0x18   : > { %5936 = vrot.lane.b32.xlu0 %v6743_v38, %s6614_s9 }
  0x19   : > { %5817 = vmatpush3.bf16.msra.mxu0 %v6568_v3 }
  0x1a   : > { %5818 = vmatprep.subr.bf16.mxu0 %v6569_v5 }
  0x1d   : > { %5819 = vmatpush3.bf16.msra.mxu0 %v6569_v5 }
  0x1e   : > { %5820 = vmatprep.subr.bf16.mxu0 %v6570_v6 }
  0x21   : > { %5821 = vmatpush3.bf16.msra.mxu0 %v6570_v6 }
  0x22   : > { %5822 = vmatprep.subr.bf16.mxu0 %v6571_v7 }
  0x25   : > { %5823 = vmatpush3.bf16.msra.mxu0 %v6571_v7 }
  0x26   : > { %5824 = vmatprep.subr.bf16.mxu0 %v6572_v8 }
  0x29   : > { %5825 = vmatpush3.bf16.msra.mxu0 %v6572_v8 }
  0x2c   : > { %5827 = vmatmul.mubr.bf16.vlgmr.msra.gmra.mxu0 %v6574_v9 }
  0x2d   : > { %5830 = vmatprep.mubr.bf16.mxu0 %v6575_v10 }
  0x34   : > { %5831 = vmatmul.mubr.bf16.gmra.mxu0 %v6576_v11 }
  0x35   : > { %5834 = vmatprep.mubr.bf16.mxu0 %v6577_v12 }
  0x3c   : > { %5835 = vmatmul.mubr.bf16.gmra.mxu0 %v6578_v13 }
  0x3d   : > { %5838 = vmatprep.mubr.bf16.mxu0 %v6579_v14 }
  0x44   : > { %5839 = vmatmul.mubr.bf16.gmra.mxu0 %v6580_v15 }
  0x45   : > { %5842 = vmatprep.mubr.bf16.mxu0 %v6581_v16 }
  0x4c   : > { %5843 = vmatmul.mubr.bf16.gmra.mxu0 %v6582_v17 }
  0x4d   : > { %5846 = vmatprep.mubr.bf16.mxu0 %v6583_v18 }
  0x54   : > { %5847 = vmatmul.mubr.bf16.gmra.mxu0 %v6584_v19 }
  0x55   : > { %5850 = vmatprep.mubr.bf16.mxu0 %v6585_v20 }
  0x5c   : > { %5851 = vmatmul.mubr.bf16.gmra.mxu0 %v6586_v21 }
  0x5d   : > { %5854 = vmatprep.mubr.bf16.mxu0 %v6587_v39 }
  0x64   : > { %5855 = vmatmul.mubr.bf16.gmra.mxu0 %v6588_v40 }
  0xec   : > { %v5828_v42 = vpop.f32.mrf.mxu0 }
  0xed   : > { %v682_v44 = vmul.f32 %v5828_v42, %v6753_v41 }
  0xee   : > { %v546_v45 = vpop.f32.mrf.mxu0 }
  0xef   : > { %v721_v46 = vadd.f32 %v6758_v43, %v682_v44  ;;  %v680_v47 = vmul.f32 %v6753_v41, %v546_v45 }
  0xf0   : > { %v5829_v48 = vpop.f32.mrf.mxu0 }
  0xf1   : > { %v753_v49 = vmax.f32 %v721_v46, 0.0  ;;  %v719_v50 = vadd.f32 %v6758_v43, %v680_v47  ;;  %v683_v51 = vmul.f32 %v5829_v48, %v6753_v41  ;;  %v6589_v46 = vld [vmem:[%s10182_s4 + $0x38] sm:$0xff]  }
  0xf2   : > { %v549_v52 = vpop.f32.mrf.mxu0  ;;  %5858 = vmatprep.subr.bf16.mxu1 %v6589_v46 }
  0xf3   : > { %v751_v53 = vmax.f32 %v719_v50, 0.0  ;;  %v722_v54 = vadd.f32 %v6758_v43, %v683_v51  ;;  %v681_v55 = vmul.f32 %v6753_v41, %v549_v52  ;;  %v822_v57 = vrot.slane %v753_v49, 7  ;;  %5859 = vmatpush3.bf16.msra.mxu1 %v6589_v46  ;;  %v6596_v46 = vld [vmem:[%s10182_s4] sm:$0xff]  }
  0xf4   : > { %v5832_v56 = vpop.f32.mrf.mxu0 }
  0xf5   : > { %v754_v58 = vmax.f32 %v722_v54, 0.0  ;;  %v720_v59 = vadd.f32 %v6758_v43, %v681_v55  ;;  %v819_v61 = vrot.slane %v751_v53, 7  ;;  %v6769_v1 = vsel %vm816_vm0, 0.0, %v822_v57 }
  0xf6   : > { %v562_v60 = vpop.f32.mrf.mxu0  ;;  %v1170_v13 = vrot.slane %v6769_v1, 2  ;;  %v993_v14 = vrot.slane %v6769_v1, 1  ;;  %v686_v18 = vmul.f32 %v5832_v56, %v6753_v41  ;;  %v6590_v56 = vld [vmem:[%s10182_s4 + $0x30] sm:$0xff]  }
  0xf7   : > { %v823_v62 = vrot.slane %v754_v58, 7  ;;  %v752_v63 = vmax.f32 %v720_v59, 0.0  ;;  %v6778_v6 = vsel %vm816_vm0, 0.0, %v819_v61  ;;  %v684_v12 = vmul.f32 %v6753_v41, %v562_v60  ;;  %5860 = vmatprep.subr.bf16.mxu1 %v6590_v56 }
  0xf8   : > { %v5833_v0 = vpop.f32.mrf.mxu0  ;;  %v725_v32 = vadd.f32 %v6758_v43, %v686_v18  ;;  %v988_v45 = vrot.slane %v6778_v6, 1  ;;  %v1165_v48 = vrot.slane %v6778_v6, 2  ;;  %5861 = vmatpush3.bf16.msra.mxu1 %v6590_v56 }
  0xf9   : > { %v6772_v2 = vsel %vm816_vm0, %v822_v57, %v823_v62  ;;  %v935_v3 = vsel %vm816_vm0, %v823_v62, 0.0  ;;  %v820_v4 = vrot.slane %v752_v63, 7  ;;  %v687_v19 = vmul.f32 %v5833_v0, %v6753_v41 }
  0xfa   : > { %v5940_v5 = vpack.i.bf16 %v6772_v2, %v6769_v1  ;;  %v565_v8 = vpop.f32.mrf.mxu0  ;;  %v996_v9 = vrot.slane %v935_v3, 1  ;;  %v1173_v10 = vrot.slane %v935_v3, 2  ;;  %v1171_v16 = vrot.slane %v6772_v2, 2  ;;  %v6591_v3 = vld [vmem:[%s10182_s4 + $0x28] sm:$0xff]  }
  0xfb   : > { %v6781_v7 = vsel %vm816_vm0, %v819_v61, %v820_v4  ;;  %v685_v15 = vmul.f32 %v6753_v41, %v565_v8  ;;  %v994_v17 = vrot.slane %v6772_v2, 1  ;;  %v723_v26 = vadd.f32 %v6758_v43, %v684_v12  ;;  %5862 = vmatprep.subr.bf16.mxu1 %v6591_v3 }
  0xfc   : > { %5941 = vrot.lane.b32.xlu1 %v5940_v5, %s6615_s14  ;;  %v5950_v11 = vpack.i.bf16 %v6781_v7, %v6778_v6  ;;  %v1172_v20 = vsel %vm1159_vm2, %v1170_v13, %v1171_v16  ;;  %v1174_v21 = vsel %vm1159_vm2, %v1171_v16, %v1173_v10  ;;  %v934_v30 = vsel %vm816_vm0, %v820_v4, 0.0  ;;  %v5836_v0 = vpop.f32.mrf.mxu0  ;;  %5863 = vmatpush3.bf16.msra.mxu1 %v6591_v3 }
  0xfd   : > { %v995_v22 = vsel %vm982_vm1, %v993_v14, %v994_v17  ;;  %v997_v25 = vsel %vm982_vm1, %v994_v17, %v996_v9  ;;  %v5960_v27 = vpack.i.bf16 %v1174_v21, %v1172_v20  ;;  %v724_v28 = vadd.f32 %v6758_v43, %v685_v15  ;;  %v6593_v17 = vld [vmem:[%s10182_s4 + $0x18] sm:$0xff]  }
  0xfe   : > { %5951 = vrot.lane.b32.xlu0 %v5950_v11, %s6615_s14  ;;  %v5955_v29 = vpack.i.bf16 %v997_v25, %v995_v22  ;;  %v726_v33 = vadd.f32 %v6758_v43, %v687_v19  ;;  %v755_v34 = vmax.f32 %v723_v26, 0.0  ;;  %v991_v35 = vrot.slane %v934_v30, 1  ;;  %v578_v10 = vpop.f32.mrf.mxu0  ;;  %v6592_v11 = vld [vmem:[%s10182_s4 + $0x20] sm:$0xff]   ;;  %v6594_v25 = vld [vmem:[%s10182_s4 + $0x10] sm:$0xff]  }
  0xff   : > { %v756_v36 = vmax.f32 %v724_v28, 0.0  ;;  %v989_v37 = vrot.slane %v6781_v7, 1  ;;  %v1168_v39 = vrot.slane %v934_v30, 2  ;;  %v757_v40 = vmax.f32 %v725_v32, 0.0  ;;  %5864 = vmatprep.subr.bf16.mxu1 %v6592_v11 }
 0x100   : > { %5946 = vrot.lane.b32.xlu1 %v5940_v5, %s6613_s30  ;;  %v758_v42 = vmax.f32 %v726_v33, 0.0  ;;  %v1166_v44 = vrot.slane %v6781_v7, 2  ;;  %v825_v47 = vrot.slane %v755_v34, 7  ;;  %v5837_v18 = vpop.f32.mrf.mxu0  ;;  %5865 = vmatpush3.bf16.msra.mxu1 %v6592_v11  ;;  %v690_v32 = vmul.f32 %v5836_v0, %v6753_v41  ;;  %v6595_v34 = vld [vmem:[%s10182_s4 + $0x8] sm:$0xff]  }
 0x101   : > { %v826_v49 = vrot.slane %v756_v36, 7  ;;  %v990_v50 = vsel %vm982_vm1, %v988_v45, %v989_v37  ;;  %v992_v51 = vsel %vm982_vm1, %v989_v37, %v991_v35  ;;  %v828_v52 = vrot.slane %v757_v40, 7  ;;  %5866 = vmatprep.subr.bf16.mxu1 %v6593_v17 }
 0x102   : > { %5961 = vrot.lane.b32.xlu0 %v5960_v27, %s6614_s9  ;;  %v829_v53 = vrot.slane %v758_v42, 7  ;;  %v1167_v54 = vsel %vm1159_vm2, %v1165_v48, %v1166_v44  ;;  %v1169_v55 = vsel %vm1159_vm2, %v1166_v44, %v1168_v39  ;;  %v5985_v57 = vpack.i.bf16 %v992_v51, %v990_v50  ;;  %v581_v26 = vpop.f32.mrf.mxu0 }
 0x103   : > { %v6826_v58 = vsel %vm816_vm0, 0.0, %v825_v47  ;;  %v6829_v59 = vsel %vm816_vm0, %v825_v47, %v826_v49  ;;  %v5990_v60 = vpack.i.bf16 %v1169_v55, %v1167_v54  ;;  %v6832_v61 = vsel %vm816_vm0, 0.0, %v828_v52 }
 0x104   : > { %5956 = vrot.lane.b32.xlu1 %v5955_v29, %s6612_s29  ;;  %v6835_v62 = vsel %vm816_vm0, %v828_v52, %v829_v53  ;;  %v937_v63 = vsel %vm816_vm0, %v829_v53, 0.0  ;;  %v6015_v4 = vpack.i.bf16 %v6829_v59, %v6826_v58  ;;  %v1003_v8 = vrot.slane %v6832_v61, 1  ;;  %5867 = vmatpush3.bf16.msra.mxu1 %v6593_v17 }
 0x105   : > { %v1006_v5 = vrot.slane %v937_v63, 1  ;;  %v1004_v9 = vrot.slane %v6835_v62, 1  ;;  %v1183_v12 = vrot.slane %v937_v63, 2  ;;  %v1180_v15 = vrot.slane %v6832_v61, 2  ;;  %5868 = vmatprep.subr.bf16.mxu1 %v6594_v25 }
 0x106   : > { %5966 = vrot.lane.b32.xlu0 %v5955_v29, %s6616_s15  ;;  %v1181_v16 = vrot.slane %v6835_v62, 2  ;;  %v6005_v20 = vpack.i.bf16 %v6835_v62, %v6832_v61  ;;  %v689_v30 = vmul.f32 %v6753_v41, %v581_v26  ;;  %v691_v33 = vmul.f32 %v5837_v18, %v6753_v41 }
 0x107   : > { %v1005_v13 = vsel %vm982_vm1, %v1003_v8, %v1004_v9  ;;  %v1007_v14 = vsel %vm982_vm1, %v1004_v9, %v1006_v5  ;;  %v998_v39 = vrot.slane %v6826_v58, 1  ;;  %v999_v40 = vrot.slane %v6829_v59, 1 }
 0x108   : > { %5976 = vrot.lane.b32.xlu1 %v5955_v29, %s6617_s16  ;;  %v6025_v19 = vpack.i.bf16 %v1007_v14, %v1005_v13  ;;  %v1182_v21 = vsel %vm1159_vm2, %v1180_v15, %v1181_v16  ;;  %v1184_v22 = vsel %vm1159_vm2, %v1181_v16, %v1183_v12  ;;  %v936_v29 = vsel %vm816_vm0, %v826_v49, 0.0  ;;  %5869 = vmatpush3.bf16.msra.mxu1 %v6594_v25  ;;  %v5840_v16 = vpop.f32.mrf.mxu0 }
 0x109   : > { %v6030_v28 = vpack.i.bf16 %v1184_v22, %v1182_v21  ;;  %v1001_v35 = vrot.slane %v936_v29, 1  ;;  %v728_v37 = vadd.f32 %v6758_v43, %v689_v30  ;;  %5870 = vmatprep.subr.bf16.mxu1 %v6595_v34  ;;  %v729_v42 = vadd.f32 %v6758_v43, %v690_v32 }
 0x10a   : > { %5971 = vrot.lane.b32.xlu0 %v5960_v27, %s6618_s19  ;;  %v730_v44 = vadd.f32 %v6758_v43, %v691_v33  ;;  %v1178_v45 = vrot.slane %v936_v29, 2  ;;  %v1175_v48 = vrot.slane %v6826_v58, 2  ;;  %v1000_v50 = vsel %vm982_vm1, %v998_v39, %v999_v40  ;;  %v594_v22 = vpop.f32.mrf.mxu0 }
 0x10b   : > { %v760_v49 = vmax.f32 %v728_v37, 0.0  ;;  %v1002_v51 = vsel %vm982_vm1, %v999_v40, %v1001_v35  ;;  %v1176_v52 = vrot.slane %v6829_v59, 2  ;;  %v761_v53 = vmax.f32 %v729_v42, 0.0 }
 0x10c   : > { %5981 = vrot.lane.b32.xlu1 %v5960_v27, %s6619_s20  ;;  %v688_v27 = vmul.f32 %v6753_v41, %v578_v10  ;;  %5871 = vmatpush3.bf16.msra.mxu1 %v6595_v34  ;;  %v762_v54 = vmax.f32 %v730_v44, 0.0  ;;  %v6065_v56 = vpack.i.bf16 %v1002_v51, %v1000_v50  ;;  %v5841_v29 = vpop.f32.mrf.mxu0  ;;  %v694_v30 = vmul.f32 %v5840_v16, %v6753_v41 }
 0x10d   : > { %5872 = vmatprep.subr.bf16.mxu1 %v6596_v46  ;;  %v1179_v63 = vsel %vm1159_vm2, %v1176_v52, %v1178_v45  ;;  %v834_v0 = vrot.slane %v761_v53, 7  ;;  %v695_v33 = vmul.f32 %v5841_v29, %v6753_v41  ;;  %v692_v37 = vmul.f32 %v6753_v41, %v594_v22 }
 0x10e   : > { %5986 = vrot.lane.b32.xlu0 %v5985_v57, %s6612_s29  ;;  %v727_v36 = vadd.f32 %v6758_v43, %v688_v27  ;;  %v835_v3 = vrot.slane %v762_v54, 7  ;;  %v597_v34 = vpop.f32.mrf.mxu0 }
 0x10f   : > { %v6908_v9 = vsel %vm816_vm0, 0.0, %v834_v0  ;;  %v734_v39 = vadd.f32 %v6758_v43, %v695_v33  ;;  %v693_v40 = vmul.f32 %v6753_v41, %v597_v34 }
 0x110   : > { %5991 = vrot.lane.b32.xlu1 %v5990_v60, %s6614_s9  ;;  %v759_v47 = vmax.f32 %v727_v36, 0.0  ;;  %5873 = vmatpush3.bf16.msra.mxu1 %v6596_v46  ;;  %v6911_v10 = vsel %vm816_vm0, %v834_v0, %v835_v3  ;;  %v939_v11 = vsel %vm816_vm0, %v835_v3, 0.0  ;;  %v1013_v14 = vrot.slane %v6908_v9, 1 }
 0x111   : > { %v1016_v13 = vrot.slane %v939_v11, 1  ;;  %v1014_v15 = vrot.slane %v6911_v10, 1  ;;  %v1193_v17 = vrot.slane %v939_v11, 2  ;;  %v1191_v21 = vrot.slane %v6911_v10, 2 }
 0x112   : > { %6016 = vrot.lane.b32.xlu0 %v6015_v4, %s6615_s14  ;;  %v831_v55 = vrot.slane %v759_v47, 7  ;;  %v6085_v26 = vpack.i.bf16 %v6911_v10, %v6908_v9  ;;  %v733_v36 = vadd.f32 %v6758_v43, %v694_v30  ;;  %v732_v50 = vadd.f32 %v6758_v43, %v693_v40 }
 0x113   : > { %v1015_v18 = vsel %vm982_vm1, %v1013_v14, %v1014_v15 }
 0x114   : > { %5996 = vrot.lane.b32.xlu1 %v5985_v57, %s6616_s15  ;;  %v832_v57 = vrot.slane %v760_v49, 7  ;;  %v6902_v5 = vsel %vm816_vm0, 0.0, %v831_v55  ;;  %v765_v47 = vmax.f32 %v733_v36, 0.0  ;;  %v766_v49 = vmax.f32 %v734_v39, 0.0 }
 0x115   : > { %v1008_v44 = vrot.slane %v6902_v5, 1  ;;  %v1185_v53 = vrot.slane %v6902_v5, 2 }
 0x116   : > { %6021 = vrot.lane.b32.xlu0 %v6015_v4, %s6613_s30  ;;  %v6905_v8 = vsel %vm816_vm0, %v831_v55, %v832_v57  ;;  %v938_v35 = vsel %vm816_vm0, %v832_v57, 0.0  ;;  %v840_v55 = vrot.slane %v765_v47, 7  ;;  %v841_v57 = vrot.slane %v766_v49, 7 }
 0x117   : > { %v6095_v12 = vpack.i.bf16 %v6905_v8, %v6902_v5  ;;  %v1011_v42 = vrot.slane %v938_v35, 1  ;;  %v1009_v45 = vrot.slane %v6905_v8, 1  ;;  %v1188_v46 = vrot.slane %v938_v35, 2 }
 0x118   : > { %6001 = vrot.lane.b32.xlu1 %v5990_v60, %s6618_s19  ;;  %v1177_v60 = vsel %vm1159_vm2, %v1175_v48, %v1176_v52  ;;  %v731_v48 = vadd.f32 %v6758_v43, %v692_v37  ;;  %v1186_v54 = vrot.slane %v6905_v8, 2 }
 0x119   : > { %v6070_v4 = vpack.i.bf16 %v1179_v63, %v1177_v60  ;;  %v1010_v51 = vsel %vm982_vm1, %v1008_v44, %v1009_v45  ;;  %v1012_v52 = vsel %vm982_vm1, %v1009_v45, %v1011_v42  ;;  %v764_v63 = vmax.f32 %v732_v50, 0.0 }
 0x11a   : > { %6026 = vrot.lane.b32.xlu0 %v6025_v19, %s6612_s29  ;;  %v6145_v60 = vpack.i.bf16 %v1012_v52, %v1010_v51  ;;  %v1187_v0 = vsel %vm1159_vm2, %v1185_v53, %v1186_v54  ;;  %v1189_v3 = vsel %vm1159_vm2, %v1186_v54, %v1188_v46 }
 0x11b   : > { %v6150_v11 = vpack.i.bf16 %v1189_v3, %v1187_v0  ;;  %v838_v14 = vrot.slane %v764_v63, 7 }
 0x11c   : > { %6006 = vrot.lane.b32.xlu1 %v6005_v20, %s6615_s14 }
 0x11d   : > { %v940_v37 = vsel %vm816_vm0, %v838_v14, 0.0 }
 0x11e   : > { %6031 = vrot.lane.b32.xlu0 %v6030_v28, %s6614_s9  ;;  %v1198_v51 = vrot.slane %v940_v37, 2 }
 0x120   : > { %6011 = vrot.lane.b32.xlu1 %v6005_v20, %s6613_s30  ;;  %v1190_v20 = vrot.slane %v6908_v9, 2 }
 0x122   : > { %6036 = vrot.lane.b32.xlu0 %v6025_v19, %s6616_s15  ;;  %v1192_v27 = vsel %vm1159_vm2, %v1190_v20, %v1191_v21  ;;  %v941_v20 = vsel %vm816_vm0, %v841_v57, 0.0 }
 0x123   : > { %v1026_v22 = vrot.slane %v941_v20, 1  ;;  %v1203_v29 = vrot.slane %v941_v20, 2 }
 0x124   : > { %6046 = vrot.lane.b32.xlu1 %v6025_v19, %s6617_s16  ;;  %v1017_v19 = vsel %vm982_vm1, %v1014_v15, %v1016_v13  ;;  %v6963_v13 = vsel %vm816_vm0, %v840_v55, %v841_v57  ;;  %v5844_v15 = vpop.f32.mrf.mxu0 }
 0x125   : > { %v6105_v25 = vpack.i.bf16 %v1017_v19, %v1015_v18  ;;  %v1201_v36 = vrot.slane %v6963_v13, 2 }
 0x126   : > { %6041 = vrot.lane.b32.xlu0 %v6030_v28, %s6618_s19  ;;  %v610_v19 = vpop.f32.mrf.mxu0 }
 0x127   : > { %v696_v40 = vmul.f32 %v6753_v41, %v610_v19  ;;  %v1204_v47 = vsel %vm1159_vm2, %v1201_v36, %v1203_v29 }
 0x128   : > { %6051 = vrot.lane.b32.xlu1 %v6030_v28, %s6619_s20  ;;  %v1194_v28 = vsel %vm1159_vm2, %v1191_v21, %v1193_v17 }
 0x129   : > { %v6110_v32 = vpack.i.bf16 %v1194_v28, %v1192_v27  ;;  %v5845_v27 = vpop.f32.mrf.mxu0  ;;  %v698_v28 = vmul.f32 %v5844_v15, %v6753_v41  ;;  %v735_v54 = vadd.f32 %v6758_v43, %v696_v40 }
 0x12a   : > { %6066 = vrot.lane.b32.xlu0 %v6065_v56, %s6617_s16  ;;  %v699_v30 = vmul.f32 %v5845_v27, %v6753_v41 }
 0x12b   : > { %v613_v34 = vpop.f32.mrf.mxu0  ;;  %v737_v39 = vadd.f32 %v6758_v43, %v698_v28 }
 0x12c   : > { %6056 = vrot.lane.b32.xlu1 %v6065_v56, %s6612_s29  ;;  %v697_v44 = vmul.f32 %v6753_v41, %v613_v34  ;;  %v738_v45 = vadd.f32 %v6758_v43, %v699_v30 }
 0x12d   : > { %v769_v52 = vmax.f32 %v737_v39, 0.0 }
 0x12e   : > { %6071 = vrot.lane.b32.xlu0 %v6070_v4, %s6619_s20 }
 0x12f   : > { %v846_v3 = vrot.slane %v769_v52, 7 }
 0x130   : > { %6061 = vrot.lane.b32.xlu1 %v6070_v4, %s6614_s9 }
 0x131   : > { %v7020_v27 = vsel %vm816_vm0, 0.0, %v846_v3 }
 0x132   : > { %6096 = vrot.lane.b32.xlu0 %v6095_v12, %s6615_s14  ;;  %10204 = vst [vmem:[#allocation3_spill] sm:$0xff] %v7020_v27  ;;  %v1033_v40 = vrot.slane %v7020_v27, 1  ;;  %v1210_v52 = vrot.slane %v7020_v27, 2 }
 0x134   : > { %6076 = vrot.lane.b32.xlu1 %v6065_v56, %s6616_s15  ;;  %v763_v56 = vmax.f32 %v731_v48, 0.0  ;;  %v1021_v48 = vrot.slane %v940_v37, 1 }
 0x136   : > { %6101 = vrot.lane.b32.xlu0 %v6095_v12, %s6613_s30  ;;  %v6960_v12 = vsel %vm816_vm0, 0.0, %v840_v55  ;;  %v770_v55 = vmax.f32 %v738_v45, 0.0 }
 0x137   : > { %v6170_v16 = vpack.i.bf16 %v6963_v13, %v6960_v12  ;;  %v1200_v35 = vrot.slane %v6960_v12, 2 }
 0x138   : > { %6081 = vrot.lane.b32.xlu1 %v6070_v4, %s6618_s19  ;;  %v837_v4 = vrot.slane %v763_v56, 7  ;;  %v736_v56 = vadd.f32 %v6758_v43, %v697_v44  ;;  %v847_v15 = vrot.slane %v770_v55, 7 }
 0x139   : > { %v1202_v46 = vsel %vm1159_vm2, %v1200_v35, %v1201_v36 }
 0x13a   : > { %6106 = vrot.lane.b32.xlu0 %v6105_v25, %s6612_s29  ;;  %v6970_v17 = vsel %vm816_vm0, 0.0, %v837_v4  ;;  %v6973_v18 = vsel %vm816_vm0, %v837_v4, %v838_v14  ;;  %v6190_v53 = vpack.i.bf16 %v1204_v47, %v1202_v46  ;;  %v767_v4 = vmax.f32 %v735_v54, 0.0 }
 0x13b   : > { %v6175_v21 = vpack.i.bf16 %v6973_v18, %v6970_v17  ;;  %v1018_v49 = vrot.slane %v6970_v17, 1  ;;  %v1019_v50 = vrot.slane %v6973_v18, 1  ;;  %v1195_v63 = vrot.slane %v6970_v17, 2 }
 0x13c   : > { %6086 = vrot.lane.b32.xlu1 %v6085_v26, %s6615_s14  ;;  %v1196_v0 = vrot.slane %v6973_v18, 2  ;;  %v7023_v28 = vsel %vm816_vm0, %v846_v3, %v847_v15  ;;  %v943_v30 = vsel %vm816_vm0, %v847_v15, 0.0 }
 0x13d   : > { %v1020_v57 = vsel %vm982_vm1, %v1018_v49, %v1019_v50  ;;  %10205 = vst [vmem:[#allocation4_spill] sm:$0xff] %v7023_v28  ;;  %v6245_v35 = vpack.i.bf16 %v7023_v28, %v7020_v27  ;;  %v1036_v37 = vrot.slane %v943_v30, 1  ;;  %v1213_v45 = vrot.slane %v943_v30, 2 }
 0x13e   : > { %6111 = vrot.lane.b32.xlu0 %v6110_v32, %s6614_s9  ;;  %v1197_v19 = vsel %vm1159_vm2, %v1195_v63, %v1196_v0  ;;  %v1199_v20 = vsel %vm1159_vm2, %v1196_v0, %v1198_v51 }
 0x140   : > { %6091 = vrot.lane.b32.xlu1 %v6085_v26, %s6613_s30  ;;  %v1024_v26 = vrot.slane %v6963_v13, 1 }
 0x142   : > { %6116 = vrot.lane.b32.xlu0 %v6105_v25, %s6616_s15  ;;  %v1027_v33 = vsel %vm982_vm1, %v1024_v26, %v1026_v22  ;;  %v843_v22 = vrot.slane %v767_v4, 7 }
 0x144   : > { %6126 = vrot.lane.b32.xlu1 %v6105_v25, %s6617_s16  ;;  %v1023_v25 = vrot.slane %v6960_v12, 1 }
 0x146   : > { %6121 = vrot.lane.b32.xlu0 %v6110_v32, %s6618_s19 }
 0x148   : > { %6131 = vrot.lane.b32.xlu1 %v6110_v32, %s6619_s20  ;;  %v1025_v32 = vsel %vm982_vm1, %v1023_v25, %v1024_v26  ;;  %v6220_v25 = vpack.i.bf16 %v1199_v20, %v1197_v19  ;;  %v5848_v26 = vpop.f32.mrf.mxu0 }
 0x149   : > { %v6185_v42 = vpack.i.bf16 %v1027_v33, %v1025_v32  ;;  %v7031_v33 = vsel %vm816_vm0, 0.0, %v843_v22  ;;  %v702_v63 = vmul.f32 %v5848_v26, %v6753_v41 }
 0x14a   : > { %6146 = vrot.lane.b32.xlu0 %v6145_v60, %s6617_s16  ;;  %v626_v36 = vpop.f32.mrf.mxu0 }
 0x14b   : > { %v700_v0 = vmul.f32 %v6753_v41, %v626_v36 }
 0x14c   : > { %6136 = vrot.lane.b32.xlu1 %v6145_v60, %s6612_s29  ;;  %v5849_v49 = vpop.f32.mrf.mxu0 }
 0x14d   : > { %v703_v55 = vmul.f32 %v5849_v49, %v6753_v41 }
 0x14e   : > { %6151 = vrot.lane.b32.xlu0 %v6150_v11, %s6619_s20  ;;  %v629_v3 = vpop.f32.mrf.mxu0 }
 0x14f   : > { %v701_v26 = vmul.f32 %v6753_v41, %v629_v3 }
 0x150   : > { %6141 = vrot.lane.b32.xlu1 %v6150_v11, %s6614_s9 }
 0x152   : > { %6171 = vrot.lane.b32.xlu0 %v6170_v16, %s6613_s30 }
 0x154   : > { %6156 = vrot.lane.b32.xlu1 %v6145_v60, %s6616_s15  ;;  %v1022_v60 = vsel %vm982_vm1, %v1019_v50, %v1021_v48 }
 0x155   : > { %v6215_v14 = vpack.i.bf16 %v1022_v60, %v1020_v57 }
 0x156   : > { %6176 = vrot.lane.b32.xlu0 %v6175_v21, %s6615_s14 }
 0x158   : > { %6161 = vrot.lane.b32.xlu1 %v6150_v11, %s6618_s19  ;;  %v7011_v11 = vpop.permute.xlu0 %5931 }
 0x159   : > { %v5934_v41 = vunpack.i.h.bf16 %v7011_v11 }
 0x15a   : > { %6181 = vrot.lane.b32.xlu0 %v6175_v21, %s6613_s30  ;;  %v7017_v21 = vpop.permute.xlu1 %5926 }
 0x15b   : > { %10203 = vst [vmem:[#allocation2_spill] sm:$0xff] %v7017_v21 }
 0x15c   : > { %6166 = vrot.lane.b32.xlu1 %v6170_v16, %s6615_s14  ;;  %v768_v16 = vmax.f32 %v736_v56, 0.0  ;;  %v7027_v32 = vpop.permute.xlu0 %5936 }
 0x15d   : > { %v5939_v3 = vunpack.i.h.bf16 %v7027_v32 }
 0x15e   : > { %6186 = vrot.lane.b32.xlu0 %v6185_v42, %s6612_s29  ;;  %v844_v29 = vrot.slane %v768_v16, 7  ;;  %v1028_v16 = vrot.slane %v7031_v33, 1 }
 0x160   : > { %6196 = vrot.lane.b32.xlu1 %v6185_v42, %s6616_s15  ;;  %v7038_v39 = vsel %vm816_vm0, %v843_v22, %v844_v29  ;;  %v942_v46 = vsel %vm816_vm0, %v844_v29, 0.0  ;;  %v742_v22 = vadd.f32 %v6758_v43, %v703_v55 }
 0x161   : > { %v6255_v48 = vpack.i.bf16 %v7038_v39, %v7031_v33  ;;  %v1031_v56 = vrot.slane %v942_v46, 1  ;;  %v1029_v19 = vrot.slane %v7038_v39, 1  ;;  %v1208_v29 = vrot.slane %v942_v46, 2 }
 0x162   : > { %6191 = vrot.lane.b32.xlu0 %v6190_v53, %s6614_s9  ;;  %v1206_v49 = vrot.slane %v7038_v39, 2  ;;  %v5933_v46 = vunpack.i.l.bf16 %v7011_v11  ;;  %v1926_v11 = vsel %vm1924_vm3, %v6721_v23, %v5934_v41 }
 0x164   : > { %6201 = vrot.lane.b32.xlu1 %v6190_v53, %s6618_s19 }
 0x166   : > { %6206 = vrot.lane.b32.xlu0 %v6185_v42, %s6617_s16  ;;  %v1034_v42 = vrot.slane %v7023_v28, 1 }
 0x168   : > { %6216 = vrot.lane.b32.xlu1 %v6215_v14, %s6612_s29  ;;  %v1035_v50 = vsel %vm982_vm1, %v1033_v40, %v1034_v42  ;;  %v1037_v51 = vsel %vm982_vm1, %v1034_v42, %v1036_v37  ;;  %v739_v37 = vadd.f32 %v6758_v43, %v700_v0  ;;  %v1030_v40 = vsel %vm982_vm1, %v1028_v16, %v1029_v19 }
 0x169   : > { %v7062_v60 = vpack.i.bf16 %v1037_v51, %v1035_v50  ;;  %v1032_v42 = vsel %vm982_vm1, %v1029_v19, %v1031_v56  ;;  %v774_v51 = vmax.f32 %v742_v22, 0.0  ;;  %v1209_v0 = vsel %vm1159_vm2, %v1206_v49, %v1208_v29 }
 0x16a   : > { %6211 = vrot.lane.b32.xlu0 %v6190_v53, %s6619_s20  ;;  %v1211_v53 = vrot.slane %v7023_v28, 2  ;;  %v7097_v56 = vpack.i.bf16 %v1032_v42, %v1030_v40  ;;  %v1959_v29 = vsel %vm1957_vm4, %v1926_v11, %v5939_v3 }
 0x16c   : > { %6221 = vrot.lane.b32.xlu1 %v6220_v25, %s6614_s9  ;;  %v1212_v4 = vsel %vm1159_vm2, %v1210_v52, %v1211_v53  ;;  %v1214_v15 = vsel %vm1159_vm2, %v1211_v53, %v1213_v45  ;;  %v1205_v45 = vrot.slane %v7031_v33, 2  ;;  %v771_v53 = vmax.f32 %v739_v37, 0.0 }
 0x16d   : > { %v7080_v36 = vpack.i.bf16 %v1214_v15, %v1212_v4  ;;  %v1925_v4 = vsel %vm1924_vm3, %v6725_v24, %v5933_v46  ;;  %v853_v15 = vrot.slane %v774_v51, 7 }
 0x16e   : > { %v7033_v34 = vpop.permute.xlu1 %5941  ;;  %6226 = vrot.lane.b32.xlu0 %v6215_v14, %s6617_s16  ;;  %v849_v22 = vrot.slane %v771_v53, 7 }
 0x16f   : > { %v7122_v24 = vsel %vm816_vm0, %v853_v15, 0.0  ;;  %v5944_v28 = vunpack.i.h.bf16 %v7033_v34 }
 0x170   : > { %v7043_v44 = vpop.permute.xlu0 %5951  ;;  %6246 = vrot.lane.b32.xlu1 %v6245_v35, %s6615_s14  ;;  %v7130_v42 = vsel %vm816_vm0, 0.0, %v849_v22  ;;  %v1046_v46 = vrot.slane %v7122_v24, 1 }
 0x171   : > { %10207 = vst [vmem:[#allocation6_spill] sm:$0xff] %v7130_v42 }
 0x172   : > { %v7047_v47 = vpop.permute.xlu1 %5946  ;;  %6231 = vrot.lane.b32.xlu0 %v6220_v25, %s6619_s20 }
 0x174   : > { %6256 = vrot.lane.b32.xlu1 %v6255_v48, %s6613_s30  ;;  %v7057_v54 = vpop.permute.xlu0 %5961 }
 0x176   : > { %v7060_v57 = vpop.permute.xlu1 %5956  ;;  %6236 = vrot.lane.b32.xlu0 %v6215_v14, %s6616_s15  ;;  %v741_v14 = vadd.f32 %v6758_v43, %v702_v63  ;;  %v1207_v63 = vsel %vm1159_vm2, %v1205_v45, %v1206_v49  ;;  %v5954_v45 = vunpack.i.h.bf16 %v7043_v44  ;;  %v5953_v49 = vunpack.i.l.bf16 %v7043_v44  ;;  %v5852_v44 = vpop.f32.mrf.mxu0 }
 0x177   : > { %v7114_v23 = vpack.i.bf16 %v1209_v0, %v1207_v63 }
 0x178   : > { %6276 = vrot.lane.b32.xlu1 %v7062_v60, %s6616_s15  ;;  %v7073_v20 = vpop.permute.xlu0 %5966  ;;  %v773_v52 = vmax.f32 %v741_v14, 0.0  ;;  %v1992_v11 = vsel %vm1990_vm5, %v1959_v29, %v5954_v45 }
 0x17a   : > { %v7077_v30 = vpop.permute.xlu1 %5976  ;;  %6241 = vrot.lane.b32.xlu0 %v6220_v25, %s6618_s19  ;;  %v740_v25 = vadd.f32 %v6758_v43, %v701_v26  ;;  %v5938_v43 = vunpack.i.l.bf16 %v7027_v32  ;;  %v852_v19 = vrot.slane %v773_v52, 7 }
 0x17b   : > { %v5979_v29 = vunpack.i.h.bf16 %v7077_v30 }
 0x17c   : > { %6281 = vrot.lane.b32.xlu1 %v7080_v36, %s6618_s19  ;;  %v7092_v50 = vpop.permute.xlu0 %5971  ;;  %v772_v16 = vmax.f32 %v740_v25, 0.0  ;;  %v1958_v32 = vsel %vm1957_vm4, %v1925_v4, %v5938_v43  ;;  %v7127_v40 = vsel %vm816_vm0, 0.0, %v852_v19  ;;  %v7135_v41 = vsel %vm816_vm0, %v852_v19, %v853_v15 }
 0x17d   : > { %10206 = vst [vmem:[#allocation5_spill] sm:$0xff] %v7127_v40  ;;  %10208 = vst [vmem:[#allocation7_spill] sm:$0xff] %v7135_v41  ;;  %v7149_v0 = vpack.i.bf16 %v7135_v41, %v7127_v40  ;;  %v1991_v3 = vsel %vm1990_vm5, %v1958_v32, %v5953_v49  ;;  %v5949_v15 = vunpack.i.h.bf16 %v7047_v47  ;;  %v5978_v32 = vunpack.i.l.bf16 %v7077_v30 }
 0x17e   : > { %v7095_v55 = vpop.permute.xlu1 %5981  ;;  %6251 = vrot.lane.b32.xlu0 %v6245_v35, %s6613_s30  ;;  %v850_v14 = vrot.slane %v772_v16, 7  ;;  %v5948_v16 = vunpack.i.l.bf16 %v7047_v47 }
 0x17f   : > { %v5984_v47 = vunpack.i.h.bf16 %v7095_v55 }
 0x180   : > { %6296 = vrot.lane.b32.xlu1 %v7097_v56, %s6612_s29  ;;  %v7110_v35 = vpop.permute.xlu0 %5986  ;;  %v7143_v52 = vsel %vm816_vm0, %v849_v22, %v850_v14 }
 0x181   : > { %10209 = vst [vmem:[#allocation8_spill] sm:$0xff] %v7143_v52  ;;  %v1039_v27 = vrot.slane %v7143_v52, 1 }
 0x182   : > { %v7112_v26 = vpop.permute.xlu1 %5991  ;;  %6261 = vrot.lane.b32.xlu0 %v6255_v48, %s6615_s14 }
 0x184   : > { %6301 = vrot.lane.b32.xlu1 %v7114_v23, %s6614_s9  ;;  %v7124_v37 = vpop.permute.xlu0 %6016 }
 0x186   : > { %v5997_v48 = vpop.permute.xlu1 %5996  ;;  %6266 = vrot.lane.b32.xlu0 %v7062_v60, %s6612_s29 }
 0x187   : > { %v5999_v51 = vunpack.i.h.bf16 %v5997_v48  ;;  %v5998_v25 = vunpack.i.l.bf16 %v5997_v48 }
 0x188   : > { %6306 = vrot.lane.b32.xlu1 %v7097_v56, %s6617_s16  ;;  %v7145_v53 = vpop.permute.xlu0 %6021 }
 0x189   : > { %v2025_v19 = vsel %vm2023_vm6, %v1992_v11, %v5999_v51  ;;  %v2024_v22 = vsel %vm2023_vm6, %v1991_v3, %v5998_v25  ;;  %v5983_v51 = vunpack.i.l.bf16 %v7095_v55 }
 0x18a   : > { %v6002_v63 = vpop.permute.xlu1 %6001  ;;  %6271 = vrot.lane.b32.xlu0 %v7080_v36, %s6614_s9 }
 0x18b   : > { %v6004_v43 = vunpack.i.h.bf16 %v6002_v63  ;;  %v6003_v4 = vunpack.i.l.bf16 %v6002_v63  ;;  %v642_v63 = vpop.f32.mrf.mxu0 }
 0x18c   : > { %6311 = vrot.lane.b32.xlu1 %v7114_v23, %s6619_s20  ;;  %v7165_v49 = vpop.permute.xlu0 %6026 }
 0x18d   : > { %v2057_v48 = vsel %vm2056_vm7, %v2024_v22, %v6003_v4  ;;  %v2058_v45 = vsel %vm2056_vm7, %v2025_v19, %v6004_v43  ;;  %v1043_v4 = vrot.slane %v7127_v40, 1  ;;  %v1044_v19 = vrot.slane %v7135_v41, 1 }
 0x18e   : > { %v7169_v11 = vpop.permute.xlu1 %6006  ;;  %v2090_v25 = vsel %vm2089_vm8, %v2057_v48, %v5948_v16  ;;  %v2091_v3 = vsel %vm2089_vm8, %v2058_v45, %v5949_v15  ;;  %6286 = vrot.lane.b32.xlu0 %v7062_v60, %s6617_s16  ;;  %v7180_v22 = vsel %vm816_vm0, %v850_v14, 0.0  ;;  %v5989_v16 = vunpack.i.h.bf16 %v7110_v35  ;;  %v5853_v48 = vpop.f32.mrf.mxu0 }
 0x18f   : > { %v2123_v30 = vsel %vm2122_vm9, %v2090_v25, %v5978_v32  ;;  %v2124_v43 = vsel %vm2122_vm9, %v2091_v3, %v5979_v29  ;;  %v5988_v29 = vunpack.i.l.bf16 %v7110_v35  ;;  %v1223_v45 = vrot.slane %v7122_v24, 2 }
 0x190   : > { %6326 = vrot.lane.b32.xlu1 %v7149_v0, %s6615_s14  ;;  %v2156_v55 = vsel %vm2155_vm10, %v2123_v30, %v5983_v51  ;;  %v2157_v15 = vsel %vm2155_vm10, %v2124_v43, %v5984_v47  ;;  %v7194_v32 = vpop.permute.xlu0 %6031  ;;  %v7201_v47 = vpack.i.bf16 %v7143_v52, %v7130_v42  ;;  %v7206_v51 = vld [vmem:[%s10180_s2] ss:$0 sm:$0xff]  ;;  %v1220_v35 = vrot.slane %v7127_v40, 2 }
 0x191   : > { %v5708_v14 = vpack.c.bf16 %v2157_v15, %v2156_v55  ;;  %v706_v3 = vmul.f32 %v7206_v51, %v5852_v44  ;;  %v1045_v24 = vsel %vm982_vm1, %v1043_v4, %v1044_v19  ;;  %v1047_v30 = vsel %vm982_vm1, %v1044_v19, %v1046_v46 }
 0x192   : > { %v7197_v25 = vpop.permute.xlu1 %6011  ;;  %6291 = vrot.lane.b32.xlu0 %v7080_v36, %s6619_s20  ;;  %v1221_v43 = vrot.slane %v7135_v41, 2  ;;  %v704_v55 = vmul.f32 %v7206_v51, %v642_v63  ;;  %v1041_v15 = vrot.slane %v7180_v22, 1  ;;  %v5994_v44 = vunpack.i.h.bf16 %v7112_v26 }
 0x193   : > { %5874 = vmatprep.mubr.msk.bf16.mxu1 %vm7188_vm12, %v5708_v14  ;;  %v5993_v40 = vunpack.i.l.bf16 %v7112_v26  ;;  %v707_v36 = vmul.f32 %v7206_v51, %v5853_v48  ;;  %v1928_v4 = vsel %vm1924_vm3, %v6781_v7, %v5989_v16  ;;  %v1927_v46 = vsel %vm1924_vm3, %v6778_v6, %v5988_v29  ;;  %v645_v14 = vpop.f32.mrf.mxu0  ;;  %v7242_v6 = vld [vmem:[%s10181_s3] ss:$0 sm:$0xff] }
 0x194   : > { %6336 = vrot.lane.b32.xlu1 %v7201_v47, %s6613_s30  ;;  %v1218_v19 = vrot.slane %v7180_v22, 2  ;;  %v7229_v63 = vpop.permute.xlu0 %6036  ;;  %v7233_v21 = vpack.i.bf16 %v1047_v30, %v1045_v24  ;;  %v1038_v26 = vrot.slane %v7130_v42, 1  ;;  %v745_v7 = vadd.f32 %v7242_v6, %v706_v3 }
 0x195   : > { %v1222_v22 = vsel %vm1159_vm2, %v1220_v35, %v1221_v43  ;;  %v1224_v16 = vsel %vm1159_vm2, %v1221_v43, %v1223_v45  ;;  %v743_v29 = vadd.f32 %v7242_v6, %v704_v55  ;;  %v1960_v48 = vsel %vm1957_vm4, %v1927_v46, %v5993_v40 }
 0x196   : > { %v7231_v41 = vpop.permute.xlu1 %6046  ;;  %6316 = vrot.lane.b32.xlu0 %v7097_v56, %s6616_s15  ;;  %v1961_v24 = vsel %vm1957_vm4, %v1928_v4, %v5994_v44  ;;  %v746_v56 = vadd.f32 %v7242_v6, %v707_v36  ;;  %v705_v30 = vmul.f32 %v7206_v51, %v645_v14  ;;  %v5943_v3 = vunpack.i.l.bf16 %v7033_v34 }
 0x197   : > { %v1215_v45 = vrot.slane %v7130_v42, 2  ;;  %v1216_v43 = vrot.slane %v7143_v52, 2  ;;  %v7262_v55 = vpack.i.bf16 %v1224_v16, %v1222_v22  ;;  %v1040_v44 = vsel %vm982_vm1, %v1038_v26, %v1039_v27 }
 0x198   : > { %6356 = vrot.lane.b32.xlu1 %v7233_v21, %s6616_s15  ;;  %v7256_v35 = vpop.permute.xlu0 %6041  ;;  %v1042_v36 = vsel %vm982_vm1, %v1039_v27, %v1041_v15  ;;  %v1993_v4 = vsel %vm1990_vm5, %v1960_v48, %v5943_v3  ;;  %v1994_v46 = vsel %vm1990_vm5, %v1961_v24, %v5944_v28  ;;  %v777_v34 = vmax.f32 %v745_v7, 0.0 }
 0x199   : > { %v5969_v14 = vunpack.i.h.bf16 %v7073_v20  ;;  %v5968_v42 = vunpack.i.l.bf16 %v7073_v20  ;;  %v775_v22 = vmax.f32 %v743_v29, 0.0  ;;  %v778_v16 = vmax.f32 %v746_v56, 0.0 }
 0x19a   : > { %v7260_v40 = vpop.permute.xlu1 %6051  ;;  %6321 = vrot.lane.b32.xlu0 %v7114_v23, %s6618_s19  ;;  %v7274_v52 = vpack.i.bf16 %v1042_v36, %v1040_v44  ;;  %v744_v27 = vadd.f32 %v7242_v6, %v705_v30  ;;  %v1217_v28 = vsel %vm1159_vm2, %v1215_v45, %v1216_v43  ;;  %v1219_v15 = vsel %vm1159_vm2, %v1216_v43, %v1218_v19 }
 0x19b   : > { %v2026_v23 = vsel %vm2023_vm6, %v1993_v4, %v5968_v42  ;;  %v2027_v7 = vsel %vm2023_vm6, %v1994_v46, %v5969_v14  ;;  %v6024_v20 = vunpack.i.h.bf16 %v7145_v53  ;;  %v6023_v48 = vunpack.i.l.bf16 %v7145_v53 }
 0x19c   : > { %6361 = vrot.lane.b32.xlu1 %v7262_v55, %s6618_s19  ;;  %v6067_v26 = vpop.permute.xlu0 %6066  ;;  %v5974_v29 = vunpack.i.h.bf16 %v7092_v50  ;;  %v5973_v56 = vunpack.i.l.bf16 %v7092_v50  ;;  %v858_v19 = vrot.slane %v777_v34, 7  ;;  %v855_v45 = vrot.slane %v775_v22, 7 }
 0x19d   : > { %v6069_v3 = vunpack.i.h.bf16 %v6067_v26  ;;  %v6068_v30 = vunpack.i.l.bf16 %v6067_v26  ;;  %v859_v42 = vrot.slane %v778_v16, 7  ;;  %v776_v36 = vmax.f32 %v744_v27, 0.0 }
 0x19e   : > { %v7283_v24 = vpop.permute.xlu1 %6056  ;;  %6331 = vrot.lane.b32.xlu0 %v7149_v0, %s6613_s30  ;;  %v2059_v43 = vsel %vm2056_vm7, %v2026_v23, %v5973_v56  ;;  %v2060_v53 = vsel %vm2056_vm7, %v2027_v7, %v5974_v29  ;;  %v7293_v4 = vpack.i.bf16 %v1219_v15, %v1217_v28  ;;  %v5959_v22 = vunpack.i.h.bf16 %v7060_v57 }
 0x19f   : > { %v2093_v50 = vsel %vm2089_vm8, %v2060_v53, %v6024_v20  ;;  %v2092_v46 = vsel %vm2089_vm8, %v2059_v43, %v6023_v48  ;;  %v5958_v16 = vunpack.i.l.bf16 %v7060_v57  ;;  %v7310_v15 = vsel %vm816_vm0, 0.0, %v858_v19 }
 0x1a0   : > { %6376 = vrot.lane.b32.xlu1 %v7274_v52, %s6612_s29  ;;  %v6072_v44 = vpop.permute.xlu0 %6071  ;;  %v2126_v26 = vsel %vm2122_vm9, %v2093_v50, %v6069_v3  ;;  %v2125_v23 = vsel %vm2122_vm9, %v2092_v46, %v6068_v30  ;;  %v856_v7 = vrot.slane %v776_v36, 7  ;;  %v7315_v48 = vsel %vm816_vm0, 0.0, %v855_v45 }
 0x1a1   : > { %v6074_v14 = vunpack.i.h.bf16 %v6072_v44  ;;  %v6073_v0 = vunpack.i.l.bf16 %v6072_v44  ;;  %v7318_v29 = vsel %vm816_vm0, %v858_v19, %v859_v42  ;;  %v1930_v3 = vsel %vm1924_vm3, %v6772_v2, %v5959_v22 }
 0x1a2   : > { %v7297_v34 = vpop.permute.xlu1 %6061  ;;  %6341 = vrot.lane.b32.xlu0 %v7201_v47, %s6615_s14  ;;  %v7321_v47 = vsel %vm816_vm0, %v859_v42, 0.0  ;;  %v1929_v30 = vsel %vm1924_vm3, %v6769_v1, %v5958_v16  ;;  %v6019_v43 = vunpack.i.h.bf16 %v7124_v37  ;;  %v6018_v53 = vunpack.i.l.bf16 %v7124_v37 }
 0x1a3   : > { %v2158_v27 = vsel %vm2155_vm10, %v2125_v23, %v6073_v0  ;;  %v2159_v28 = vsel %vm2155_vm10, %v2126_v26, %v6074_v14  ;;  %v5964_v19 = vunpack.i.h.bf16 %v7057_v54  ;;  %v5963_v42 = vunpack.i.l.bf16 %v7057_v54 }
 0x1a4   : > { %6381 = vrot.lane.b32.xlu1 %v7293_v4, %s6614_s9  ;;  %v7312_v20 = vpop.permute.xlu0 %6096  ;;  %v5711_v57 = vpack.c.bf16 %v2159_v28, %v2158_v27  ;;  %v1056_v1 = vrot.slane %v7321_v47, 1  ;;  %v7339_v2 = vsel %vm816_vm0, %v855_v45, %v856_v7  ;;  %v7347_v54 = vpack.i.bf16 %v7318_v29, %v7310_v15 }
 0x1a5   : > { %v1962_v50 = vsel %vm1957_vm4, %v1929_v30, %v5963_v42  ;;  %v1963_v46 = vsel %vm1957_vm4, %v1930_v3, %v5964_v19  ;;  %v6014_v45 = vunpack.i.h.bf16 %v7197_v25  ;;  %v6013_v23 = vunpack.i.l.bf16 %v7197_v25 }
 0x1a6   : > { %v6077_v56 = vpop.permute.xlu1 %6076  ;;  %5875 = vmatmul.mubr.msk.bf16.vlgmr.msra.gmra.mxu1 %vm7188_vm12, %v5711_v57  ;;  %6346 = vrot.lane.b32.xlu0 %v7233_v21, %s6612_s29  ;;  %v1996_v0 = vsel %vm1990_vm5, %v1963_v46, %v6019_v43  ;;  %v1995_v22 = vsel %vm1990_vm5, %v1962_v50, %v6018_v53  ;;  %v5856_v57 = vpop.f32.mrf.mxu0  ;;  %v6048_v3 = vunpack.i.l.bf16 %v7231_v41  ;;  %v6054_v25 = vunpack.i.h.bf16 %v7260_v40 }
 0x1a7   : > { %v6079_v44 = vunpack.i.h.bf16 %v6077_v56  ;;  %v6078_v36 = vunpack.i.l.bf16 %v6077_v56  ;;  %v6049_v56 = vunpack.i.h.bf16 %v7231_v41  ;;  %v6053_v19 = vunpack.i.l.bf16 %v7260_v40 }
 0x1a8   : > { %6386 = vrot.lane.b32.xlu1 %v7274_v52, %s6617_s16  ;;  %v7341_v37 = vpop.permute.xlu0 %6101  ;;  %v1053_v46 = vrot.slane %v7310_v15, 1 }
 0x1a9   : > { %v2029_v27 = vsel %vm2023_vm6, %v1996_v0, %v6079_v44  ;;  %v2028_v28 = vsel %vm2023_vm6, %v1995_v22, %v6078_v36  ;;  %v658_v22 = vpop.f32.mrf.mxu0 }
 0x1aa   : > { %v6082_v14 = vpop.permute.xlu1 %6081  ;;  %6351 = vrot.lane.b32.xlu0 %v7262_v55, %s6614_s9 }
 0x1ab   : > { %v6084_v16 = vunpack.i.h.bf16 %v6082_v14  ;;  %v6083_v26 = vunpack.i.l.bf16 %v6082_v14  ;;  %v1054_v14 = vrot.slane %v7318_v29, 1 }
 0x1ac   : > { %6391 = vrot.lane.b32.xlu1 %v7293_v4, %s6619_s20  ;;  %v7363_v53 = vpop.permute.xlu0 %6106 }
 0x1ad   : > { %v2061_v30 = vsel %vm2056_vm7, %v2028_v28, %v6083_v26  ;;  %v2062_v43 = vsel %vm2056_vm7, %v2029_v27, %v6084_v16  ;;  %v1230_v16 = vrot.slane %v7310_v15, 2  ;;  %v7390_v28 = vpack.i.bf16 %v7339_v2, %v7315_v48 }
 0x1ae   : > { %v2094_v42 = vsel %vm2089_vm8, %v2061_v30, %v6013_v23  ;;  %v2095_v44 = vsel %vm2089_vm8, %v2062_v43, %v6014_v45  ;;  %v7369_v36 = vpop.permute.xlu1 %6086  ;;  %6366 = vrot.lane.b32.xlu0 %v7233_v21, %s6617_s16  ;;  %v1233_v21 = vrot.slane %v7321_v47, 2  ;;  %v946_v23 = vsel %vm816_vm0, %v856_v7, 0.0 }
 0x1af   : > { %v2127_v41 = vsel %vm2122_vm9, %v2094_v42, %v6048_v3  ;;  %v2128_v50 = vsel %vm2122_vm9, %v2095_v44, %v6049_v56  ;;  %v710_v56 = vmul.f32 %v7206_v51, %v5856_v57  ;;  %v1231_v3 = vrot.slane %v7318_v29, 2  ;;  %v5857_v42 = vpop.f32.mrf.mxu0 }
 0x1b0   : > { %6406 = vrot.lane.b32.xlu1 %v7347_v54, %s6615_s14  ;;  %v2160_v40 = vsel %vm2155_vm10, %v2127_v41, %v6053_v19  ;;  %v2161_v0 = vsel %vm2155_vm10, %v2128_v50, %v6054_v25  ;;  %v7383_v26 = vpop.permute.xlu0 %6111  ;;  %v6059_v30 = vunpack.i.h.bf16 %v7283_v24  ;;  %v6058_v43 = vunpack.i.l.bf16 %v7283_v24 }
 0x1b1   : > { %v5714_v45 = vpack.c.bf16 %v2161_v0, %v2160_v40  ;;  %v1055_v7 = vsel %vm982_vm1, %v1053_v46, %v1054_v14  ;;  %v1057_v47 = vsel %vm982_vm1, %v1054_v14, %v1056_v1  ;;  %v1048_v25 = vrot.slane %v7315_v48, 1 }
 0x1b2   : > { %v7386_v27 = vpop.permute.xlu1 %6091  ;;  %6371 = vrot.lane.b32.xlu0 %v7262_v55, %s6619_s20  ;;  %v6064_v57 = vunpack.i.h.bf16 %v7297_v34  ;;  %v6063_v19 = vunpack.i.l.bf16 %v7297_v34  ;;  %v708_v24 = vmul.f32 %v7206_v51, %v658_v22  ;;  %v1225_v55 = vrot.slane %v7315_v48, 2 }
 0x1b3   : > { %5878 = vmatprep.mubr.msk.bf16.mxu1 %vm7188_vm12, %v5714_v45  ;;  %v1051_v44 = vrot.slane %v946_v23, 1  ;;  %v711_v50 = vmul.f32 %v7206_v51, %v5857_v42  ;;  %v1228_v1 = vrot.slane %v946_v23, 2  ;;  %v7414_v14 = vpack.i.bf16 %v1057_v47, %v1055_v7 }
 0x1b4   : > { %6416 = vrot.lane.b32.xlu1 %v7390_v28, %s6613_s30  ;;  %v7409_v41 = vpop.permute.xlu0 %6116  ;;  %v749_v34 = vadd.f32 %v7242_v6, %v710_v56  ;;  %v1049_v40 = vrot.slane %v7339_v2, 1  ;;  %v1932_v0 = vsel %vm1924_vm3, %v6829_v59, %v6059_v30  ;;  %v1931_v22 = vsel %vm1924_vm3, %v6826_v58, %v6058_v43 }
 0x1b5   : > { %v1232_v45 = vsel %vm1159_vm2, %v1230_v16, %v1231_v3  ;;  %v1234_v23 = vsel %vm1159_vm2, %v1231_v3, %v1233_v21  ;;  %v1964_v7 = vsel %vm1957_vm4, %v1931_v22, %v6063_v19  ;;  %v1965_v47 = vsel %vm1957_vm4, %v1932_v0, %v6064_v57  ;;  %v661_v16 = vpop.f32.mrf.mxu0 }
 0x1b6   : > { %v7412_v46 = vpop.permute.xlu1 %6126  ;;  %6396 = vrot.lane.b32.xlu0 %v7274_v52, %s6616_s15  ;;  %v747_v56 = vadd.f32 %v7242_v6, %v708_v24  ;;  %v6009_v59 = vunpack.i.h.bf16 %v7169_v11  ;;  %v6008_v58 = vunpack.i.l.bf16 %v7169_v11  ;;  %v750_v52 = vadd.f32 %v7242_v6, %v711_v50 }
 0x1b7   : > { %v1226_v21 = vrot.slane %v7339_v2, 2  ;;  %v7439_v43 = vpack.i.bf16 %v1234_v23, %v1232_v45  ;;  %v1050_v57 = vsel %vm982_vm1, %v1048_v25, %v1049_v40  ;;  %v1052_v19 = vsel %vm982_vm1, %v1049_v40, %v1051_v44 }
 0x1b8   : > { %6436 = vrot.lane.b32.xlu1 %v7414_v14, %s6616_s15  ;;  %v7433_v30 = vpop.permute.xlu0 %6121  ;;  %v1997_v24 = vsel %vm1990_vm5, %v1964_v7, %v6008_v58  ;;  %v1998_v42 = vsel %vm1990_vm5, %v1965_v47, %v6009_v59  ;;  %v781_v11 = vmax.f32 %v749_v34, 0.0  ;;  %v6039_v50 = vunpack.i.h.bf16 %v7229_v63 }
 0x1b9   : > { %v6038_v0 = vunpack.i.l.bf16 %v7229_v63  ;;  %v779_v22 = vmax.f32 %v747_v56, 0.0  ;;  %v709_v25 = vmul.f32 %v7206_v51, %v661_v16  ;;  %v782_v44 = vmax.f32 %v750_v52, 0.0 }
 0x1ba   : > { %v7437_v3 = vpop.permute.xlu1 %6131  ;;  %6401 = vrot.lane.b32.xlu0 %v7293_v4, %s6618_s19  ;;  %v7452_v40 = vpack.i.bf16 %v1052_v19, %v1050_v57  ;;  %v1227_v23 = vsel %vm1159_vm2, %v1225_v55, %v1226_v21  ;;  %v1229_v7 = vsel %vm1159_vm2, %v1226_v21, %v1228_v1  ;;  %v2031_v34 = vsel %vm2023_vm6, %v1998_v42, %v6039_v50 }
 0x1bb   : > { %v2030_v4 = vsel %vm2023_vm6, %v1997_v24, %v6038_v0  ;;  %v6104_v63 = vunpack.i.h.bf16 %v7341_v37  ;;  %v6103_v47 = vunpack.i.l.bf16 %v7341_v37  ;;  %v6044_v51 = vunpack.i.h.bf16 %v7256_v35 }
 0x1bc   : > { %6441 = vrot.lane.b32.xlu1 %v7439_v43, %s6618_s19  ;;  %v6147_v45 = vpop.permute.xlu0 %6146  ;;  %v6043_v56 = vunpack.i.l.bf16 %v7256_v35  ;;  %v864_v55 = vrot.slane %v781_v11, 7  ;;  %v748_v1 = vadd.f32 %v7242_v6, %v709_v25  ;;  %v865_v21 = vrot.slane %v782_v44, 7 }
 0x1bd   : > { %v6149_v58 = vunpack.i.h.bf16 %v6147_v45  ;;  %v6148_v52 = vunpack.i.l.bf16 %v6147_v45  ;;  %v2064_v37 = vsel %vm2056_vm7, %v2031_v34, %v6044_v51  ;;  %v7471_v19 = vpack.i.bf16 %v1229_v7, %v1227_v23 }
 0x1be   : > { %v7460_v59 = vpop.permute.xlu1 %6136  ;;  %6411 = vrot.lane.b32.xlu0 %v7347_v54, %s6613_s30  ;;  %v2063_v16 = vsel %vm2056_vm7, %v2030_v4, %v6043_v56  ;;  %v2097_v35 = vsel %vm2089_vm8, %v2064_v37, %v6104_v63  ;;  %v861_v0 = vrot.slane %v779_v22, 7  ;;  %v7482_v25 = vsel %vm816_vm0, 0.0, %v864_v55 }
 0x1bf   : > { %v2096_v24 = vsel %vm2089_vm8, %v2063_v16, %v6103_v47  ;;  %v2130_v50 = vsel %vm2122_vm9, %v2097_v35, %v6149_v58  ;;  %v780_v23 = vmax.f32 %v748_v1, 0.0  ;;  %v6029_v7 = vunpack.i.h.bf16 %v7165_v49 }
 0x1c0   : > { %6456 = vrot.lane.b32.xlu1 %v7452_v40, %s6612_s29  ;;  %v6152_v57 = vpop.permute.xlu0 %6151  ;;  %v2129_v6 = vsel %vm2122_vm9, %v2096_v24, %v6148_v52  ;;  %v6028_v4 = vunpack.i.l.bf16 %v7165_v49  ;;  %v7491_v22 = vsel %vm816_vm0, %v864_v55, %v865_v21  ;;  %v6034_v63 = vunpack.i.h.bf16 %v7194_v32 }
 0x1c1   : > { %v6154_v42 = vunpack.i.h.bf16 %v6152_v57  ;;  %v6153_v54 = vunpack.i.l.bf16 %v6152_v57  ;;  %v6033_v47 = vunpack.i.l.bf16 %v7194_v32  ;;  %v6099_v56 = vunpack.i.h.bf16 %v7312_v20 }
 0x1c2   : > { %v7475_v11 = vpop.permute.xlu1 %6141  ;;  %6421 = vrot.lane.b32.xlu0 %v7390_v28, %s6615_s14  ;;  %v6098_v58 = vunpack.i.l.bf16 %v7312_v20  ;;  %v1434_v52 = vrot.slane %v7482_v25, 1  ;;  %v7501_v1 = vsel %vm816_vm0, 0.0, %v861_v0  ;;  %v7508_v49 = vsel %vm816_vm0, %v865_v21, 0.0 }
 0x1c3   : > { %v2162_v45 = vsel %vm2155_vm10, %v2129_v6, %v6153_v54  ;;  %v2163_v44 = vsel %vm2155_vm10, %v2130_v50, %v6154_v42  ;;  %v1435_v32 = vrot.slane %v7491_v22, 1  ;;  %v1934_v20 = vsel %vm1924_vm3, %v6835_v62, %v6029_v7 }
 0x1c4   : > { %6461 = vrot.lane.b32.xlu1 %v7471_v19, %s6614_s9  ;;  %v5717_v34 = vpack.c.bf16 %v2163_v44, %v2162_v45  ;;  %v7493_v28 = vpop.permute.xlu0 %6171  ;;  %v1933_v37 = vsel %vm1924_vm3, %v6832_v61, %v6028_v4  ;;  %v862_v57 = vrot.slane %v780_v23, 7  ;;  %v1967_v21 = vsel %vm1957_vm4, %v1934_v20, %v6034_v63 }
 0x1c5   : > { %v1966_v24 = vsel %vm1957_vm4, %v1933_v37, %v6033_v47  ;;  %v7523_v54 = vpack.i.bf16 %v7491_v22, %v7482_v25  ;;  %v2000_v50 = vsel %vm1990_vm5, %v1967_v21, %v6099_v56  ;;  %v6094_v61 = vunpack.i.h.bf16 %v7386_v27 }
 0x1c6   : > { %v6157_v51 = vpop.permute.xlu1 %6156  ;;  %5879 = vmatmul.mubr.msk.bf16.gmra.mxu1 %vm7188_vm12, %v5717_v34  ;;  %6426 = vrot.lane.b32.xlu0 %v7414_v14, %s6612_s29  ;;  %v1999_v6 = vsel %vm1990_vm5, %v1966_v24, %v6098_v58  ;;  %v6093_v44 = vunpack.i.l.bf16 %v7386_v27  ;;  %v6129_v4 = vunpack.i.h.bf16 %v7412_v46  ;;  %v6128_v34 = vunpack.i.l.bf16 %v7412_v46 }
 0x1c7   : > { %v6159_v55 = vunpack.i.h.bf16 %v6157_v51  ;;  %v6158_v16 = vunpack.i.l.bf16 %v6157_v51  ;;  %v6134_v56 = vunpack.i.h.bf16 %v7437_v3  ;;  %v6133_v27 = vunpack.i.l.bf16 %v7437_v3 }
 0x1c8   : > { %6466 = vrot.lane.b32.xlu1 %v7452_v40, %s6617_s16  ;;  %v7517_v35 = vpop.permute.xlu0 %6176  ;;  %v1437_v20 = vrot.slane %v7508_v49, 1  ;;  %v7549_v46 = vsel %vm816_vm0, %v861_v0, %v862_v57  ;;  %v1535_v0 = vrot.slane %v7482_v25, 2 }
 0x1c9   : > { %v2033_v23 = vsel %vm2023_vm6, %v2000_v50, %v6159_v55  ;;  %v2032_v7 = vsel %vm2023_vm6, %v1999_v6, %v6158_v16  ;;  %v1536_v6 = vrot.slane %v7491_v22, 2 }
 0x1ca   : > { %v6162_v42 = vpop.permute.xlu1 %6161  ;;  %6431 = vrot.lane.b32.xlu0 %v7439_v43, %s6614_s9  ;;  %v1438_v25 = vsel %vm982_vm1, %v1435_v32, %v1437_v20 }
 0x1cb   : > { %v6164_v62 = vunpack.i.h.bf16 %v6162_v42  ;;  %v6163_v45 = vunpack.i.l.bf16 %v6162_v42 }
 0x1cc   : > { %6471 = vrot.lane.b32.xlu1 %v7471_v19, %s6619_s20  ;;  %v7539_v51 = vpop.permute.xlu0 %6181 }
 0x1cd   : > { %v2065_v63 = vsel %vm2056_vm7, %v2032_v7, %v6163_v45  ;;  %v2066_v47 = vsel %vm2056_vm7, %v2033_v23, %v6164_v62  ;;  %v1538_v45 = vrot.slane %v7508_v49, 2  ;;  %v1058_v23 = vrot.slane %v7501_v1, 1 }
 0x1ce   : > { %v2098_v58 = vsel %vm2089_vm8, %v2065_v63, %v6093_v44  ;;  %v2099_v55 = vsel %vm2089_vm8, %v2066_v47, %v6094_v61  ;;  %v7545_v16 = vpop.permute.xlu1 %6166  ;;  %6446 = vrot.lane.b32.xlu0 %v7414_v14, %s6617_s16  ;;  %v6495_v14 = vpack.i.bf16 %v7549_v46, %v7501_v1  ;;  %v948_v61 = vsel %vm816_vm0, %v862_v57, 0.0 }
 0x1cf   : > { %v2131_v37 = vsel %vm2122_vm9, %v2098_v58, %v6128_v34  ;;  %v2132_v24 = vsel %vm2122_vm9, %v2099_v55, %v6129_v4  ;;  %v1436_v44 = vsel %vm982_vm1, %v1434_v52, %v1435_v32  ;;  %v1061_v7 = vrot.slane %v948_v61, 1 }
 0x1d0   : > { %6486 = vrot.lane.b32.xlu1 %v7523_v54, %s6615_s14  ;;  %v2164_v3 = vsel %vm2155_vm10, %v2131_v37, %v6133_v27  ;;  %v2165_v21 = vsel %vm2155_vm10, %v2132_v24, %v6134_v56  ;;  %v7559_v42 = vpop.permute.xlu0 %6186  ;;  %v7581_v57 = vpack.i.bf16 %v1438_v25, %v1436_v44  ;;  %v6139_v4 = vunpack.i.h.bf16 %v7460_v59 }
 0x1d1   : > { %v5720_v50 = vpack.c.bf16 %v2165_v21, %v2164_v3  ;;  %v6138_v34 = vunpack.i.l.bf16 %v7460_v59  ;;  %v1539_v52 = vsel %vm1159_vm2, %v1536_v6, %v1538_v45  ;;  %v1059_v32 = vrot.slane %v7549_v46, 1 }
 0x1d2   : > { %v7563_v62 = vpop.permute.xlu1 %6196  ;;  %6451 = vrot.lane.b32.xlu0 %v7439_v43, %s6619_s20  ;;  %v1537_v43 = vsel %vm1159_vm2, %v1535_v0, %v1536_v6  ;;  %v6144_v63 = vunpack.i.h.bf16 %v7475_v11  ;;  %v6143_v47 = vunpack.i.l.bf16 %v7475_v11  ;;  %v1235_v27 = vrot.slane %v7501_v1, 2 }
 0x1d3   : > { %5882 = vmatprep.mubr.msk.bf16.mxu1 %vm7188_vm12, %v5720_v50  ;;  %v1238_v58 = vrot.slane %v948_v61, 2  ;;  %v7599_v55 = vpack.i.bf16 %v1539_v52, %v1537_v43  ;;  %v1936_v20 = vsel %vm1924_vm3, %v6905_v8, %v6139_v4  ;;  %v1935_v11 = vsel %vm1924_vm3, %v6902_v5, %v6138_v34 }
 0x1d4   : > { %6496 = vrot.lane.b32.xlu1 %v6495_v14, %s6613_s30  ;;  %v7576_v22 = vpop.permute.xlu0 %6191  ;;  %v1060_v37 = vsel %vm982_vm1, %v1058_v23, %v1059_v32  ;;  %v1062_v24 = vsel %vm982_vm1, %v1059_v32, %v1061_v7  ;;  %v1968_v3 = vsel %vm1957_vm4, %v1935_v11, %v6143_v47  ;;  %v1969_v21 = vsel %vm1957_vm4, %v1936_v20, %v6144_v63 }
 0x1d5   : > { %v6089_v50 = vunpack.i.h.bf16 %v7369_v36  ;;  %v6088_v8 = vunpack.i.l.bf16 %v7369_v36  ;;  %v6119_v25 = vunpack.i.h.bf16 %v7409_v41  ;;  %v6118_v36 = vunpack.i.l.bf16 %v7409_v41 }
 0x1d6   : > { %v7579_v49 = vpop.permute.xlu1 %6201  ;;  %6476 = vrot.lane.b32.xlu0 %v7452_v40, %s6616_s15  ;;  %v1236_v40 = vrot.slane %v7549_v46, 2  ;;  %v6184_v34 = vunpack.i.h.bf16 %v7539_v51  ;;  %v6183_v52 = vunpack.i.l.bf16 %v7539_v51  ;;  %v6123_v63 = vunpack.i.l.bf16 %v7433_v30 }
 0x1d7   : > { %v2001_v61 = vsel %vm1990_vm5, %v1968_v3, %v6088_v8  ;;  %v2002_v44 = vsel %vm1990_vm5, %v1969_v21, %v6089_v50  ;;  %v6108_v3 = vunpack.i.l.bf16 %v7363_v53  ;;  %v6114_v50 = vunpack.i.h.bf16 %v7383_v26 }
 0x1d8   : > { %6506 = vrot.lane.b32.xlu1 %v7581_v57, %s6616_s15  ;;  %v7594_v56 = vpop.permute.xlu0 %6206  ;;  %v1237_v6 = vsel %vm1159_vm2, %v1235_v27, %v1236_v40  ;;  %v1239_v45 = vsel %vm1159_vm2, %v1236_v40, %v1238_v58  ;;  %v2034_v43 = vsel %vm2023_vm6, %v2001_v61, %v6118_v36  ;;  %v2035_v4 = vsel %vm2023_vm6, %v2002_v44, %v6119_v25 }
 0x1d9   : > { %v6525_v7 = vpack.i.bf16 %v1239_v45, %v1237_v6  ;;  %v2067_v27 = vsel %vm2056_vm7, %v2034_v43, %v6123_v63  ;;  %v6113_v8 = vunpack.i.l.bf16 %v7383_v26  ;;  %v6179_v61 = vunpack.i.h.bf16 %v7517_v35 }
 0x1da   : > { %v7597_v59 = vpop.permute.xlu1 %6216  ;;  %6481 = vrot.lane.b32.xlu0 %v7471_v19, %s6618_s19  ;;  %v6520_v19 = vpack.i.bf16 %v1062_v24, %v1060_v37  ;;  %v2100_v51 = vsel %vm2089_vm8, %v2067_v27, %v6183_v52  ;;  %v1937_v26 = vsel %vm1924_vm3, %v6908_v9, %v6108_v3  ;;  %v6209_v63 = vunpack.i.h.bf16 %v7594_v56 }
 0x1dc   : > { %6511 = vrot.lane.b32.xlu1 %v7599_v55, %s6618_s19  ;;  %v7616_v0 = vpop.permute.xlu0 %6211 }
 0x1de   : > { %v7618_v5 = vpop.permute.xlu1 %6221  ;;  %6491 = vrot.lane.b32.xlu0 %v7523_v54, %s6613_s30  ;;  %v6124_v54 = vunpack.i.h.bf16 %v7433_v30  ;;  %v6109_v30 = vunpack.i.h.bf16 %v7363_v53  ;;  %v6178_v53 = vunpack.i.l.bf16 %v7517_v35 }
 0x1e0   : > { %6521 = vrot.lane.b32.xlu1 %v6520_v19, %s6612_s29  ;;  %v6227_v23 = vpop.permute.xlu0 %6226  ;;  %v2068_v58 = vsel %vm2056_vm7, %v2035_v4, %v6124_v54  ;;  %v1970_v4 = vsel %vm1957_vm4, %v1937_v26, %v6113_v8  ;;  %v6198_v26 = vunpack.i.l.bf16 %v7563_v62 }
 0x1e1   : > { %v6229_v47 = vunpack.i.h.bf16 %v6227_v23  ;;  %v6228_v41 = vunpack.i.l.bf16 %v6227_v23  ;;  %v2101_v20 = vsel %vm2089_vm8, %v2068_v58, %v6184_v34  ;;  %v6174_v34 = vunpack.i.h.bf16 %v7493_v28 }
 0x1e2   : > { %v7633_v32 = vpop.permute.xlu1 %6246  ;;  %6501 = vrot.lane.b32.xlu0 %v6495_v14, %s6615_s14  ;;  %v2003_v9 = vsel %vm1990_vm5, %v1970_v4, %v6178_v53  ;;  %v6219_v58 = vunpack.i.h.bf16 %v7597_v59 }
 0x1e3   : > { %v2134_v14 = vsel %vm2122_vm9, %v2101_v20, %v6229_v47  ;;  %v2133_v21 = vsel %vm2122_vm9, %v2100_v51, %v6228_v41  ;;  %v6208_v47 = vunpack.i.l.bf16 %v7594_v56  ;;  %v6214_v51 = vunpack.i.h.bf16 %v7616_v0 }
 0x1e4   : > { %6526 = vrot.lane.b32.xlu1 %v6525_v7, %s6614_s9  ;;  %v6232_v40 = vpop.permute.xlu0 %6231 }
 0x1e5   : > { %v6234_v11 = vunpack.i.h.bf16 %v6232_v40  ;;  %v6233_v37 = vunpack.i.l.bf16 %v6232_v40  ;;  %v6218_v40 = vunpack.i.l.bf16 %v7597_v59  ;;  %v6223_v59 = vunpack.i.l.bf16 %v7618_v5 }
 0x1e6   : > { %v7643_v24 = vpop.permute.xlu1 %6256  ;;  %6516 = vrot.lane.b32.xlu0 %v7581_v57, %s6617_s16  ;;  %v1938_v57 = vsel %vm1924_vm3, %v6911_v10, %v6109_v30  ;;  %v6173_v10 = vunpack.i.l.bf16 %v7493_v28  ;;  %v6224_v30 = vunpack.i.h.bf16 %v7618_v5  ;;  %v1940_v5 = vsel %vm1924_vm3, %v6973_v18, %v6219_v58 }
 0x1e7   : > { %v2166_v6 = vsel %vm2155_vm10, %v2133_v21, %v6233_v37  ;;  %v2167_v45 = vsel %vm2155_vm10, %v2134_v14, %v6234_v11  ;;  %v1971_v35 = vsel %vm1957_vm4, %v1938_v57, %v6114_v50  ;;  %v6213_v11 = vunpack.i.l.bf16 %v7616_v0 }
 0x1e8   : > { %6531 = vrot.lane.b32.xlu1 %v6520_v19, %s6617_s16  ;;  %v5723_v44 = vpack.c.bf16 %v2167_v45, %v2166_v6  ;;  %v6237_v25 = vpop.permute.xlu0 %6236  ;;  %v2004_v52 = vsel %vm1990_vm5, %v1971_v35, %v6179_v61  ;;  %v1939_v6 = vsel %vm1924_vm3, %v6970_v17, %v6218_v40  ;;  %v1973_v53 = vsel %vm1957_vm4, %v1940_v5, %v6224_v30 }
 0x1e9   : > { %v6239_v23 = vunpack.i.h.bf16 %v6237_v25  ;;  %v6238_v43 = vunpack.i.l.bf16 %v6237_v25  ;;  %v1972_v61 = vsel %vm1957_vm4, %v1939_v6, %v6223_v59  ;;  %v6168_v25 = vunpack.i.l.bf16 %v7545_v16 }
 0x1ea   : > { %v7658_v36 = vpop.permute.xlu1 %6276  ;;  %5883 = vmatmul.mubr.msk.bf16.gmra.mxu1 %vm7188_vm12, %v5723_v44  ;;  %6546 = vrot.lane.b32.xlu0 %v6520_v19, %s6616_s15  ;;  %v6259_v35 = vunpack.i.h.bf16 %v7643_v24  ;;  %s5760_s15 = sshll.u32 %s10465_s28, 6 }
 0x1eb   : > { %v2037_v20 = vsel %vm2023_vm6, %v2004_v52, %v6239_v23  ;;  %v2036_v28 = vsel %vm2023_vm6, %v2003_v9, %v6238_v43  ;;  %v2005_v17 = vsel %vm1990_vm5, %v1972_v61, %v6168_v25  ;;  %v6203_v52 = vunpack.i.l.bf16 %v7579_v49  ;;  %s8333_s12 = scalar_lea.vmem %s10186_s8, %s5760_s15 }
 0x1ec   : > { %6536 = vrot.lane.b32.xlu1 %v6525_v7, %s6619_s20  ;;  %v6242_v54 = vpop.permute.xlu0 %6241  ;;  %v2038_v4 = vsel %vm2023_vm6, %v2005_v17, %v6198_v26 }
 0x1ed   : > { %v6244_v19 = vunpack.i.h.bf16 %v6242_v54  ;;  %v6243_v41 = vunpack.i.l.bf16 %v6242_v54 }
 0x1ee   : > { %v7676_v27 = vpop.permute.xlu1 %6281  ;;  %6551 = vrot.lane.b32.xlu0 %v6525_v7, %s6618_s19 }
 0x1ef   : > { %v2069_v56 = vsel %vm2056_vm7, %v2036_v28, %v6243_v41  ;;  %v2070_v37 = vsel %vm2056_vm7, %v2037_v20, %v6244_v19 }
 0x1f0   : > { %6541 = vrot.lane.b32.xlu1 %v6733_v31, %s6617_s16  ;;  %v2102_v3 = vsel %vm2089_vm8, %v2069_v56, %v6173_v10  ;;  %v2103_v14 = vsel %vm2089_vm8, %v2070_v37, %v6174_v34  ;;  %v7693_v7 = vpop.permute.xlu0 %6251  ;;  %v6258_v34 = vunpack.i.l.bf16 %v7643_v24  ;;  %v6204_v10 = vunpack.i.h.bf16 %v7579_v49 }
 0x1f1   : > { %v2135_v0 = vsel %vm2122_vm9, %v2102_v3, %v6208_v47  ;;  %v2136_v50 = vsel %vm2122_vm9, %v2103_v14, %v6209_v63  ;;  %v6189_v3 = vunpack.i.h.bf16 %v7559_v42  ;;  %v6188_v14 = vunpack.i.l.bf16 %v7559_v42 }
 0x1f2   : > { %v7695_v21 = vpop.permute.xlu1 %6296  ;;  %6556 = vrot.lane.b32.xlu0 %v7599_v55, %s6619_s20  ;;  %v2168_v31 = vsel %vm2155_vm10, %v2135_v0, %v6213_v11  ;;  %v2169_v8 = vsel %vm2155_vm10, %v2136_v50, %v6214_v51  ;;  %v6169_v55 = vunpack.i.h.bf16 %v7545_v16  ;;  %v6194_v0 = vunpack.i.h.bf16 %v7576_v22 }
 0x1f3   : > { %v5726_v45 = vpack.c.bf16 %v2169_v8, %v2168_v31  ;;  %v6193_v50 = vunpack.i.l.bf16 %v7576_v22  ;;  %v1941_v61 = vsel %vm1924_vm3, %v6960_v12, %v6188_v14  ;;  %v6254_v17 = vunpack.i.h.bf16 %v7693_v7 }
 0x1f4   : > { %6561 = vrot.lane.b32.xlu1 %v6743_v38, %s6619_s20  ;;  %v6262_v44 = vpop.permute.xlu0 %6261  ;;  %v2006_v57 = vsel %vm1990_vm5, %v1973_v53, %v6169_v55  ;;  %v6199_v38 = vunpack.i.h.bf16 %v7563_v62  ;;  %v2071_v62 = vsel %vm2056_vm7, %v2038_v4, %v6203_v52  ;;  %v6253_v22 = vunpack.i.l.bf16 %v7693_v7  ;;  %s8253_s20 = scalar_lea.vmem %s10185_s7, %s5760_s15 }
 0x1f5   : > { %5886 = vmatprep.mubr.msk.bf16.mxu1 %vm7188_vm12, %v5726_v45  ;;  %v2104_v58 = vsel %vm2089_vm8, %v2071_v62, %v6258_v34  ;;  %v6264_v8 = vunpack.i.h.bf16 %v6262_v44  ;;  %v6263_v5 = vunpack.i.l.bf16 %v6262_v44  ;;  %v1942_v45 = vsel %vm1924_vm3, %v6963_v13, %v6189_v3 }
 0x1f6   : > { %v7715_v18 = vpop.permute.xlu1 %6301  ;;  %v2039_v16 = vsel %vm2023_vm6, %v2006_v57, %v6199_v38  ;;  %v1974_v25 = vsel %vm1957_vm4, %v1941_v61, %v6193_v50  ;;  %v1975_v42 = vsel %vm1957_vm4, %v1942_v45, %v6194_v0  ;;  %v6299_v44 = vunpack.i.h.bf16 %v7695_v21 }
 0x1f7   : > { %v2072_v47 = vsel %vm2056_vm7, %v2039_v16, %v6204_v10  ;;  %v6298_v57 = vunpack.i.l.bf16 %v7695_v21  ;;  %v2008_v13 = vsel %vm1990_vm5, %v1975_v42, %v6264_v8  ;;  %v2007_v26 = vsel %vm1990_vm5, %v1974_v25, %v6263_v5 }
 0x1f8   : > { %v7721_v23 = vpop.permute.xlu0 %6266  ;;  %v2105_v41 = vsel %vm2089_vm8, %v2072_v47, %v6259_v35  ;;  %v6304_v16 = vunpack.i.h.bf16 %v7715_v18  ;;  %v6303_v35 = vunpack.i.l.bf16 %v7715_v18  ;;  %v6249_v3 = vunpack.i.h.bf16 %v7633_v32 }
 0x1f9   : > { %v6248_v14 = vunpack.i.l.bf16 %v7633_v32  ;;  %v6283_v25 = vunpack.i.l.bf16 %v7676_v27 }
 0x1fa   : > { %v6307_v43 = vpop.permute.xlu1 %6306 }
 0x1fb   : > { %v6309_v9 = vunpack.i.h.bf16 %v6307_v43  ;;  %v6308_v54 = vunpack.i.l.bf16 %v6307_v43 }
 0x1fc   : > { %v7729_v63 = vpop.permute.xlu0 %6271 }
 0x1fd   : > { %v2138_v24 = vsel %vm2122_vm9, %v2105_v41, %v6309_v9  ;;  %v2137_v28 = vsel %vm2122_vm9, %v2104_v58, %v6308_v54 }
 0x1fe   : > { %v6312_v19 = vpop.permute.xlu1 %6311 }
 0x1ff   : > { %v6314_v40 = vunpack.i.h.bf16 %v6312_v19  ;;  %v6313_v20 = vunpack.i.l.bf16 %v6312_v19 }
 0x200   : > { %v6287_v11 = vpop.permute.xlu0 %6286 }
 0x201   : > { %v2170_v49 = vsel %vm2155_vm10, %v2137_v28, %v6313_v20  ;;  %v2171_v51 = vsel %vm2155_vm10, %v2138_v24, %v6314_v40  ;;  %v6289_v10 = vunpack.i.h.bf16 %v6287_v11  ;;  %v6288_v52 = vunpack.i.l.bf16 %v6287_v11 }
 0x202   : > { %v5729_v56 = vpack.c.bf16 %v2171_v51, %v2170_v49  ;;  %v7739_v37 = vpop.permute.xlu1 %6326  ;;  %v1944_v28 = vsel %vm1924_vm3, %v7038_v39, %v6299_v44  ;;  %v1943_v49 = vsel %vm1924_vm3, %v7031_v33, %v6298_v57  ;;  %v6279_v33 = vunpack.i.h.bf16 %v7658_v36 }
 0x203   : > { %v1976_v11 = vsel %vm1957_vm4, %v1943_v49, %v6303_v35 }
 0x204   : > { %5887 = vmatmul.mubr.msk.bf16.gmra.mxu1 %vm7188_vm12, %v5729_v56  ;;  %v6292_v30 = vpop.permute.xlu0 %6291  ;;  %v1977_v56 = vsel %vm1957_vm4, %v1944_v28, %v6304_v16  ;;  %v2009_v39 = vsel %vm1990_vm5, %v1976_v11, %v6248_v14  ;;  %v10213_v28 = vld [vmem:[#allocation3_spill] sm:$0xff] }
 0x205   : > { %v6294_v54 = vunpack.i.h.bf16 %v6292_v30  ;;  %v6293_v62 = vunpack.i.l.bf16 %v6292_v30  ;;  %v2010_v50 = vsel %vm1990_vm5, %v1977_v56, %v6249_v3 }
 0x206   : > { %v7743_v59 = vpop.permute.xlu1 %6336  ;;  %v2043_v32 = vsel %vm2023_vm6, %v2010_v50, %v6279_v33 }
 0x207   : > { %v6339_v61 = vunpack.i.h.bf16 %v7743_v59 }
 0x208   : > { %v6317_v31 = vpop.permute.xlu0 %6316 }
 0x209   : > { %v6319_v53 = vunpack.i.h.bf16 %v6317_v31  ;;  %v6318_v55 = vunpack.i.l.bf16 %v6317_v31  ;;  %v6278_v31 = vunpack.i.l.bf16 %v7658_v36 }
 0x20a   : > { %v7749_v6 = vpop.permute.xlu1 %6356 }
 0x20b   : > { %v2041_v34 = vsel %vm2023_vm6, %v2008_v13, %v6319_v53  ;;  %v2040_v7 = vsel %vm2023_vm6, %v2007_v26, %v6318_v55  ;;  %v2042_v45 = vsel %vm2023_vm6, %v2009_v39, %v6278_v31  ;;  %v6338_v53 = vunpack.i.l.bf16 %v7743_v59 }
 0x20c   : > { %v6322_v38 = vpop.permute.xlu0 %6321  ;;  %v6284_v55 = vunpack.i.h.bf16 %v7676_v27  ;;  %v2075_v36 = vsel %vm2056_vm7, %v2042_v45, %v6283_v25 }
 0x20d   : > { %v6324_v12 = vunpack.i.h.bf16 %v6322_v38  ;;  %v6323_v43 = vunpack.i.l.bf16 %v6322_v38  ;;  %v2108_v13 = vsel %vm2089_vm8, %v2075_v36, %v6338_v53 }
 0x20e   : > { %v7763_v4 = vpop.permute.xlu1 %6361  ;;  %v2076_v44 = vsel %vm2056_vm7, %v2043_v32, %v6284_v55 }
 0x20f   : > { %v2073_v21 = vsel %vm2056_vm7, %v2040_v7, %v6323_v43  ;;  %v2074_v9 = vsel %vm2056_vm7, %v2041_v34, %v6324_v12  ;;  %v2109_v38 = vsel %vm2089_vm8, %v2076_v44, %v6339_v61 }
 0x210   : > { %v2106_v47 = vsel %vm2089_vm8, %v2073_v21, %v6253_v22  ;;  %v2107_v19 = vsel %vm2089_vm8, %v2074_v9, %v6254_v17  ;;  %v7773_v41 = vpop.permute.xlu0 %6331  ;;  %v6269_v21 = vunpack.i.h.bf16 %v7721_v23  ;;  %v6268_v9 = vunpack.i.l.bf16 %v7721_v23 }
 0x211   : > { %v2139_v18 = vsel %vm2122_vm9, %v2106_v47, %v6288_v52  ;;  %v2140_v40 = vsel %vm2122_vm9, %v2107_v19, %v6289_v10  ;;  %v6334_v3 = vunpack.i.h.bf16 %v7773_v41 }
 0x212   : > { %v7775_v58 = vpop.permute.xlu1 %6376  ;;  %v2172_v20 = vsel %vm2155_vm10, %v2139_v18, %v6293_v62  ;;  %v2173_v24 = vsel %vm2155_vm10, %v2140_v40, %v6294_v54  ;;  %v6274_v54 = vunpack.i.h.bf16 %v7729_v63  ;;  %v6273_v62 = vunpack.i.l.bf16 %v7729_v63 }
 0x213   : > { %v5732_v51 = vpack.c.bf16 %v2173_v24, %v2172_v20  ;;  %v10212_v20 = vld [vmem:[#allocation4_spill] sm:$0xff]  ;;  %v1945_v49 = vsel %vm1924_vm3, %v10213_v28, %v6268_v9  ;;  %v6333_v63 = vunpack.i.l.bf16 %v7773_v41  ;;  %v6378_v14 = vunpack.i.l.bf16 %v7775_v58 }
 0x214   : > { %v6342_v30 = vpop.permute.xlu0 %6341  ;;  %v1946_v24 = vsel %vm1924_vm3, %v10212_v20, %v6269_v21  ;;  %v1978_v56 = vsel %vm1957_vm4, %v1945_v49, %v6273_v62  ;;  %v6328_v62 = vunpack.i.l.bf16 %v7739_v37  ;;  %v6359_v20 = vunpack.i.h.bf16 %v7749_v6 }
 0x215   : > { %5890 = vmatprep.mubr.msk.bf16.mxu1 %vm7188_vm12, %v5732_v51  ;;  %v6344_v19 = vunpack.i.h.bf16 %v6342_v30  ;;  %v6343_v18 = vunpack.i.l.bf16 %v6342_v30  ;;  %v1979_v23 = vsel %vm1957_vm4, %v1946_v24, %v6274_v54  ;;  %v6379_v30 = vunpack.i.h.bf16 %v7775_v58 }
 0x216   : > { %v7791_v0 = vpop.permute.xlu1 %6381  ;;  %v6329_v54 = vunpack.i.h.bf16 %v7739_v37  ;;  %v6358_v24 = vunpack.i.l.bf16 %v7749_v6 }
 0x217   : > { %v2012_v50 = vsel %vm1990_vm5, %v1979_v23, %v6344_v19  ;;  %v2011_v33 = vsel %vm1990_vm5, %v1978_v56, %v6343_v18  ;;  %v6384_v32 = vunpack.i.h.bf16 %v7791_v0  ;;  %v6383_v61 = vunpack.i.l.bf16 %v7791_v0 }
 0x218   : > { %v7797_v8 = vpop.permute.xlu0 %6346  ;;  %v6364_v23 = vunpack.i.h.bf16 %v7763_v4 }
 0x21a   : > { %v6387_v5 = vpop.permute.xlu1 %6386 }
 0x21b   : > { %v6389_v42 = vunpack.i.h.bf16 %v6387_v5  ;;  %v6388_v17 = vunpack.i.l.bf16 %v6387_v5 }
 0x21c   : > { %v7805_v22 = vpop.permute.xlu0 %6351 }
 0x21d   : > { %v2142_v59 = vsel %vm2122_vm9, %v2109_v38, %v6389_v42  ;;  %v2141_v43 = vsel %vm2122_vm9, %v2108_v13, %v6388_v17 }
 0x21e   : > { %v6392_v57 = vpop.permute.xlu1 %6391 }
 0x21f   : > { %v6394_v26 = vunpack.i.h.bf16 %v6392_v57  ;;  %v6393_v12 = vunpack.i.l.bf16 %v6392_v57 }
 0x220   : > { %v6367_v35 = vpop.permute.xlu0 %6366 }
 0x221   : > { %v2174_v27 = vsel %vm2155_vm10, %v2141_v43, %v6393_v12  ;;  %v2175_v16 = vsel %vm2155_vm10, %v2142_v59, %v6394_v26  ;;  %v6369_v55 = vunpack.i.h.bf16 %v6367_v35  ;;  %v6368_v25 = vunpack.i.l.bf16 %v6367_v35  ;;  %v10214_v43 = vld [vmem:[#allocation8_spill] sm:$0xff] }
 0x222   : > { %v5735_v34 = vpack.c.bf16 %v2175_v16, %v2174_v27  ;;  %v7815_v7 = vpop.permute.xlu1 %6406  ;;  %v1948_v27 = vsel %vm1924_vm3, %v10214_v43, %v6379_v30  ;;  %v10215_v16 = vld [vmem:[#allocation6_spill] sm:$0xff] }
 0x223   : > { %v1947_v35 = vsel %vm1924_vm3, %v10215_v16, %v6378_v14  ;;  %v1981_v21 = vsel %vm1957_vm4, %v1948_v27, %v6384_v32  ;;  %v2608_v16 = vlaneseq }
 0x224   : > { %5891 = vmatmul.mubr.msk.bf16.gmra.mxu1 %vm7188_vm12, %v5735_v34  ;;  %v6372_v10 = vpop.permute.xlu0 %6371  ;;  %v2014_v18 = vsel %vm1990_vm5, %v1981_v21, %v6329_v54 }
 0x225   : > { %v6374_v17 = vunpack.i.h.bf16 %v6372_v10  ;;  %v6373_v36 = vunpack.i.l.bf16 %v6372_v10  ;;  %v1980_v10 = vsel %vm1957_vm4, %v1947_v35, %v6383_v61  ;;  %v2047_v37 = vsel %vm2023_vm6, %v2014_v18, %v6359_v20  ;;  %v10217_v35 = vld [vmem:[#allocation7_spill] sm:$0xff] }
 0x226   : > { %v7819_v52 = vpop.permute.xlu1 %6416  ;;  %v2013_v19 = vsel %vm1990_vm5, %v1980_v10, %v6328_v62 }
 0x227   : > { %v6418_v56 = vunpack.i.l.bf16 %v7819_v52 }
 0x228   : > { %v6397_v47 = vpop.permute.xlu0 %6396 }
 0x229   : > { %v6399_v51 = vunpack.i.h.bf16 %v6397_v47  ;;  %v6398_v11 = vunpack.i.l.bf16 %v6397_v47 }
 0x22a   : > { %v7825_v40 = vpop.permute.xlu1 %6436 }
 0x22b   : > { %v2045_v53 = vsel %vm2023_vm6, %v2012_v50, %v6399_v51  ;;  %v2044_v41 = vsel %vm2023_vm6, %v2011_v33, %v6398_v11  ;;  %v2046_v51 = vsel %vm2023_vm6, %v2013_v19, %v6358_v24  ;;  %v6419_v11 = vunpack.i.h.bf16 %v7819_v52 }
 0x22c   : > { %v6402_v39 = vpop.permute.xlu0 %6401 }
 0x22d   : > { %v6404_v31 = vunpack.i.h.bf16 %v6402_v39  ;;  %v6403_v5 = vunpack.i.l.bf16 %v6402_v39  ;;  %v2080_v39 = vsel %vm2056_vm7, %v2047_v37, %v6364_v23 }
 0x22e   : > { %v7839_v45 = vpop.permute.xlu1 %6441  ;;  %v2113_v33 = vsel %vm2089_vm8, %v2080_v39, %v6419_v11 }
 0x22f   : > { %v2077_v58 = vsel %vm2056_vm7, %v2044_v41, %v6403_v5  ;;  %v2078_v42 = vsel %vm2056_vm7, %v2045_v53, %v6404_v31 }
 0x230   : > { %v2110_v44 = vsel %vm2089_vm8, %v2077_v58, %v6333_v63  ;;  %v2111_v57 = vsel %vm2089_vm8, %v2078_v42, %v6334_v3  ;;  %v7849_v38 = vpop.permute.xlu0 %6411  ;;  %v6363_v3 = vunpack.i.l.bf16 %v7763_v4  ;;  %v6349_v42 = vunpack.i.h.bf16 %v7797_v8 }
 0x231   : > { %v2143_v0 = vsel %vm2122_vm9, %v2110_v44, %v6368_v25  ;;  %v2144_v26 = vsel %vm2122_vm9, %v2111_v57, %v6369_v55  ;;  %v10216_v44 = vld [vmem:[#allocation2_spill] sm:$0xff]  ;;  %v6414_v37 = vunpack.i.h.bf16 %v7849_v38 }
 0x232   : > { %v7851_v13 = vpop.permute.xlu1 %6456  ;;  %v2176_v12 = vsel %vm2155_vm10, %v2143_v0, %v6373_v36  ;;  %v2177_v59 = vsel %vm2155_vm10, %v2144_v26, %v6374_v17  ;;  %v2079_v6 = vsel %vm2056_vm7, %v2046_v51, %v6363_v3  ;;  %v6348_v17 = vunpack.i.l.bf16 %v7797_v8  ;;  %v10218_v8 = vld [vmem:[#allocation5_spill] sm:$0xff] }
 0x233   : > { %v5738_v34 = vpack.c.bf16 %v2177_v59, %v2176_v12  ;;  %v2112_v31 = vsel %vm2089_vm8, %v2079_v6, %v6418_v56  ;;  %v5929_v57 = vunpack.i.h.bf16 %v10216_v44  ;;  %v5928_v0 = vunpack.i.l.bf16 %v10216_v44 }
 0x234   : > { %v7863_v9 = vpop.permute.xlu0 %6421  ;;  %v6354_v26 = vunpack.i.h.bf16 %v7805_v22  ;;  %v6353_v12 = vunpack.i.l.bf16 %v7805_v22  ;;  %v6459_v59 = vunpack.i.h.bf16 %v7851_v13  ;;  %v6458_v43 = vunpack.i.l.bf16 %v7851_v13 }
 0x235   : > { %5894 = vmatprep.mubr.msk.bf16.mxu1 %vm7188_vm12, %v5738_v34  ;;  %v1950_v34 = vsel %vm1924_vm3, %v10217_v35, %v6349_v42  ;;  %v1949_v10 = vsel %vm1924_vm3, %v10218_v8, %v6348_v17  ;;  %v6424_v21 = vunpack.i.h.bf16 %v7863_v9  ;;  %v6423_v54 = vunpack.i.l.bf16 %v7863_v9 }
 0x236   : > { %v7869_v47 = vpop.permute.xlu1 %6461  ;;  %v1982_v20 = vsel %vm1957_vm4, %v1949_v10, %v6353_v12  ;;  %v1983_v24 = vsel %vm1957_vm4, %v1950_v34, %v6354_v26  ;;  %v6408_v51 = vunpack.i.l.bf16 %v7815_v7  ;;  %v6413_v9 = vunpack.i.l.bf16 %v7849_v38 }
 0x237   : > { %v6464_v22 = vunpack.i.h.bf16 %v7869_v47  ;;  %v6463_v19 = vunpack.i.l.bf16 %v7869_v47  ;;  %v1952_v11 = vsel %vm1924_vm3, %v7339_v2, %v6459_v59  ;;  %v1951_v47 = vsel %vm1924_vm3, %v7315_v48, %v6458_v43 }
 0x238   : > { %v7875_v28 = vpop.permute.xlu0 %6426  ;;  %v2016_v23 = vsel %vm1990_vm5, %v1983_v24, %v6424_v21  ;;  %v2015_v3 = vsel %vm1990_vm5, %v1982_v20, %v6423_v54  ;;  %v6438_v26 = vunpack.i.l.bf16 %v7825_v40  ;;  %v6443_v8 = vunpack.i.l.bf16 %v7839_v45 }
 0x239   : > { %v1985_v39 = vsel %vm1957_vm4, %v1952_v11, %v6464_v22  ;;  %v6429_v43 = vunpack.i.h.bf16 %v7875_v28  ;;  %v6620_v54 = vmov 1983009808   ;;  %v6444_v24 = vunpack.i.h.bf16 %v7839_v45 }
 0x23a   : > { %v6467_v49 = vpop.permute.xlu1 %6466  ;;  %v7953_v22 = vunpack.c.l.s4 %v6620_v54 }
 0x23b   : > { %v6469_v63 = vunpack.i.h.bf16 %v6467_v49  ;;  %v6468_v30 = vunpack.i.l.bf16 %v6467_v49  ;;  %v6409_v49 = vunpack.i.h.bf16 %v7815_v7  ;;  %v1984_v7 = vsel %vm1957_vm4, %v1951_v47, %v6463_v19 }
 0x23c   : > { %v7883_v14 = vpop.permute.xlu0 %6431 }
 0x23d   : > { %v2146_v52 = vsel %vm2122_vm9, %v2113_v33, %v6469_v63  ;;  %v2145_v61 = vsel %vm2122_vm9, %v2112_v31, %v6468_v30  ;;  %v2018_v12 = vsel %vm1990_vm5, %v1985_v39, %v6409_v49  ;;  %v6434_v19 = vunpack.i.h.bf16 %v7883_v14 }
 0x23e   : > { %v6472_v50 = vpop.permute.xlu1 %6471 }
 0x23f   : > { %v6474_v5 = vunpack.i.h.bf16 %v6472_v50  ;;  %v6473_v32 = vunpack.i.l.bf16 %v6472_v50 }
 0x240   : > { %v6447_v41 = vpop.permute.xlu0 %6446 }
 0x241   : > { %v2178_v4 = vsel %vm2155_vm10, %v2145_v61, %v6473_v32  ;;  %v2179_v53 = vsel %vm2155_vm10, %v2146_v52, %v6474_v5  ;;  %v6449_v50 = vunpack.i.h.bf16 %v6447_v41  ;;  %v6448_v33 = vunpack.i.l.bf16 %v6447_v41 }
 0x242   : > { %v5741_v55 = vpack.c.bf16 %v2179_v53, %v2178_v4  ;;  %v7893_v25 = vpop.permute.xlu1 %6486  ;;  %v6439_v53 = vunpack.i.h.bf16 %v7825_v40  ;;  %v7955_v40 = vshrl.u32 %v2608_v16, 7  ;;  %v1954_v16 = vsel %vm1924_vm3, %v7318_v29, %v6429_v43 }
 0x243   : > { %v6488_v47 = vunpack.i.l.bf16 %v7893_v25  ;;  %v1987_v29 = vsel %vm1957_vm4, %v1954_v16, %v6434_v19 }
 0x244   : > { %5895 = vmatmul.mubr.msk.bf16.gmra.mxu1 %vm7188_vm12, %v5741_v55  ;;  %v6452_v58 = vpop.permute.xlu0 %6451  ;;  %v2017_v55 = vsel %vm1990_vm5, %v1984_v7, %v6408_v51 }
 0x245   : > { %v6454_v5 = vunpack.i.h.bf16 %v6452_v58  ;;  %v6453_v32 = vunpack.i.l.bf16 %v6452_v58  ;;  %v2050_v10 = vsel %vm2023_vm6, %v2017_v55, %v6438_v26 }
 0x246   : > { %v7899_v36 = vpop.permute.xlu1 %6496 }
 0x247   : > { %v6499_v49 = vunpack.i.h.bf16 %v7899_v36  ;;  %v6498_v45 = vunpack.i.l.bf16 %v7899_v36 }
 0x248   : > { %v6477_v27 = vpop.permute.xlu0 %6476 }
 0x249   : > { %v6479_v18 = vunpack.i.h.bf16 %v6477_v27  ;;  %v6478_v13 = vunpack.i.l.bf16 %v6477_v27  ;;  %v6428_v27 = vunpack.i.l.bf16 %v7875_v28 }
 0x24a   : > { %v7913_v62 = vpop.permute.xlu1 %6506 }
 0x24b   : > { %v2049_v38 = vsel %vm2023_vm6, %v2016_v23, %v6479_v18  ;;  %v2048_v2 = vsel %vm2023_vm6, %v2015_v3, %v6478_v13  ;;  %v6433_v18 = vunpack.i.l.bf16 %v7883_v14  ;;  %v2051_v13 = vsel %vm2023_vm6, %v2018_v12, %v6439_v53 }
 0x24c   : > { %v6482_v56 = vpop.permute.xlu0 %6481  ;;  %v2083_v14 = vsel %vm2056_vm7, %v2050_v10, %v6443_v8  ;;  %v6508_v39 = vunpack.i.l.bf16 %v7913_v62 }
 0x24d   : > { %v6484_v63 = vunpack.i.h.bf16 %v6482_v56  ;;  %v6483_v30 = vunpack.i.l.bf16 %v6482_v56  ;;  %v2084_v56 = vsel %vm2056_vm7, %v2051_v13, %v6444_v24 }
 0x24e   : > { %v7929_v6 = vpop.permute.xlu1 %6511 }
 0x24f   : > { %v2081_v48 = vsel %vm2056_vm7, %v2048_v2, %v6483_v30  ;;  %v2082_v31 = vsel %vm2056_vm7, %v2049_v38, %v6484_v63 }
 0x250   : > { %v2114_v52 = vsel %vm2089_vm8, %v2081_v48, %v6413_v9  ;;  %v2115_v61 = vsel %vm2089_vm8, %v2082_v31, %v6414_v37  ;;  %v7939_v4 = vpop.permute.xlu0 %6491  ;;  %v1953_v9 = vsel %vm1924_vm3, %v7310_v15, %v6428_v27  ;;  %v6489_v15 = vunpack.i.h.bf16 %v7893_v25 }
 0x251   : > { %v2147_v17 = vsel %vm2122_vm9, %v2114_v52, %v6448_v33  ;;  %v2148_v41 = vsel %vm2122_vm9, %v2115_v61, %v6449_v50  ;;  %v1986_v63 = vsel %vm1957_vm4, %v1953_v9, %v6433_v18  ;;  %v2116_v31 = vsel %vm2089_vm8, %v2083_v14, %v6498_v45 }
 0x252   : > { %v6522_v42 = vpop.permute.xlu1 %6521  ;;  %v2180_v58 = vsel %vm2155_vm10, %v2147_v17, %v6453_v32  ;;  %v2181_v59 = vsel %vm2155_vm10, %v2148_v41, %v6454_v5  ;;  %v6509_v25 = vunpack.i.h.bf16 %v7913_v62  ;;  %v6514_v5 = vunpack.i.h.bf16 %v7929_v6 }
 0x253   : > { %v6523_v35 = vunpack.i.l.bf16 %v6522_v42  ;;  %v5744_v34 = vpack.c.bf16 %v2181_v59, %v2180_v58  ;;  %v6524_v20 = vunpack.i.h.bf16 %v6522_v42  ;;  %v6494_v52 = vunpack.i.h.bf16 %v7939_v4 }
 0x254   : > { %v6502_v21 = vpop.permute.xlu0 %6501  ;;  %v6493_v61 = vunpack.i.l.bf16 %v7939_v4 }
 0x255   : > { %5898 = vmatprep.mubr.msk.bf16.mxu1 %vm7188_vm12, %v5744_v34  ;;  %v1955_v11 = vsel %vm1924_vm3, %v7501_v1, %v6523_v35  ;;  %v1956_v30 = vsel %vm1924_vm3, %v7549_v46, %v6524_v20  ;;  %v2117_v1 = vsel %vm2089_vm8, %v2084_v56, %v6499_v49  ;;  %v6504_v2 = vunpack.i.h.bf16 %v6502_v21 }
 0x256   : > { %v6527_v28 = vpop.permute.xlu1 %6526  ;;  %v6503_v50 = vunpack.i.l.bf16 %v6502_v21  ;;  %v6513_v46 = vunpack.i.l.bf16 %v7929_v6  ;;  %v2607_v56 = vunpack.c.0.s8 %v7953_v22 }
 0x257   : > { %v6529_v51 = vunpack.i.h.bf16 %v6527_v28  ;;  %v6528_v37 = vunpack.i.l.bf16 %v6527_v28  ;;  %v2020_v62 = vsel %vm1990_vm5, %v1987_v29, %v6504_v2 }
 0x258   : > { %v6517_v3 = vpop.permute.xlu0 %6516  ;;  %v2019_v58 = vsel %vm1990_vm5, %v1986_v63, %v6503_v50 }
 0x259   : > { %v1988_v23 = vsel %vm1957_vm4, %v1955_v11, %v6528_v37  ;;  %v1989_v38 = vsel %vm1957_vm4, %v1956_v30, %v6529_v51  ;;  %v6519_v4 = vunpack.i.h.bf16 %v6517_v3  ;;  %v6518_v18 = vunpack.i.l.bf16 %v6517_v3 }
 0x25a   : > { %v6532_v7 = vpop.permute.xlu1 %6531  ;;  %v2021_v36 = vsel %vm1990_vm5, %v1988_v23, %v6488_v47  ;;  %v2022_v53 = vsel %vm1990_vm5, %v1989_v38, %v6489_v15  ;;  %v8015_v47 = vld [vmem:[%s10183_s5] ss:$0 sm:$0xff] }
 0x25b   : > { %v6534_v33 = vunpack.i.h.bf16 %v6532_v7  ;;  %v6533_v48 = vunpack.i.l.bf16 %v6532_v7  ;;  %v2054_v55 = vsel %vm2023_vm6, %v2021_v36, %v6508_v39  ;;  %v2055_v43 = vsel %vm2023_vm6, %v2022_v53, %v6509_v25  ;;  %v8027_v7 = vld [vmem:[%s10184_s6] ss:$0 sm:$0xff] }
 0x25c   : > { %v6547_v32 = vpop.permute.xlu0 %6546  ;;  %v2087_v19 = vsel %vm2056_vm7, %v2054_v55, %v6513_v46  ;;  %v2088_v37 = vsel %vm2056_vm7, %v2055_v43, %v6514_v5 }
 0x25d   : > { %v6549_v17 = vunpack.i.h.bf16 %v6547_v32  ;;  %v6548_v41 = vunpack.i.l.bf16 %v6547_v32  ;;  %v2150_v6 = vsel %vm2122_vm9, %v2117_v1, %v6534_v33  ;;  %v2149_v59 = vsel %vm2122_vm9, %v2116_v31, %v6533_v48 }
 0x25e   : > { %v6537_v42 = vpop.permute.xlu1 %6536  ;;  %v2120_v14 = vsel %vm2089_vm8, %v2087_v19, %v5928_v0  ;;  %v2121_v15 = vsel %vm2089_vm8, %v2088_v37, %v5929_v57  ;;  %v8037_v31 = vsub.s32 %v2607_v56, %v7955_v40 }
 0x25f   : > { %v6539_v26 = vunpack.i.h.bf16 %v6537_v42  ;;  %v6538_v12 = vunpack.i.l.bf16 %v6537_v42  ;;  %v2053_v13 = vsel %vm2023_vm6, %v2020_v62, %v6549_v17  ;;  %v2052_v20 = vsel %vm2023_vm6, %v2019_v58, %v6548_v41 }
 0x260   : > { %v6552_v34 = vpop.permute.xlu0 %6551 }
 0x261   : > { %v2182_v27 = vsel %vm2155_vm10, %v2149_v59, %v6538_v12  ;;  %v2183_v35 = vsel %vm2155_vm10, %v2150_v6, %v6539_v26  ;;  %v6554_v10 = vunpack.i.h.bf16 %v6552_v34  ;;  %v6553_v21 = vunpack.i.l.bf16 %v6552_v34 }
 0x262   : > { %v5747_v8 = vpack.c.bf16 %v2183_v35, %v2182_v27  ;;  %v6542_v54 = vpop.permute.xlu1 %6541 }
 0x263   : > { %v6543_v28 = vunpack.i.l.bf16 %v6542_v54  ;;  %v2085_v24 = vsel %vm2056_vm7, %v2052_v20, %v6553_v21  ;;  %v2086_v49 = vsel %vm2056_vm7, %v2053_v13, %v6554_v10  ;;  %v6544_v51 = vunpack.i.h.bf16 %v6542_v54 }
 0x264   : > { %5899 = vmatmul.mubr.msk.bf16.gmra.mxu1 %vm7188_vm12, %v5747_v8  ;;  %v2118_v16 = vsel %vm2089_vm8, %v2085_v24, %v6493_v61  ;;  %v2119_v9 = vsel %vm2089_vm8, %v2086_v49, %v6494_v52  ;;  %v6557_v11 = vpop.permute.xlu0 %6556  ;;  %v8057_v21 = vsub.s32 1, %v7955_v40 }
 0x265   : > { %v6559_v45 = vunpack.i.h.bf16 %v6557_v11  ;;  %v6558_v23 = vunpack.i.l.bf16 %v6557_v11  ;;  %v2151_v3 = vsel %vm2122_vm9, %v2118_v16, %v6518_v18  ;;  %v2152_v63 = vsel %vm2122_vm9, %v2119_v9, %v6519_v4 }
 0x266   : > { %v6562_v29 = vpop.permute.xlu1 %6561  ;;  %v2153_v0 = vsel %vm2122_vm9, %v2120_v14, %v6543_v28  ;;  %v5876_v30 = vpop.f32.mrf.mxu1  ;;  %v2154_v39 = vsel %vm2122_vm9, %v2121_v15, %v6544_v51  ;;  %vm10196_vm9 = vcmask 1042434  }
 0x267   : > { %v6564_v22 = vunpack.i.h.bf16 %v6562_v29  ;;  %v6563_v1 = vunpack.i.l.bf16 %v6562_v29  ;;  %v2184_v38 = vsel %vm2155_vm10, %v2151_v3, %v6558_v23  ;;  %v2185_v36 = vsel %vm2155_vm10, %v2152_v63, %v6559_v45 }
 0x268   : > { %v2471_v44 = vmul.f32 %v5876_v30, %v8015_v47  ;;  %v5750_v2 = vpack.c.bf16 %v2185_v36, %v2184_v38  ;;  %v2335_v33 = vpop.f32.mrf.mxu1  ;;  %v6621_v63 = vmov 0  }
 0x269   : > { %v2186_v57 = vsel %vm2155_vm10, %v2153_v0, %v6563_v1  ;;  %v2187_v50 = vsel %vm2155_vm10, %v2154_v39, %v6564_v22  ;;  %v2469_v5 = vmul.f32 %v8015_v47, %v2335_v33  ;;  %vm10194_vm10 = vcmask 1041409  }
 0x26a   : > { %v2510_v48 = vadd.f32 %v8027_v7, %v2471_v44  ;;  %v5753_v25 = vpack.c.bf16 %v2187_v50, %v2186_v57  ;;  %v5877_v46 = vpop.f32.mrf.mxu1  ;;  %5902 = vmatprep.mubr.msk.bf16.mxu1 %vm7188_vm12, %v5750_v2 }
 0x26b   : > { %v2508_v52 = vadd.f32 %v8027_v7, %v2469_v5  ;;  %v2472_v42 = vmul.f32 %v5877_v46, %v8015_v47 }
 0x26c   : > { %v2542_v32 = vmax.f32 %v2510_v48, 0.0  ;;  %5903 = vmatmul.mubr.msk.bf16.gmra.mxu1 %vm7188_vm12, %v5753_v25  ;;  %v2338_v12 = vpop.f32.mrf.mxu1  ;;  %vm10202_vm12 = vcmask 1044484  }
 0x26d   : > { %v2540_v55 = vmax.f32 %v2508_v52, 0.0  ;;  %v2511_v43 = vadd.f32 %v8027_v7, %v2472_v42  ;;  %v2470_v35 = vmul.f32 %v8015_v47, %v2338_v12 }
 0x26e   : > { %v2638_v61 = vcombine.high %v2542_v32, %v2542_v32  ;;  %v2645_v53 = vrot.slane %v2542_v32, %v8037_v31 }
 0x26f   : > { %v2604_v26 = vcombine.high %v2540_v55, %v2540_v55  ;;  %v2611_v58 = vrot.slane %v2540_v55, %v8037_v31  ;;  %v2543_v24 = vmax.f32 %v2511_v43, 0.0  ;;  %v2509_v49 = vadd.f32 %v8027_v7, %v2470_v35 }
 0x270   : > { %v2652_v17 = vrot.slane %v2638_v61, %v8037_v31  ;;  %v2653_v41 = vcombine.high %v2645_v53, %v2645_v53  ;;  %v3284_v62 = vrot.slane %v2645_v53, 7 }
 0x271   : > { %v2618_v4 = vrot.slane %v2604_v26, %v8037_v31  ;;  %v2619_v27 = vcombine.high %v2611_v58, %v2611_v58  ;;  %v3276_v34 = vrot.slane %v2611_v58, 7  ;;  %v2655_v25 = vcombine.high %v2543_v24, %v2543_v24 }
 0x272   : > { %v2654_v6 = vcombine.high %v2652_v17, %v2652_v17  ;;  %v3285_v59 = vrot.slane %v2653_v41, 7  ;;  %v3286_v60 = vrot.slane %v2652_v17, 7  ;;  %vm8052_vm13 = vcmp.gt.f32.partialorder %v2645_v53, %v3284_v62 }
 0x273   : > { %v2620_v19 = vcombine.high %v2618_v4, %v2618_v4  ;;  %v3277_v18 = vrot.slane %v2619_v27, 7  ;;  %v3278_v13 = vrot.slane %v2618_v4, 7  ;;  %vm8067_vm0 = vcmp.gt.f32.partialorder %v2611_v58, %v3276_v34 }
 0x274   : > { %v3287_v8 = vrot.slane %v2654_v6, 7  ;;  %vm8059_vm14 = vcmp.gt.f32.partialorder %v2653_v41, %v3285_v59  ;;  %vm8063_vm15 = vcmp.gt.f32.partialorder %v2652_v17, %v3286_v60  ;;  %v8078_v16 = vsel %vm8067_vm0, %v2611_v58, %v3276_v34 }
 0x275   : > { %v3279_v51 = vrot.slane %v2620_v19, 7  ;;  %vm3533_vm1 = vcmp.gt.f32.partialorder %v2619_v27, %v3277_v18  ;;  %vm8072_vm2 = vcmp.gt.f32.partialorder %v2618_v4, %v3278_v13  ;;  %v8082_v9 = vsel %vm8052_vm13, %v2645_v53, %v3284_v62 }
 0x276   : > { %v8086_v14 = vsel %vm8059_vm14, %v2653_v41, %v3285_v59  ;;  %v8088_v11 = vsel %vm3533_vm1, %v2619_v27, %v3277_v18  ;;  %v8092_v56 = vsel %vm8072_vm2, %v2618_v4, %v3278_v13  ;;  %vm8094_vm3 = vcmp.gt.f32.partialorder %v2654_v6, %v3287_v8 }
 0x277   : > { %v8100_v23 = vsel %vm8063_vm15, %v2652_v17, %v3286_v60  ;;  %vm3535_vm4 = vcmp.gt.f32.partialorder %v2620_v19, %v3279_v51  ;;  %vm3917_vm5 = vcmp.gt.f32.partialorder %v8086_v14, %v8088_v11  ;;  %v3788_v29 = vsel %vm8067_vm0, 1, %v6621_v63 }
 0x278   : > { %v8104_v3 = vsel %vm3535_vm4, %v2620_v19, %v3279_v51  ;;  %v3789_v15 = vsel %vm3533_vm1, 1, %v6621_v63  ;;  %vm3916_vm6 = vcmp.gt.f32.partialorder %v8082_v9, %v8078_v16  ;;  %v3796_v0 = vsel %vm8052_vm13, 1, %v6621_v63 }
 0x279   : > { %v3790_v30 = vsel %vm8072_vm2, 1, %v6621_v63  ;;  %vm10198_vm7 = vcmp.gt.f32.partialorder %v8100_v23, %v8092_v56  ;;  %v3981_v22 = vsel %vm3917_vm5, %v8086_v14, %v8088_v11  ;;  %v8127_v1 = vsel %vm8094_vm3, %v2654_v6, %v3287_v8 }
 0x27a   : > { %v3797_v39 = vsel %vm8059_vm14, 1, %v6621_v63  ;;  %v3798_v38 = vsel %vm8063_vm15, 1, %v6621_v63  ;;  %v3791_v36 = vsel %vm3535_vm4, 1, %v6621_v63  ;;  %vm10197_vm8 = vcmp.gt.f32.partialorder %v8127_v1, %v8104_v3 }
 0x27b   : > { %v3980_v44 = vsel %vm3916_vm6, %v8082_v9, %v8078_v16  ;;  %v4108_v2 = vsel %vm3916_vm6, %v3796_v0, %v3788_v29  ;;  %v4109_v57 = vsel %vm3917_vm5, %v3797_v39, %v3789_v15  ;;  %v3982_v50 = vsel %vm10198_vm7, %v8100_v23, %v8092_v56 }
 0x27c   : > { %v4110_v33 = vsel %vm10198_vm7, %v3798_v38, %v3790_v30  ;;  %v4245_v48 = vrot.slane %v3981_v22, %v8057_v21  ;;  %v3799_v5 = vsel %vm8094_vm3, 1, %v6621_v63  ;;  %v4708_v46 = vrot.slane %v4109_v57, %v8057_v21 }
 0x27d   : > { %v3983_v32 = vsel %vm10197_vm8, %v8127_v1, %v8104_v3  ;;  %v4111_v52 = vsel %vm10197_vm8, %v3799_v5, %v3791_v36  ;;  %v4241_v61 = vrot.slane %v3980_v44, %v8057_v21  ;;  %v4704_v53 = vrot.slane %v4108_v2, %v8057_v21 }
 0x27e   : > { %v4249_v55 = vrot.slane %v3982_v50, %v8057_v21  ;;  %v4712_v42 = vrot.slane %v4110_v33, %v8057_v21  ;;  %v2662_v17 = vrot.slane %v2543_v24, %v8037_v31  ;;  %v2669_v12 = vrot.slane %v2655_v25, %v8037_v31 }
 0x27f   : > { %v4495_v41 = vsel %vm10196_vm9, %v4245_v48, %v4241_v61  ;;  %v4958_v26 = vsel %vm10194_vm10, %v4708_v46, %v4704_v53  ;;  %v2541_v62 = vmax.f32 %v2509_v49, 0.0  ;;  %v4253_v58 = vrot.slane %v3983_v32, %v8057_v21 }
 0x280   : > { %v4716_v6 = vrot.slane %v4111_v52, %v8057_v21  ;;  %v2670_v59 = vcombine.high %v2662_v17, %v2662_v17  ;;  %v3288_v43 = vrot.slane %v2662_v17, 7  ;;  %v2671_v60 = vcombine.high %v2669_v12, %v2669_v12 }
 0x281   : > { %v3290_v4 = vrot.slane %v2669_v12, 7  ;;  %v2621_v27 = vcombine.high %v2541_v62, %v2541_v62  ;;  %v2628_v35 = vrot.slane %v2541_v62, %v8037_v31  ;;  %v4497_v34 = vsel %vm10195_vm11, %v4249_v55, %v4495_v41 }
 0x282   : > { %v4959_v8 = vsel %vm10196_vm9, %v4712_v42, %v4958_v26  ;;  %v3289_v10 = vrot.slane %v2670_v59, 7  ;;  %v3291_v54 = vrot.slane %v2671_v60, 7  ;;  %vm3544_vm13 = vcmp.gt.f32.partialorder %v2662_v17, %v3288_v43 }
 0x283   : > { %vm8183_vm14 = vcmp.gt.f32.partialorder %v2669_v12, %v3290_v4  ;;  %v2635_v18 = vrot.slane %v2621_v27, %v8037_v31  ;;  %v2636_v20 = vcombine.high %v2628_v35, %v2628_v35  ;;  %v4499_v28 = vsel %vm10202_vm12, %v4253_v58, %v4497_v34 }
 0x284   : > { %vm8188_vm15 = vcmp.gt.f32.partialorder %v2670_v59, %v3289_v10  ;;  %v8194_v24 = vsel %vm10195_vm11, %v4716_v6, %v4959_v8  ;;  %vm8196_vm0 = vcmp.gt.f32.partialorder %v2671_v60, %v3291_v54  ;;  %v8200_v51 = vsel %vm3544_vm13, %v2662_v17, %v3288_v43 }
 0x285   : > { %v2637_v37 = vcombine.high %v2635_v18, %v2635_v18  ;;  %v3280_v45 = vrot.slane %v2628_v35, 7  ;;  %vm4500_vm1 = vcmask 1045509   ;;  %v8204_v29 = vsel %vm8183_vm14, %v2669_v12, %v3290_v4 }
 0x286   : > { %v3800_v15 = vsel %vm3544_vm13, 1, %v6621_v63  ;;  %v3281_v0 = vrot.slane %v2636_v20, 7  ;;  %v3282_v30 = vrot.slane %v2635_v18, 7  ;;  %vm4502_vm2 = vcmask 1046534   ;;  %v5880_v36 = vpop.f32.mrf.mxu1 }
 0x287   : > { %v8209_v22 = vsel %vm8188_vm15, %v2670_v59, %v3289_v10  ;;  %v3802_v39 = vsel %vm8183_vm14, 1, %v6621_v63  ;;  %v3283_v38 = vrot.slane %v2637_v37, 7  ;;  %vm3536_vm3 = vcmp.gt.f32.partialorder %v2628_v35, %v3280_v45 }
 0x288   : > { %vm4504_vm4 = vcmask 1047559   ;;  %v8216_v44 = vsel %vm8196_vm0, %v2671_v60, %v3291_v54  ;;  %vm3537_vm13 = vcmp.gt.f32.partialorder %v2636_v20, %v3281_v0  ;;  %vm3538_vm10 = vcmp.gt.f32.partialorder %v2635_v18, %v3282_v30  ;;  %v2351_v32 = vpop.f32.mrf.mxu1 }
 0x289   : > { %v3664_v2 = vsel %vm3536_vm3, %v2628_v35, %v3280_v45  ;;  %vm3539_vm11 = vcmp.gt.f32.partialorder %v2637_v37, %v3283_v38  ;;  %v3665_v57 = vsel %vm3537_vm13, %v2636_v20, %v3281_v0  ;;  %v3666_v50 = vsel %vm3538_vm10, %v2635_v18, %v3282_v30 }
 0x28a   : > { %v3792_v33 = vsel %vm3536_vm3, 1, %v6621_v63  ;;  %v3667_v48 = vsel %vm3539_vm11, %v2637_v37, %v3283_v38  ;;  %v3793_v25 = vsel %vm3537_vm13, 1, %v6621_v63  ;;  %v3794_v5 = vsel %vm3538_vm10, 1, %v6621_v63 }
 0x28b   : > { %vm3920_vm14 = vcmp.gt.f32.partialorder %v8200_v51, %v3664_v2  ;;  %vm3921_vm9 = vcmp.gt.f32.partialorder %v8209_v22, %v3665_v57  ;;  %vm3922_vm8 = vcmp.gt.f32.partialorder %v8204_v29, %v3666_v50  ;;  %vm3923_vm7 = vcmp.gt.f32.partialorder %v8216_v44, %v3667_v48 }
 0x28c   : > { %v3984_v46 = vsel %vm3920_vm14, %v8200_v51, %v3664_v2  ;;  %v3795_v52 = vsel %vm3539_vm11, 1, %v6621_v63  ;;  %v3985_v61 = vsel %vm3921_vm9, %v8209_v22, %v3665_v57  ;;  %v3986_v53 = vsel %vm3922_vm8, %v8204_v29, %v3666_v50 }
 0x28d   : > { %v3987_v55 = vsel %vm3923_vm7, %v8216_v44, %v3667_v48  ;;  %v3801_v42 = vsel %vm8188_vm15, 1, %v6621_v63  ;;  %v3803_v17 = vsel %vm8196_vm0, 1, %v6621_v63  ;;  %v4112_v41 = vsel %vm3920_vm14, %v3800_v15, %v3792_v33 }
 0x28e   : > { %v2475_v26 = vmul.f32 %v5880_v36, %v8015_v47  ;;  %v4113_v12 = vsel %vm3921_vm9, %v3801_v42, %v3793_v25  ;;  %v4114_v62 = vsel %vm3922_vm8, %v3802_v39, %v3794_v5  ;;  %v4257_v58 = vrot.slane %v3984_v46, %v8057_v21  ;;  %v5881_v39 = vpop.f32.mrf.mxu1 }
 0x28f   : > { %v2473_v6 = vmul.f32 %v8015_v47, %v2351_v32  ;;  %v4115_v59 = vsel %vm3923_vm7, %v3803_v17, %v3795_v52  ;;  %v4261_v43 = vrot.slane %v3985_v61, %v8057_v21  ;;  %v4265_v60 = vrot.slane %v3986_v53, %v8057_v21 }
 0x290   : > { %v4269_v4 = vrot.slane %v3987_v55, %v8057_v21  ;;  %v4501_v27 = vsel %vm4500_vm1, %v4257_v58, %v4499_v28  ;;  %v8268_v35 = vmul.u32 2, %v7955_v40  ;;  %v4720_v34 = vrot.slane %v4112_v41, %v8057_v21 }
 0x291   : > { %v4044_v8 = vsel %vm3916_vm6, 1, %v6621_v63  ;;  %v4503_v10 = vsel %vm4502_vm2, %v4261_v43, %v4501_v27  ;;  %v4724_v54 = vrot.slane %v4113_v12, %v8057_v21  ;;  %v4728_v19 = vrot.slane %v4114_v62, %v8057_v21 }
 0x292   : > { %4565 = vst [vmem:[%s8253_s20 + $0x7] sm:$0x1] %v4269_v4  ;;  %v4505_v18 = vsel %vm4504_vm4, %v4265_v60, %v4503_v10  ;;  %v4732_v13 = vrot.slane %v4115_v59, %v8057_v21  ;;  %v4961_v40 = vsel %vm10202_vm12, %v4720_v34, %v8194_v24  ;;  %v2514_v20 = vadd.f32 %v8027_v7, %v2475_v26 }
 0x293   : > { %v4045_v16 = vsel %vm3917_vm5, 1, %v6621_v63  ;;  %4564 = vst [vmem:[%s8253_s20 - $0x1] sm:$0xfe] %v4505_v18  ;;  %v4962_v9 = vsel %vm4500_vm1, %v4724_v54, %v4961_v40  ;;  %v2512_v28 = vadd.f32 %v8027_v7, %v2473_v6  ;;  %vm10237_vm6 = vcmp.gt.f32.partialorder %v8100_v23, %v8092_v56 }
 0x294   : > { %v4046_v49 = vsel %vm10237_vm6, 1, %v6621_v63  ;;  %v4963_v37 = vsel %vm4502_vm2, %v4728_v19, %v4962_v9  ;;  %v2546_v24 = vmax.f32 %v2514_v20, 0.0  ;;  %vm10238_vm10 = vcmp.gt.f32.partialorder %v8127_v1, %v8104_v3 }
 0x295   : > { %v4047_v45 = vsel %vm10238_vm10, 1, %v6621_v63  ;;  %v4636_v14 = vmul.u32 16, %v4044_v8  ;;  %v4964_v11 = vsel %vm4504_vm4, %v4732_v13, %v4963_v37  ;;  %v2544_v15 = vmax.f32 %v2512_v28, 0.0 }
 0x296   : > { %v4637_v0 = vmul.u32 16, %v4045_v16  ;;  %v4048_v30 = vsel %vm3920_vm14, 1, %v6621_v63  ;;  %v4049_v56 = vsel %vm3921_vm9, 1, %v6621_v63  ;;  %v5014_v23 = vadd.s32 %v4964_v11, %v8268_v35 }
 0x297   : > { %v4638_v38 = vmul.u32 16, %v4046_v49  ;;  %v4050_v3 = vsel %vm3922_vm8, 1, %v6621_v63  ;;  %v2706_v1 = vcombine.high %v2546_v24, %v2546_v24  ;;  %v8312_v36 = vrot.slane %v2546_v24, %v8037_v31 }
 0x298   : > { %v4639_v33 = vmul.u32 16, %v4047_v45  ;;  %v4051_v51 = vsel %vm3923_vm7, 1, %v6621_v63  ;;  %v5022_v2 = vcombine.high %v5014_v23, %v5014_v23  ;;  %v5029_v22 = vrot.slane %v5014_v23, %v8037_v31 }
 0x299   : > { %v4640_v57 = vmul.u32 16, %v4048_v30  ;;  %v4641_v25 = vmul.u32 16, %v4049_v56  ;;  %v2672_v5 = vcombine.high %v2544_v15, %v2544_v15  ;;  %v2476_v46 = vmul.f32 %v5881_v39, %v8015_v47 }
 0x29a   : > { %v4642_v32 = vmul.u32 16, %v4050_v3  ;;  %v5036_v29 = vrot.slane %v5022_v2, %v8037_v31  ;;  %v5037_v50 = vcombine.high %v5029_v22, %v5029_v22  ;;  %v5158_v52 = vrot.slane %v5029_v22, 7 }
 0x29b   : > { %v4643_v61 = vmul.u32 16, %v4051_v51  ;;  %v5191_v53 = vadd.s32 %v5029_v22, %v4637_v0  ;;  %v8321_v55 = vrot.slane %v2706_v1, %v8037_v31  ;;  %v2721_v44 = vcombine.high %v8312_v36, %v8312_v36  ;;  %v2354_v22 = vpop.f32.mrf.mxu1 }
 0x29c   : > { %v5038_v48 = vcombine.high %v5036_v29, %v5036_v29  ;;  %v5159_v42 = vrot.slane %v5037_v50, 7  ;;  %v5160_v17 = vrot.slane %v5036_v29, 7  ;;  %v5190_v41 = vadd.s32 %v5158_v52, %v4636_v14 }
 0x29d   : > { %v5193_v26 = vadd.s32 %v5037_v50, %v4639_v33  ;;  %v2679_v12 = vrot.slane %v2544_v15, %v8037_v31  ;;  %v2686_v62 = vrot.slane %v2672_v5, %v8037_v31  ;;  %v2515_v58 = vadd.f32 %v8027_v7, %v2476_v46 }
 0x29e   : > { %v5161_v6 = vrot.slane %v5038_v48, 7  ;;  %v5192_v59 = vadd.s32 %v5159_v42, %v4638_v38  ;;  %v5194_v43 = vadd.s32 %v5160_v17, %v4640_v57  ;;  %v5197_v60 = vadd.s32 %v5038_v48, %v4643_v61 }
 0x29f   : > { %v5195_v4 = vadd.s32 %v5036_v29, %v4641_v25  ;;  %v5257_v27 = vrot.slane %v5190_v41, %v8057_v21  ;;  %v5261_v34 = vrot.slane %v5191_v53, %v8057_v21  ;;  %v2722_v8 = vcombine.high %v8321_v55, %v8321_v55 }
 0x2a0   : > { %v5196_v10 = vadd.s32 %v5161_v6, %v4642_v32  ;;  %v5265_v54 = vrot.slane %v5192_v59, %v8057_v21  ;;  %v5285_v19 = vrot.slane %v5197_v60, %v8057_v21  ;;  %v3301_v18 = vrot.slane %v2721_v44, 7 }
 0x2a1   : > { %v5269_v13 = vrot.slane %v5193_v26, %v8057_v21  ;;  %vm10239_vm5 = vcmask 1042434   ;;  %v2687_v20 = vcombine.high %v2679_v12, %v2679_v12  ;;  %v3292_v16 = vrot.slane %v2679_v12, 7 }
 0x2a2   : > { %v5510_v40 = vsel %vm10239_vm5, %v5261_v34, %v5257_v27  ;;  %v5273_v9 = vrot.slane %v5194_v43, %v8057_v21  ;;  %vm10240_vm7 = vcmask 1043459   ;;  %5559 = vst [vmem:[%s8333_s12 + $0x7] sm:$0x1] %v5285_v19  ;;  %v3300_v49 = vrot.slane %v8312_v36, 7 }
 0x2a3   : > { %v5511_v28 = vsel %vm10240_vm7, %v5265_v54, %v5510_v40  ;;  %v3302_v37 = vrot.slane %v8321_v55, 7  ;;  %v5277_v24 = vrot.slane %v5195_v4, %v8057_v21  ;;  %v3303_v14 = vrot.slane %v2722_v8, 7 }
 0x2a4   : > { %v5512_v45 = vsel %vm10202_vm12, %v5269_v13, %v5511_v28  ;;  %v2547_v11 = vmax.f32 %v2515_v58, 0.0  ;;  %v5281_v15 = vrot.slane %v5196_v10, %v8057_v21  ;;  %vm8352_vm8 = vcmp.gt.f32.partialorder %v2721_v44, %v3301_v18 }
 0x2a5   : > { %v5513_v0 = vsel %vm4500_vm1, %v5273_v9, %v5512_v45  ;;  %v2688_v56 = vcombine.high %v2686_v62, %v2686_v62  ;;  %v3293_v39 = vrot.slane %v2687_v20, 7  ;;  %v3294_v38 = vrot.slane %v2686_v62, 7 }
 0x2a6   : > { %v5514_v23 = vsel %vm4502_vm2, %v5277_v24, %v5513_v0  ;;  %vm8357_vm9 = vcmp.gt.f32.partialorder %v2679_v12, %v3292_v16  ;;  %vm8363_vm11 = vcmp.gt.f32.partialorder %v8312_v36, %v3300_v49  ;;  %vm8368_vm15 = vcmp.gt.f32.partialorder %v8321_v55, %v3302_v37 }
 0x2a7   : > { %v5515_v1 = vsel %vm4504_vm4, %v5281_v15, %v5514_v23  ;;  %v3295_v2 = vrot.slane %v2688_v56, 7  ;;  %vm8373_vm0 = vcmp.gt.f32.partialorder %v2722_v8, %v3303_v14  ;;  %v3685_v25 = vsel %vm8352_vm8, %v2721_v44, %v3301_v18 }
 0x2a8   : > { %5558 = vst [vmem:[%s8333_s12 - $0x1] sm:$0xfe] %v5515_v1  ;;  %vm3549_vm3 = vcmp.gt.f32.partialorder %v2687_v20, %v3293_v39  ;;  %vm8379_vm13 = vcmp.gt.f32.partialorder %v2686_v62, %v3294_v38  ;;  %v3676_v32 = vsel %vm8357_vm9, %v2679_v12, %v3292_v16  ;;  %v2723_v52 = vcombine.high %v2547_v11, %v2547_v11 }
 0x2a9   : > { %vm8383_vm14 = vcmp.gt.f32.partialorder %v2688_v56, %v3295_v2  ;;  %v3677_v29 = vsel %vm3549_vm3, %v2687_v20, %v3293_v39  ;;  %v3678_v50 = vsel %vm8379_vm13, %v2686_v62, %v3294_v38  ;;  %v8392_v61 = vrot.slane %v2547_v11, %v8037_v31 }
 0x2aa   : > { %vm3925_vm6 = vcmp.gt.f32.partialorder %v3685_v25, %v3677_v29  ;;  %v2474_v53 = vmul.f32 %v8015_v47, %v2354_v22  ;;  %v3684_v44 = vsel %vm8363_vm11, %v8312_v36, %v3300_v49  ;;  %v3686_v48 = vsel %vm8368_vm15, %v8321_v55, %v3302_v37  ;;  %v5884_v46 = vpop.f32.mrf.mxu1 }
 0x2ab   : > { %v3679_v42 = vsel %vm8383_vm14, %v2688_v56, %v3295_v2  ;;  %v3805_v17 = vsel %vm3549_vm3, 1, %v6621_v63  ;;  %v3687_v41 = vsel %vm8373_vm0, %v2722_v8, %v3303_v14  ;;  %v3804_v26 = vsel %vm8357_vm9, 1, %v6621_v63 }
 0x2ac   : > { %vm3924_vm10 = vcmp.gt.f32.partialorder %v3684_v44, %v3676_v32  ;;  %vm3926_vm5 = vcmp.gt.f32.partialorder %v3686_v48, %v3678_v50  ;;  %v3812_v36 = vsel %vm8363_vm11, 1, %v6621_v63  ;;  %v3813_v55 = vsel %vm8352_vm8, 1, %v6621_v63 }
 0x2ad   : > { %v3806_v12 = vsel %vm8379_vm13, 1, %v6621_v63  ;;  %v3989_v62 = vsel %vm3925_vm6, %v3685_v25, %v3677_v29  ;;  %v3814_v58 = vsel %vm8368_vm15, 1, %v6621_v63  ;;  %vm3927_vm7 = vcmp.gt.f32.partialorder %v3687_v41, %v3679_v42 }
 0x2ae   : > { %v4117_v6 = vsel %vm3925_vm6, %v3813_v55, %v3805_v17  ;;  %v2737_v59 = vrot.slane %v2723_v52, %v8037_v31  ;;  %v3807_v43 = vsel %vm8383_vm14, 1, %v6621_v63  ;;  %v3988_v60 = vsel %vm3924_vm10, %v3684_v44, %v3676_v32 }
 0x2af   : > { %v3990_v4 = vsel %vm3926_vm5, %v3686_v48, %v3678_v50  ;;  %v4116_v27 = vsel %vm3924_vm10, %v3812_v36, %v3804_v26  ;;  %v4118_v34 = vsel %vm3926_vm5, %v3814_v58, %v3806_v12  ;;  %v4277_v8 = vrot.slane %v3989_v62, %v8057_v21 }
 0x2b0   : > { %v2513_v10 = vadd.f32 %v8027_v7, %v2474_v53  ;;  %v3815_v54 = vsel %vm8373_vm0, 1, %v6621_v63  ;;  %v3991_v19 = vsel %vm3927_vm7, %v3687_v41, %v3679_v42  ;;  %v4052_v18 = vsel %vm3924_vm10, 1, %v6621_v63 }
 0x2b1   : > { %v4740_v13 = vrot.slane %v4117_v6, %v8057_v21  ;;  %v4119_v40 = vsel %vm3927_vm7, %v3815_v54, %v3807_v43  ;;  %v4273_v20 = vrot.slane %v3988_v60, %v8057_v21  ;;  %v4281_v16 = vrot.slane %v3990_v4, %v8057_v21 }
 0x2b2   : > { %v4736_v9 = vrot.slane %v4116_v27, %v8057_v21  ;;  %v4744_v28 = vrot.slane %v4118_v34, %v8057_v21  ;;  %v2738_v49 = vcombine.high %v8392_v61, %v8392_v61  ;;  %v2739_v37 = vcombine.high %v2737_v59, %v2737_v59 }
 0x2b3   : > { %v3304_v24 = vrot.slane %v8392_v61, 7  ;;  %v4053_v45 = vsel %vm3925_vm6, 1, %v6621_v63  ;;  %vm10255_vm8 = vcmask 1042434   ;;  %vm10256_vm9 = vcmask 1041409  }
 0x2b4   : > { %v4506_v14 = vsel %vm10255_vm8, %v4277_v8, %v4273_v20  ;;  %v4965_v11 = vsel %vm10256_vm9, %v4740_v13, %v4736_v9  ;;  %v2545_v15 = vmax.f32 %v2513_v10, 0.0  ;;  %v4054_v0 = vsel %vm3926_vm5, 1, %v6621_v63  ;;  %vm10258_vm15 = vmmov %vm10255_vm8 }
 0x2b5   : > { %v4055_v30 = vsel %vm3927_vm7, 1, %v6621_v63  ;;  %v3305_v56 = vrot.slane %v2738_v49, 7  ;;  %v3306_v23 = vrot.slane %v2737_v59, 7  ;;  %v4285_v39 = vrot.slane %v3991_v19, %v8057_v21 }
 0x2b6   : > { %v4748_v38 = vrot.slane %v4119_v40, %v8057_v21  ;;  %v3307_v3 = vrot.slane %v2739_v37, 7  ;;  %v2689_v1 = vcombine.high %v2545_v15, %v2545_v15  ;;  %vm10257_vm11 = vcmask 1043459  }
 0x2b7   : > { %v4507_v33 = vsel %vm10257_vm11, %v4281_v16, %v4506_v14  ;;  %v4966_v51 = vsel %vm10258_vm15, %v4744_v28, %v4965_v11  ;;  %vm8461_vm0 = vcmp.gt.f32.partialorder %v8392_v61, %v3304_v24  ;;  %v8465_v22 = vadd.s32 2, %v4052_v18  ;;  %vm10265_vm6 = vmmov %vm10257_vm11 }
 0x2b8   : > { %v8467_v57 = vadd.s32 2, %v4053_v45  ;;  %v8469_v25 = vadd.s32 2, %v4054_v0  ;;  %v8471_v5 = vadd.s32 2, %v4055_v30  ;;  %vm8473_vm3 = vcmp.gt.f32.partialorder %v2738_v49, %v3305_v56 }
 0x2b9   : > { %vm3562_vm13 = vcmp.gt.f32.partialorder %v2737_v59, %v3306_v23  ;;  %v2696_v29 = vrot.slane %v2545_v15, %v8037_v31  ;;  %v2703_v50 = vrot.slane %v2689_v1, %v8037_v31  ;;  %vm8479_vm14 = vcmp.gt.f32.partialorder %v2739_v37, %v3307_v3 }
 0x2ba   : > { %v3688_v53 = vsel %vm8461_vm0, %v8392_v61, %v3304_v24  ;;  %v4508_v44 = vsel %vm10202_vm12, %v4285_v39, %v4507_v33  ;;  %v8488_v48 = vsel %vm10265_vm6, %v4748_v38, %v4966_v51  ;;  %v3689_v36 = vsel %vm8473_vm3, %v2738_v49, %v3305_v56  ;;  %v2367_v61 = vpop.f32.mrf.mxu1 }
 0x2bb   : > { %v2704_v42 = vcombine.high %v2696_v29, %v2696_v29  ;;  %v2705_v17 = vcombine.high %v2703_v50, %v2703_v50  ;;  %v3296_v41 = vrot.slane %v2696_v29, 7  ;;  %v3298_v26 = vrot.slane %v2703_v50, 7 }
 0x2bc   : > { %v3690_v55 = vsel %vm3562_vm13, %v2737_v59, %v3306_v23  ;;  %v3816_v12 = vsel %vm8461_vm0, 1, %v6621_v63  ;;  %v3818_v62 = vsel %vm3562_vm13, 1, %v6621_v63  ;;  %v3691_v60 = vsel %vm8479_vm14, %v2739_v37, %v3307_v3  ;;  %v5885_v18 = vpop.f32.mrf.mxu1 }
 0x2bd   : > { %v3297_v58 = vrot.slane %v2704_v42, 7  ;;  %v3299_v6 = vrot.slane %v2705_v17, 7  ;;  %vm3552_vm10 = vcmp.gt.f32.partialorder %v2696_v29, %v3296_v41  ;;  %vm8496_vm5 = vcmp.gt.f32.partialorder %v2703_v50, %v3298_v26 }
 0x2be   : > { %v3680_v4 = vsel %vm3552_vm10, %v2696_v29, %v3296_v41  ;;  %v3682_v59 = vsel %vm8496_vm5, %v2703_v50, %v3298_v26  ;;  %v2479_v27 = vmul.f32 %v5884_v46, %v8015_v47  ;;  %v3808_v54 = vsel %vm3552_vm10, 1, %v6621_v63  ;;  %v2370_v29 = vpop.f32.mrf.mxu1 }
 0x2bf   : > { %vm3553_vm7 = vcmp.gt.f32.partialorder %v2704_v42, %v3297_v58  ;;  %vm8505_vm8 = vcmp.gt.f32.partialorder %v2705_v17, %v3299_v6  ;;  %vm3928_vm9 = vcmp.gt.f32.partialorder %v3688_v53, %v3680_v4  ;;  %vm3930_vm11 = vcmp.gt.f32.partialorder %v3690_v55, %v3682_v59 }
 0x2c0   : > { %v3681_v8 = vsel %vm3553_vm7, %v2704_v42, %v3297_v58  ;;  %v3683_v10 = vsel %vm8505_vm8, %v2705_v17, %v3299_v6  ;;  %v2477_v19 = vmul.f32 %v8015_v47, %v2367_v61  ;;  %v3809_v13 = vsel %vm3553_vm7, 1, %v6621_v63 }
 0x2c1   : > { %vm3929_vm15 = vcmp.gt.f32.partialorder %v3689_v36, %v3681_v8  ;;  %vm3931_vm0 = vcmp.gt.f32.partialorder %v3691_v60, %v3683_v10  ;;  %v3992_v40 = vsel %vm3928_vm9, %v3688_v53, %v3680_v4  ;;  %v3810_v20 = vsel %vm8496_vm5, 1, %v6621_v63 }
 0x2c2   : > { %v3993_v16 = vsel %vm3929_vm15, %v3689_v36, %v3681_v8  ;;  %v3994_v9 = vsel %vm3930_vm11, %v3690_v55, %v3682_v59  ;;  %v3995_v28 = vsel %vm3931_vm0, %v3691_v60, %v3683_v10  ;;  %v3817_v49 = vsel %vm8473_vm3, 1, %v6621_v63 }
 0x2c3   : > { %v3811_v37 = vsel %vm8505_vm8, 1, %v6621_v63  ;;  %v4120_v24 = vsel %vm3928_vm9, %v3816_v12, %v3808_v54  ;;  %v2480_v45 = vmul.f32 %v5885_v18, %v8015_v47  ;;  %v3819_v14 = vsel %vm8479_vm14, 1, %v6621_v63  ;;  %vm10273_vm14 = vmmov %vm10265_vm6 }
 0x2c4   : > { %v4121_v11 = vsel %vm3929_vm15, %v3817_v49, %v3809_v13  ;;  %v4289_v15 = vrot.slane %v3992_v40, %v8057_v21  ;;  %v4293_v0 = vrot.slane %v3993_v16, %v8057_v21  ;;  %v4122_v30 = vsel %vm3930_vm11, %v3818_v62, %v3810_v20 }
 0x2c5   : > { %v4297_v56 = vrot.slane %v3994_v9, %v8057_v21  ;;  %v4301_v23 = vrot.slane %v3995_v28, %v8057_v21  ;;  %v2518_v39 = vadd.f32 %v8027_v7, %v2479_v27  ;;  %v4123_v38 = vsel %vm3931_vm0, %v3819_v14, %v3811_v37 }
 0x2c6   : > { %v4509_v3 = vsel %vm4500_vm1, %v4289_v15, %v4508_v44  ;;  %v4752_v1 = vrot.slane %v4120_v24, %v8057_v21  ;;  %v2516_v33 = vadd.f32 %v8027_v7, %v2477_v19  ;;  %v4056_v51 = vsel %vm3928_vm9, 1, %v6621_v63 }
 0x2c7   : > { %v4510_v2 = vsel %vm4502_vm2, %v4293_v0, %v4509_v3  ;;  %4567 = vst [vmem:[%s8253_s20 + $0xf] sm:$0x1] %v4301_v23  ;;  %v4756_v46 = vrot.slane %v4121_v11, %v8057_v21  ;;  %v2519_v32 = vadd.f32 %v8027_v7, %v2480_v45  ;;  %v4057_v50 = vsel %vm3929_vm15, 1, %v6621_v63 }
 0x2c8   : > { %v4058_v52 = vsel %vm3930_vm11, 1, %v6621_v63  ;;  %v4511_v44 = vsel %vm4504_vm4, %v4297_v56, %v4510_v2  ;;  %v4760_v42 = vrot.slane %v4122_v30, %v8057_v21  ;;  %v4059_v53 = vsel %vm3931_vm0, 1, %v6621_v63 }
 0x2c9   : > { %4566 = vst [vmem:[%s8253_s20 + $0x7] sm:$0xfe] %v4511_v44  ;;  %v4764_v17 = vrot.slane %v4123_v38, %v8057_v21  ;;  %v4968_v41 = vsel %vm10202_vm12, %v4752_v1, %v8488_v48  ;;  %v2550_v26 = vmax.f32 %v2518_v39, 0.0  ;;  %v4644_v36 = vmul.u32 16, %v8465_v22 }
 0x2ca   : > { %v4969_v12 = vsel %vm4500_vm1, %v4756_v46, %v4968_v41  ;;  %v2548_v55 = vmax.f32 %v2516_v33, 0.0  ;;  %v2478_v62 = vmul.f32 %v8015_v47, %v2370_v29  ;;  %v4584_v61 = vadd.s32 2, %v4056_v51 }
 0x2cb   : > { %v4585_v58 = vadd.s32 2, %v4057_v50  ;;  %v4586_v6 = vadd.s32 2, %v4058_v52  ;;  %v4970_v43 = vsel %vm4502_vm2, %v4760_v42, %v4969_v12  ;;  %v4587_v60 = vadd.s32 2, %v4059_v53 }
 0x2cc   : > { %v4971_v4 = vsel %vm4504_vm4, %v4764_v17, %v4970_v43  ;;  %v2774_v59 = vcombine.high %v2550_v26, %v2550_v26  ;;  %v8567_v27 = vrot.slane %v2550_v26, %v8037_v31  ;;  %v4645_v48 = vmul.u32 16, %v8467_v57 }
 0x2cd   : > { %v4646_v22 = vmul.u32 16, %v8469_v25  ;;  %v5015_v34 = vadd.s32 %v4971_v4, %v8268_v35  ;;  %v8572_v8 = vmax.f32 %v2519_v32, 0.0  ;;  %v4647_v47 = vmul.u32 16, %v8471_v5 }
 0x2ce   : > { %v2740_v10 = vcombine.high %v2548_v55, %v2548_v55  ;;  %v2747_v54 = vrot.slane %v2548_v55, %v8037_v31  ;;  %v8577_v19 = vadd.f32 %v8027_v7, %v2478_v62  ;;  %v4648_v18 = vmul.u32 16, %v4584_v61 }
 0x2cf   : > { %v4649_v13 = vmul.u32 16, %v4585_v58  ;;  %v5039_v40 = vcombine.high %v5015_v34, %v5015_v34  ;;  %v5046_v20 = vrot.slane %v5015_v34, %v8037_v31  ;;  %v4650_v57 = vmul.u32 16, %v4586_v6 }
 0x2d0   : > { %v4651_v16 = vmul.u32 16, %v4587_v60  ;;  %v8581_v25 = vrot.slane %v2774_v59, %v8037_v31  ;;  %v2789_v9 = vcombine.high %v8567_v27, %v8567_v27  ;;  %v2791_v7 = vcombine.high %v8572_v8, %v8572_v8 }
 0x2d1   : > { %v5053_v5 = vrot.slane %v5039_v40, %v8037_v31  ;;  %v5054_v28 = vcombine.high %v5046_v20, %v5046_v20  ;;  %v5162_v49 = vrot.slane %v5046_v20, 7  ;;  %v5199_v37 = vadd.s32 %v5046_v20, %v4645_v48 }
 0x2d2   : > { %v3316_v24 = vrot.slane %v8567_v27, 7  ;;  %v2754_v45 = vrot.slane %v2740_v10, %v8037_v31  ;;  %v2755_v14 = vcombine.high %v2747_v54, %v2747_v54  ;;  %v2790_v23 = vcombine.high %v8581_v25, %v8581_v25 }
 0x2d3   : > { %v5055_v11 = vcombine.high %v5053_v5, %v5053_v5  ;;  %v5163_v15 = vrot.slane %v5054_v28, 7  ;;  %v5164_v0 = vrot.slane %v5053_v5, 7  ;;  %v5198_v30 = vadd.s32 %v5162_v49, %v4644_v36 }
 0x2d4   : > { %v5201_v56 = vadd.s32 %v5054_v28, %v4647_v47  ;;  %v3317_v39 = vrot.slane %v2789_v9, 7  ;;  %v3308_v38 = vrot.slane %v2747_v54, 7  ;;  %v5203_v2 = vadd.s32 %v5053_v5, %v4649_v13 }
 0x2d5   : > { %v5165_v3 = vrot.slane %v5055_v11, 7  ;;  %v5200_v1 = vadd.s32 %v5163_v15, %v4646_v22  ;;  %v5202_v33 = vadd.s32 %v5164_v0, %v4648_v18  ;;  %v5205_v51 = vadd.s32 %v5055_v11, %v4651_v16 }
 0x2d6   : > { %v5289_v46 = vrot.slane %v5198_v30, %v8057_v21  ;;  %v5293_v32 = vrot.slane %v5199_v37, %v8057_v21  ;;  %v2756_v29 = vcombine.high %v2754_v45, %v2754_v45  ;;  %v3309_v42 = vrot.slane %v2755_v14, 7 }
 0x2d7   : > { %v5204_v50 = vadd.s32 %v5165_v3, %v4650_v57  ;;  %v5297_v52 = vrot.slane %v5200_v1, %v8057_v21  ;;  %v5317_v44 = vrot.slane %v5205_v51, %v8057_v21  ;;  %v5301_v53 = vrot.slane %v5201_v56, %v8057_v21 }
 0x2d8   : > { %vm10270_vm3 = vcmask 1042434   ;;  %v3318_v41 = vrot.slane %v8581_v25, 7  ;;  %vm8600_vm13 = vcmp.gt.f32.partialorder %v8567_v27, %v3316_v24  ;;  %v5305_v36 = vrot.slane %v5202_v33, %v8057_v21 }
 0x2d9   : > { %v5516_v17 = vsel %vm10270_vm3, %v5293_v32, %v5289_v46  ;;  %5561 = vst [vmem:[%s8333_s12 + $0xf] sm:$0x1] %v5317_v44  ;;  %v3319_v55 = vrot.slane %v2790_v23, 7  ;;  %vm8607_vm6 = vcmp.gt.f32.partialorder %v2789_v9, %v3317_v39  ;;  %v5309_v61 = vrot.slane %v5203_v2, %v8057_v21 }
 0x2da   : > { %v5517_v12 = vsel %vm10273_vm14, %v5297_v52, %v5516_v17  ;;  %v3310_v6 = vrot.slane %v2754_v45, 7  ;;  %v3311_v43 = vrot.slane %v2756_v29, 7  ;;  %v5313_v60 = vrot.slane %v5204_v50, %v8057_v21 }
 0x2db   : > { %v5518_v58 = vsel %vm10202_vm12, %v5301_v53, %v5517_v12  ;;  %vm8615_vm10 = vcmp.gt.f32.partialorder %v2747_v54, %v3308_v38  ;;  %vm3565_vm5 = vcmp.gt.f32.partialorder %v2755_v14, %v3309_v42  ;;  %vm8632_vm9 = vcmp.gt.f32.partialorder %v8581_v25, %v3318_v41 }
 0x2dc   : > { %v5519_v4 = vsel %vm4500_vm1, %v5305_v36, %v5518_v58  ;;  %vm8620_vm7 = vcmp.gt.f32.partialorder %v2754_v45, %v3310_v6  ;;  %vm8624_vm8 = vcmp.gt.f32.partialorder %v2756_v29, %v3311_v43  ;;  %v3692_v47 = vsel %vm8615_vm10, %v2747_v54, %v3308_v38 }
 0x2dd   : > { %v5520_v48 = vsel %vm4502_vm2, %v5309_v61, %v5519_v4  ;;  %v3693_v13 = vsel %vm3565_vm5, %v2755_v14, %v3309_v42  ;;  %v8638_v40 = vrot.slane %v8572_v8, %v8037_v31  ;;  %vm8641_vm11 = vcmp.gt.f32.partialorder %v2790_v23, %v3319_v55  ;;  %v5888_v42 = vpop.f32.mrf.mxu1 }
 0x2de   : > { %v5521_v10 = vsel %vm4504_vm4, %v5313_v60, %v5520_v48  ;;  %v3700_v54 = vsel %vm8600_vm13, %v8567_v27, %v3316_v24  ;;  %v3701_v57 = vsel %vm8607_vm6, %v2789_v9, %v3317_v39  ;;  %v3694_v16 = vsel %vm8620_vm7, %v2754_v45, %v3310_v6 }
 0x2df   : > { %5560 = vst [vmem:[%s8333_s12 + $0x7] sm:$0xfe] %v5521_v10  ;;  %v3695_v5 = vsel %vm8624_vm8, %v2756_v29, %v3311_v43  ;;  %v3821_v28 = vsel %vm3565_vm5, 1, %v6621_v63  ;;  %vm3932_vm15 = vcmp.gt.f32.partialorder %v3700_v54, %v3692_v47  ;;  %vm3933_vm0 = vcmp.gt.f32.partialorder %v3701_v57, %v3693_v13  ;;  %v8726_v43 = vld [vmem:[%s10183_s5] ss:$0 sm:$0xff] }
 0x2e0   : > { %v3702_v49 = vsel %vm8632_vm9, %v8581_v25, %v3318_v41  ;;  %v3820_v27 = vsel %vm8615_vm10, 1, %v6621_v63  ;;  %v3997_v9 = vsel %vm3933_vm0, %v3701_v57, %v3693_v13  ;;  %v8666_v37 = vrot.slane %v2791_v7, %v8037_v31 }
 0x2e1   : > { %v3703_v24 = vsel %vm8641_vm11, %v2790_v23, %v3319_v55  ;;  %v3829_v45 = vsel %vm8607_vm6, 1, %v6621_v63  ;;  %v3822_v25 = vsel %vm8620_vm7, 1, %v6621_v63  ;;  %vm3934_vm3 = vcmp.gt.f32.partialorder %v3702_v49, %v3694_v16 }
 0x2e2   : > { %v3828_v14 = vsel %vm8600_vm13, 1, %v6621_v63  ;;  %vm3935_vm14 = vcmp.gt.f32.partialorder %v3703_v24, %v3695_v5  ;;  %v3996_v8 = vsel %vm3932_vm15, %v3700_v54, %v3692_v47  ;;  %v4125_v7 = vsel %vm3933_vm0, %v3829_v45, %v3821_v28 }
 0x2e3   : > { %v3830_v11 = vsel %vm8632_vm9, 1, %v6621_v63  ;;  %v3823_v15 = vsel %vm8624_vm8, 1, %v6621_v63  ;;  %v4124_v0 = vsel %vm3932_vm15, %v3828_v14, %v3820_v27  ;;  %v4309_v30 = vrot.slane %v3997_v9, %v8057_v21 }
 0x2e4   : > { %v3998_v56 = vsel %vm3934_vm3, %v3702_v49, %v3694_v16  ;;  %v4126_v23 = vsel %vm3934_vm3, %v3830_v11, %v3822_v25  ;;  %v2806_v39 = vcombine.high %v8638_v40, %v8638_v40  ;;  %v2549_v38 = vmax.f32 %v8577_v19, 0.0 }
 0x2e5   : > { %v3831_v3 = vsel %vm8641_vm11, 1, %v6621_v63  ;;  %v3999_v1 = vsel %vm3935_vm14, %v3703_v24, %v3695_v5  ;;  %v4305_v33 = vrot.slane %v3996_v8, %v8057_v21  ;;  %v4772_v51 = vrot.slane %v4125_v7, %v8057_v21 }
 0x2e6   : > { %v4060_v2 = vsel %vm3932_vm15, 1, %v6621_v63  ;;  %v4061_v46 = vsel %vm3933_vm0, 1, %v6621_v63  ;;  %v4127_v32 = vsel %vm3935_vm14, %v3831_v3, %v3823_v15  ;;  %v4768_v19 = vrot.slane %v4124_v0, %v8057_v21 }
 0x2e7   : > { %v4313_v29 = vrot.slane %v3998_v56, %v8057_v21  ;;  %vm10286_vm13 = vcmask 1042434   ;;  %v4776_v52 = vrot.slane %v4126_v23, %v8057_v21  ;;  %v2807_v44 = vcombine.high %v8666_v37, %v8666_v37  ;;  %v2383_v23 = vpop.f32.mrf.mxu1 }
 0x2e8   : > { %v4512_v50 = vsel %vm10286_vm13, %v4309_v30, %v4305_v33  ;;  %vm10287_vm6 = vcmask 1041409   ;;  %v3320_v17 = vrot.slane %v8638_v40, 7  ;;  %v3321_v41 = vrot.slane %v2806_v39, 7  ;;  %vm10289_vm5 = vmmov %vm10286_vm13  ;;  %v8789_v30 = vld [vmem:[%s10184_s6] ss:$0 sm:$0xff] }
 0x2e9   : > { %v4972_v53 = vsel %vm10287_vm6, %v4772_v51, %v4768_v19  ;;  %v3322_v26 = vrot.slane %v8666_v37, 7  ;;  %v4062_v36 = vsel %vm3934_vm3, 1, %v6621_v63  ;;  %v3323_v12 = vrot.slane %v2807_v44, 7  ;;  %v5889_v48 = vpop.f32.mrf.mxu1 }
 0x2ea   : > { %v2757_v55 = vcombine.high %v2549_v38, %v2549_v38  ;;  %v2764_v62 = vrot.slane %v2549_v38, %v8037_v31  ;;  %v8719_v61 = vsel %vm3935_vm14, 1, %v6621_v63  ;;  %v4317_v58 = vrot.slane %v3999_v1, %v8057_v21 }
 0x2eb   : > { %v4780_v6 = vrot.slane %v4127_v32, %v8057_v21  ;;  %v2483_v60 = vmul.f32 %v8726_v43, %v5888_v42  ;;  %vm10288_vm10 = vcmask 1043459   ;;  %v4973_v59 = vsel %vm10289_vm5, %v4776_v52, %v4972_v53 }
 0x2ec   : > { %v4513_v4 = vsel %vm10288_vm10, %v4313_v29, %v4512_v50  ;;  %vm8732_vm7 = vcmp.gt.f32.partialorder %v8638_v40, %v3320_v17  ;;  %vm8736_vm8 = vcmp.gt.f32.partialorder %v2806_v39, %v3321_v41  ;;  %v8740_v34 = vadd.s32 4, %v4060_v2  ;;  %vm10298_vm15 = vmmov %vm10288_vm10 }
 0x2ed   : > { %v8742_v47 = vadd.s32 4, %v4061_v46  ;;  %v8744_v10 = vadd.s32 4, %v4062_v36  ;;  %vm8747_vm9 = vcmp.gt.f32.partialorder %v8666_v37, %v3322_v26  ;;  %vm8751_vm11 = vcmp.gt.f32.partialorder %v2807_v44, %v3323_v12 }
 0x2ee   : > { %v2771_v20 = vrot.slane %v2757_v55, %v8037_v31  ;;  %v2772_v54 = vcombine.high %v2764_v62, %v2764_v62  ;;  %v3312_v57 = vrot.slane %v2764_v62, 7  ;;  %v3704_v16 = vsel %vm8732_vm7, %v8638_v40, %v3320_v17 }
 0x2ef   : > { %v3705_v5 = vsel %vm8736_vm8, %v2806_v39, %v3321_v41  ;;  %v4514_v28 = vsel %vm10202_vm12, %v4317_v58, %v4513_v4  ;;  %v4974_v49 = vsel %vm10298_vm15, %v4780_v6, %v4973_v59  ;;  %v3706_v25 = vsel %vm8747_vm9, %v8666_v37, %v3322_v26 }
 0x2f0   : > { %v2773_v27 = vcombine.high %v2771_v20, %v2771_v20  ;;  %v3313_v9 = vrot.slane %v2772_v54, 7  ;;  %v3314_v24 = vrot.slane %v2771_v20, 7  ;;  %vm8763_vm0 = vcmp.gt.f32.partialorder %v2764_v62, %v3312_v57 }
 0x2f1   : > { %v3707_v40 = vsel %vm8751_vm11, %v2807_v44, %v3323_v12  ;;  %v3832_v14 = vsel %vm8732_vm7, 1, %v6621_v63  ;;  %v3696_v8 = vsel %vm8763_vm0, %v2764_v62, %v3312_v57  ;;  %v3833_v37 = vsel %vm8736_vm8, 1, %v6621_v63 }
 0x2f2   : > { %v3315_v7 = vrot.slane %v2773_v27, 7  ;;  %vm3569_vm3 = vcmp.gt.f32.partialorder %v2772_v54, %v3313_v9  ;;  %vm8777_vm14 = vcmp.gt.f32.partialorder %v2771_v20, %v3314_v24  ;;  %vm3936_vm13 = vcmp.gt.f32.partialorder %v3704_v16, %v3696_v8 }
 0x2f3   : > { %v3697_v15 = vsel %vm3569_vm3, %v2772_v54, %v3313_v9  ;;  %v3698_v0 = vsel %vm8777_vm14, %v2771_v20, %v3314_v24  ;;  %v2522_v56 = vadd.f32 %v8789_v30, %v2483_v60  ;;  %v3824_v39 = vsel %vm8763_vm0, 1, %v6621_v63 }
 0x2f4   : > { %vm3571_vm6 = vcmp.gt.f32.partialorder %v2773_v27, %v3315_v7  ;;  %vm3937_vm10 = vcmp.gt.f32.partialorder %v3705_v5, %v3697_v15  ;;  %vm3938_vm5 = vcmp.gt.f32.partialorder %v3706_v25, %v3698_v0  ;;  %v3825_v3 = vsel %vm3569_vm3, 1, %v6621_v63 }
 0x2f5   : > { %v3699_v38 = vsel %vm3571_vm6, %v2773_v27, %v3315_v7  ;;  %v4000_v1 = vsel %vm3936_vm13, %v3704_v16, %v3696_v8  ;;  %v4001_v33 = vsel %vm3937_vm10, %v3705_v5, %v3697_v15  ;;  %v3826_v51 = vsel %vm8777_vm14, 1, %v6621_v63 }
 0x2f6   : > { %vm3939_vm7 = vcmp.gt.f32.partialorder %v3707_v40, %v3699_v38  ;;  %v4002_v2 = vsel %vm3938_vm5, %v3706_v25, %v3698_v0  ;;  %v2481_v46 = vmul.f32 %v8726_v43, %v2383_v23  ;;  %v3834_v32 = vsel %vm8747_vm9, 1, %v6621_v63 }
 0x2f7   : > { %v3827_v19 = vsel %vm3571_vm6, 1, %v6621_v63  ;;  %v4003_v29 = vsel %vm3939_vm7, %v3707_v40, %v3699_v38  ;;  %v4128_v50 = vsel %vm3936_vm13, %v3832_v14, %v3824_v39  ;;  %v3835_v52 = vsel %vm8751_vm11, 1, %v6621_v63  ;;  %v2386_v14 = vpop.f32.mrf.mxu1 }
 0x2f8   : > { %v4129_v44 = vsel %vm3937_vm10, %v3833_v37, %v3825_v3  ;;  %v4321_v42 = vrot.slane %v4000_v1, %v8057_v21  ;;  %v4325_v53 = vrot.slane %v4001_v33, %v8057_v21  ;;  %v4130_v17 = vsel %vm3938_vm5, %v3834_v32, %v3826_v51 }
 0x2f9   : > { %v4329_v41 = vrot.slane %v4002_v2, %v8057_v21  ;;  %v4333_v26 = vrot.slane %v4003_v29, %v8057_v21  ;;  %v2554_v36 = vmax.f32 %v2522_v56, 0.0  ;;  %v4131_v12 = vsel %vm3939_vm7, %v3835_v52, %v3827_v19 }
 0x2fa   : > { %v4515_v55 = vsel %vm4500_vm1, %v4321_v42, %v4514_v28  ;;  %v4784_v62 = vrot.slane %v4128_v50, %v8057_v21  ;;  %v2520_v58 = vadd.f32 %v8789_v30, %v2481_v46  ;;  %v4591_v6 = vadd.s32 4, %v8719_v61 }
 0x2fb   : > { %v4064_v60 = vsel %vm3936_vm13, 1, %v6621_v63  ;;  %v4516_v4 = vsel %vm4502_vm2, %v4325_v53, %v4515_v55  ;;  %4569 = vst [vmem:[%s8253_s20 + $0x17] sm:$0x1] %v4333_v26  ;;  %v4788_v59 = vrot.slane %v4129_v44, %v8057_v21  ;;  %v4065_v22 = vsel %vm3937_vm10, 1, %v6621_v63 }
 0x2fc   : > { %v4066_v18 = vsel %vm3938_vm5, 1, %v6621_v63  ;;  %v4517_v13 = vsel %vm4504_vm4, %v4329_v41, %v4516_v4  ;;  %v4792_v20 = vrot.slane %v4130_v17, %v8057_v21  ;;  %v4067_v61 = vsel %vm3939_vm7, 1, %v6621_v63 }
 0x2fd   : > { %4568 = vst [vmem:[%s8253_s20 + $0xf] sm:$0xfe] %v4517_v13  ;;  %v4796_v54 = vrot.slane %v4131_v12, %v8057_v21  ;;  %v4975_v57 = vsel %vm10202_vm12, %v4784_v62, %v4974_v49  ;;  %v2842_v16 = vcombine.high %v2554_v36, %v2554_v36  ;;  %v4592_v28 = vadd.s32 4, %v4064_v60 }
 0x2fe   : > { %v4976_v5 = vsel %vm4500_vm1, %v4788_v59, %v4975_v57  ;;  %v8841_v27 = vrot.slane %v2554_v36, %v8037_v31  ;;  %v2552_v9 = vmax.f32 %v2520_v58, 0.0  ;;  %v4652_v24 = vmul.u32 16, %v8740_v34 }
 0x2ff   : > { %v4653_v45 = vmul.u32 16, %v8742_v47  ;;  %v4593_v25 = vadd.s32 4, %v4065_v22  ;;  %v4977_v40 = vsel %vm4502_vm2, %v4792_v20, %v4976_v5  ;;  %v4594_v8 = vadd.s32 4, %v4066_v18 }
 0x300   : > { %v4595_v7 = vadd.s32 4, %v4067_v61  ;;  %v4978_v49 = vsel %vm4504_vm4, %v4796_v54, %v4977_v40  ;;  %v2484_v11 = vmul.f32 %v8726_v43, %v5889_v48  ;;  %v4654_v37 = vmul.u32 16, %v8744_v10 }
 0x301   : > { %v4655_v15 = vmul.u32 16, %v4591_v6  ;;  %v5016_v0 = vadd.s32 %v4978_v49, %v8268_v35  ;;  %v8851_v56 = vrot.slane %v2842_v16, %v8037_v31  ;;  %v4656_v34 = vmul.u32 16, %v4592_v28 }
 0x302   : > { %v8855_v47 = vcombine.high %v8841_v27, %v8841_v27  ;;  %v2808_v23 = vcombine.high %v2552_v9, %v2552_v9  ;;  %v8858_v39 = vmul.f32 %v8726_v43, %v2386_v14  ;;  %v4657_v38 = vmul.u32 16, %v4593_v25 }
 0x303   : > { %v5056_v3 = vcombine.high %v5016_v0, %v5016_v0  ;;  %v5063_v1 = vrot.slane %v5016_v0, %v8037_v31  ;;  %v3332_v10 = vrot.slane %v8841_v27, 7  ;;  %v4658_v33 = vmul.u32 16, %v4594_v8 }
 0x304   : > { %v4659_v51 = vmul.u32 16, %v4595_v7  ;;  %v2815_v2 = vrot.slane %v2552_v9, %v8037_v31  ;;  %v2523_v46 = vadd.f32 %v8789_v30, %v2484_v11  ;;  %v2858_v50 = vcombine.high %v8851_v56, %v8851_v56 }
 0x305   : > { %v5070_v32 = vrot.slane %v5056_v3, %v8037_v31  ;;  %v5071_v19 = vcombine.high %v5063_v1, %v5063_v1  ;;  %v5166_v29 = vrot.slane %v5063_v1, 7  ;;  %v5207_v52 = vadd.s32 %v5063_v1, %v4653_v45 }
 0x306   : > { %v3333_v44 = vrot.slane %v8855_v47, 7  ;;  %v3334_v42 = vrot.slane %v8851_v56, 7  ;;  %v2822_v53 = vrot.slane %v2808_v23, %v8037_v31  ;;  %vm8871_vm8 = vcmp.gt.f32.partialorder %v8841_v27, %v3332_v10 }
 0x307   : > { %v5072_v17 = vcombine.high %v5070_v32, %v5070_v32  ;;  %v5167_v41 = vrot.slane %v5071_v19, 7  ;;  %v5168_v26 = vrot.slane %v5070_v32, 7  ;;  %v5206_v36 = vadd.s32 %v5166_v29, %v4652_v24 }
 0x308   : > { %v5209_v55 = vadd.s32 %v5071_v19, %v4655_v15  ;;  %v5211_v62 = vadd.s32 %v5070_v32, %v4657_v38  ;;  %v2823_v58 = vcombine.high %v2815_v2, %v2815_v2  ;;  %v3324_v6 = vrot.slane %v2815_v2, 7 }
 0x309   : > { %v5169_v60 = vrot.slane %v5072_v17, 7  ;;  %v5208_v4 = vadd.s32 %v5167_v41, %v4654_v37  ;;  %v5210_v59 = vadd.s32 %v5168_v26, %v4656_v34  ;;  %v5213_v48 = vadd.s32 %v5072_v17, %v4659_v51 }
 0x30a   : > { %v5321_v22 = vrot.slane %v5206_v36, %v8057_v21  ;;  %v5325_v18 = vrot.slane %v5207_v52, %v8057_v21  ;;  %v3335_v13 = vrot.slane %v2858_v50, 7  ;;  %vm8878_vm9 = vcmp.gt.f32.partialorder %v8855_v47, %v3333_v44 }
 0x30b   : > { %v5212_v61 = vadd.s32 %v5169_v60, %v4658_v33  ;;  %v5329_v54 = vrot.slane %v5208_v4, %v8057_v21  ;;  %v5333_v57 = vrot.slane %v5209_v55, %v8057_v21  ;;  %v5349_v16 = vrot.slane %v5213_v48, %v8057_v21 }
 0x30c   : > { %vm10307_vm11 = vcmask 1042434   ;;  %v2824_v5 = vcombine.high %v2822_v53, %v2822_v53  ;;  %v3325_v9 = vrot.slane %v2823_v58, 7  ;;  %v3326_v24 = vrot.slane %v2822_v53, 7 }
 0x30d   : > { %v5522_v28 = vsel %vm10307_vm11, %v5325_v18, %v5321_v22  ;;  %v5337_v45 = vrot.slane %v5210_v59, %v8057_v21  ;;  %v5341_v25 = vrot.slane %v5211_v62, %v8057_v21  ;;  %5563 = vst [vmem:[%s8333_s12 + $0x17] sm:$0x1] %v5349_v16  ;;  %vm8890_vm0 = vcmp.gt.f32.partialorder %v2815_v2, %v3324_v6 }
 0x30e   : > { %v5523_v40 = vsel %vm10298_vm15, %v5329_v54, %v5522_v28  ;;  %v3327_v7 = vrot.slane %v2824_v5, 7  ;;  %vm8895_vm3 = vcmp.gt.f32.partialorder %v2823_v58, %v3325_v9  ;;  %vm8899_vm14 = vcmp.gt.f32.partialorder %v2822_v53, %v3326_v24 }
 0x30f   : > { %v5524_v8 = vsel %vm10202_vm12, %v5333_v57, %v5523_v40  ;;  %v5345_v37 = vrot.slane %v5212_v61, %v8057_v21  ;;  %vm8906_vm13 = vcmp.gt.f32.partialorder %v8851_v56, %v3334_v42  ;;  %v3709_v34 = vsel %vm8895_vm3, %v2823_v58, %v3325_v9 }
 0x310   : > { %v5525_v15 = vsel %vm4500_vm1, %v5337_v45, %v5524_v8  ;;  %vm8913_vm6 = vcmp.gt.f32.partialorder %v2858_v50, %v3335_v13  ;;  %vm8917_vm10 = vcmp.gt.f32.partialorder %v2824_v5, %v3327_v7  ;;  %v3708_v1 = vsel %vm8890_vm0, %v2815_v2, %v3324_v6 }
 0x311   : > { %v5526_v23 = vsel %vm4502_vm2, %v5341_v25, %v5525_v15  ;;  %v3717_v51 = vsel %vm8878_vm9, %v8855_v47, %v3333_v44  ;;  %v3710_v32 = vsel %vm8899_vm14, %v2822_v53, %v3326_v24  ;;  %v3711_v19 = vsel %vm8917_vm10, %v2824_v5, %v3327_v7 }
 0x312   : > { %v5527_v33 = vsel %vm4504_vm4, %v5345_v37, %v5526_v23  ;;  %v3716_v29 = vsel %vm8871_vm8, %v8841_v27, %v3332_v10  ;;  %v3837_v2 = vsel %vm8895_vm3, 1, %v6621_v63  ;;  %vm3941_vm5 = vcmp.gt.f32.partialorder %v3717_v51, %v3709_v34 }
 0x313   : > { %5562 = vst [vmem:[%s8333_s12 + $0xf] sm:$0xfe] %v5527_v33  ;;  %v2555_v52 = vmax.f32 %v2523_v46, 0.0  ;;  %v3718_v47 = vsel %vm8906_vm13, %v8851_v56, %v3334_v42  ;;  %v3719_v44 = vsel %vm8913_vm6, %v2858_v50, %v3335_v13  ;;  %v3845_v53 = vsel %vm8878_vm9, 1, %v6621_v63  ;;  %v5892_v13 = vpop.f32.mrf.mxu1 }
 0x314   : > { %vm3940_vm7 = vcmp.gt.f32.partialorder %v3716_v29, %v3708_v1  ;;  %v3836_v27 = vsel %vm8890_vm0, 1, %v6621_v63  ;;  %vm3942_vm11 = vcmp.gt.f32.partialorder %v3718_v47, %v3710_v32  ;;  %vm3943_vm15 = vcmp.gt.f32.partialorder %v3719_v44, %v3711_v19 }
 0x315   : > { %v4005_v10 = vsel %vm3941_vm5, %v3717_v51, %v3709_v34  ;;  %v3844_v56 = vsel %vm8871_vm8, 1, %v6621_v63  ;;  %v3838_v46 = vsel %vm8899_vm14, 1, %v6621_v63  ;;  %v4133_v50 = vsel %vm3941_vm5, %v3845_v53, %v3837_v2  ;;  %v2399_v3 = vpop.f32.mrf.mxu1 }
 0x316   : > { %v2521_v42 = vadd.f32 %v8789_v30, %v8858_v39  ;;  %v3846_v17 = vsel %vm8906_vm13, 1, %v6621_v63  ;;  %v3839_v41 = vsel %vm8917_vm10, 1, %v6621_v63  ;;  %v4004_v26 = vsel %vm3940_vm7, %v3716_v29, %v3708_v1 }
 0x317   : > { %v2859_v36 = vcombine.high %v2555_v52, %v2555_v52  ;;  %v4006_v12 = vsel %vm3942_vm11, %v3718_v47, %v3710_v32  ;;  %v4007_v55 = vsel %vm3943_vm15, %v3719_v44, %v3711_v19  ;;  %v4132_v62 = vsel %vm3940_vm7, %v3844_v56, %v3836_v27 }
 0x318   : > { %v4341_v58 = vrot.slane %v4005_v10, %v8057_v21  ;;  %v3847_v39 = vsel %vm8913_vm6, 1, %v6621_v63  ;;  %v4068_v6 = vsel %vm3940_vm7, 1, %v6621_v63  ;;  %v4134_v60 = vsel %vm3942_vm11, %v3846_v17, %v3838_v46 }
 0x319   : > { %v4804_v4 = vrot.slane %v4133_v50, %v8057_v21  ;;  %v4069_v59 = vsel %vm3941_vm5, 1, %v6621_v63  ;;  %v4070_v48 = vsel %vm3942_vm11, 1, %v6621_v63  ;;  %v8982_v22 = vsel %vm3943_vm15, %v3847_v39, %v3839_v41 }
 0x31a   : > { %v4337_v18 = vrot.slane %v4004_v26, %v8057_v21  ;;  %v4345_v20 = vrot.slane %v4006_v12, %v8057_v21  ;;  %v4349_v61 = vrot.slane %v4007_v55, %v8057_v21  ;;  %v4800_v54 = vrot.slane %v4132_v62, %v8057_v21 }
 0x31b   : > { %v2866_v57 = vrot.slane %v2555_v52, %v8037_v31  ;;  %vm10320_vm8 = vcmask 1042434   ;;  %v4808_v28 = vrot.slane %v4134_v60, %v8057_v21  ;;  %v2873_v5 = vrot.slane %v2859_v36, %v8037_v31 }
 0x31c   : > { %v4518_v16 = vsel %vm10320_vm8, %v4341_v58, %v4337_v18  ;;  %v2553_v9 = vmax.f32 %v2521_v42, 0.0  ;;  %vm10321_vm9 = vcmask 1041409   ;;  %v2487_v40 = vmul.f32 %v8726_v43, %v5892_v13  ;;  %vm10323_vm3 = vmmov %vm10320_vm8 }
 0x31d   : > { %v4979_v24 = vsel %vm10321_vm9, %v4804_v4, %v4800_v54  ;;  %v2874_v45 = vcombine.high %v2866_v57, %v2866_v57  ;;  %v3336_v25 = vrot.slane %v2866_v57, 7  ;;  %v2875_v14 = vcombine.high %v2873_v5, %v2873_v5 }
 0x31e   : > { %v3338_v8 = vrot.slane %v2873_v5, 7  ;;  %v2825_v7 = vcombine.high %v2553_v9, %v2553_v9  ;;  %v2832_v49 = vrot.slane %v2553_v9, %v8037_v31  ;;  %v8997_v11 = vsel %vm3943_vm15, 1, %v6621_v63 }
 0x31f   : > { %vm10322_vm0 = vcmask 1043459   ;;  %v3337_v15 = vrot.slane %v2874_v45, 7  ;;  %v9000_v0 = vadd.s32 6, %v4068_v6  ;;  %v9002_v34 = vadd.s32 6, %v4069_v59 }
 0x320   : > { %v4519_v37 = vsel %vm10322_vm0, %v4345_v20, %v4518_v16  ;;  %v9004_v23 = vadd.s32 6, %v4070_v48  ;;  %v3339_v38 = vrot.slane %v2875_v14, 7  ;;  %v4812_v1 = vrot.slane %v8982_v22, %v8057_v21 }
 0x321   : > { %v4980_v33 = vsel %vm10323_vm3, %v4808_v28, %v4979_v24  ;;  %vm3592_vm14 = vcmp.gt.f32.partialorder %v2866_v57, %v3336_v25  ;;  %v2839_v51 = vrot.slane %v2825_v7, %v8037_v31  ;;  %vm9010_vm13 = vcmp.gt.f32.partialorder %v2873_v5, %v3338_v8 }
 0x322   : > { %v2840_v19 = vcombine.high %v2832_v49, %v2832_v49  ;;  %v4520_v29 = vsel %vm10202_vm12, %v4349_v61, %v4519_v37  ;;  %v2526_v2 = vadd.f32 %v8789_v30, %v2487_v40  ;;  %vm9016_vm6 = vcmp.gt.f32.partialorder %v2874_v45, %v3337_v15 }
 0x323   : > { %v2841_v47 = vcombine.high %v2839_v51, %v2839_v51  ;;  %v3328_v44 = vrot.slane %v2832_v49, 7  ;;  %v2485_v53 = vmul.f32 %v8726_v43, %v2399_v3  ;;  %vm9021_vm10 = vcmp.gt.f32.partialorder %v2875_v14, %v3339_v38 }
 0x324   : > { %v3720_v10 = vsel %vm3592_vm14, %v2866_v57, %v3336_v25  ;;  %v3329_v56 = vrot.slane %v2840_v19, 7  ;;  %v3330_v46 = vrot.slane %v2839_v51, 7  ;;  %v3722_v50 = vsel %vm9010_vm13, %v2873_v5, %v3338_v8 }
 0x325   : > { %v3848_v42 = vsel %vm3592_vm14, 1, %v6621_v63  ;;  %v3331_v17 = vrot.slane %v2841_v47, 7  ;;  %vm3584_vm5 = vcmp.gt.f32.partialorder %v2832_v49, %v3328_v44  ;;  %v3721_v41 = vsel %vm9016_vm6, %v2874_v45, %v3337_v15 }
 0x326   : > { %vm3585_vm7 = vcmp.gt.f32.partialorder %v2840_v19, %v3329_v56  ;;  %vm3586_vm11 = vcmp.gt.f32.partialorder %v2839_v51, %v3330_v46  ;;  %v3712_v26 = vsel %vm3584_vm5, %v2832_v49, %v3328_v44  ;;  %v3723_v36 = vsel %vm9021_vm10, %v2875_v14, %v3339_v38  ;;  %v5893_v38 = vpop.f32.mrf.mxu1 }
 0x327   : > { %vm9032_vm15 = vcmp.gt.f32.partialorder %v2841_v47, %v3331_v17  ;;  %v3713_v55 = vsel %vm3585_vm7, %v2840_v19, %v3329_v56  ;;  %v3714_v62 = vsel %vm3586_vm11, %v2839_v51, %v3330_v46  ;;  %v3840_v39 = vsel %vm3584_vm5, 1, %v6621_v63 }
 0x328   : > { %v3715_v58 = vsel %vm9032_vm15, %v2841_v47, %v3331_v17  ;;  %v3841_v6 = vsel %vm3585_vm7, 1, %v6621_v63  ;;  %vm3944_vm8 = vcmp.gt.f32.partialorder %v3720_v10, %v3712_v26  ;;  %vm3945_vm9 = vcmp.gt.f32.partialorder %v3721_v41, %v3713_v55 }
 0x329   : > { %vm3946_vm0 = vcmp.gt.f32.partialorder %v3722_v50, %v3714_v62  ;;  %vm3947_vm3 = vcmp.gt.f32.partialorder %v3723_v36, %v3715_v58  ;;  %v4008_v60 = vsel %vm3944_vm8, %v3720_v10, %v3712_v26  ;;  %v3842_v4 = vsel %vm3586_vm11, 1, %v6621_v63 }
 0x32a   : > { %v4009_v59 = vsel %vm3945_vm9, %v3721_v41, %v3713_v55  ;;  %v4010_v48 = vsel %vm3946_vm0, %v3722_v50, %v3714_v62  ;;  %v4011_v22 = vsel %vm3947_vm3, %v3723_v36, %v3715_v58  ;;  %v3849_v18 = vsel %vm9016_vm6, 1, %v6621_v63  ;;  %v2402_v50 = vpop.f32.mrf.mxu1 }
 0x32b   : > { %v3850_v13 = vsel %vm9010_vm13, 1, %v6621_v63  ;;  %v3851_v20 = vsel %vm9021_vm10, 1, %v6621_v63  ;;  %v3843_v61 = vsel %vm9032_vm15, 1, %v6621_v63  ;;  %v4136_v54 = vsel %vm3944_vm8, %v3848_v42, %v3840_v39 }
 0x32c   : > { %v4137_v57 = vsel %vm3945_vm9, %v3849_v18, %v3841_v6  ;;  %v4353_v16 = vrot.slane %v4008_v60, %v8057_v21  ;;  %v2558_v28 = vmax.f32 %v2526_v2, 0.0  ;;  %v4138_v5 = vsel %vm3946_vm0, %v3850_v13, %v3842_v4 }
 0x32d   : > { %v4357_v9 = vrot.slane %v4009_v59, %v8057_v21  ;;  %v4361_v24 = vrot.slane %v4010_v48, %v8057_v21  ;;  %v4365_v45 = vrot.slane %v4011_v22, %v8057_v21  ;;  %v4139_v25 = vsel %vm3947_vm3, %v3851_v20, %v3843_v61 }
 0x32e   : > { %v4521_v40 = vsel %vm4500_vm1, %v4353_v16, %v4520_v29  ;;  %vm10332_vm14 = vcmask 1043459   ;;  %v2524_v8 = vadd.f32 %v8789_v30, %v2485_v53  ;;  %v4072_v7 = vsel %vm3944_vm8, 1, %v6621_v63 }
 0x32f   : > { %v4981_v14 = vsel %vm10332_vm14, %v4812_v1, %v4980_v33  ;;  %v4522_v49 = vsel %vm4502_vm2, %v4357_v9, %v4521_v40  ;;  %4571 = vst [vmem:[%s8253_s20 + $0x1f] sm:$0x1] %v4365_v45  ;;  %v4816_v37 = vrot.slane %v4136_v54, %v8057_v21  ;;  %v4820_v15 = vrot.slane %v4137_v57, %v8057_v21  ;;  %vm10340_vm7 = vmmov %vm10332_vm14 }
 0x330   : > { %v4073_v3 = vsel %vm3945_vm9, 1, %v6621_v63  ;;  %v4074_v51 = vsel %vm3946_vm0, 1, %v6621_v63  ;;  %v4523_v1 = vsel %vm4504_vm4, %v4361_v24, %v4522_v49  ;;  %v4824_v33 = vrot.slane %v4138_v5, %v8057_v21 }
 0x331   : > { %v4075_v32 = vsel %vm3947_vm3, 1, %v6621_v63  ;;  %4570 = vst [vmem:[%s8253_s20 + $0x17] sm:$0xfe] %v4523_v1  ;;  %v4828_v19 = vrot.slane %v4139_v25, %v8057_v21  ;;  %v4982_v29 = vsel %vm10202_vm12, %v4816_v37, %v4981_v14  ;;  %v2910_v2 = vcombine.high %v2558_v28, %v2558_v28 }
 0x332   : > { %v4599_v52 = vadd.s32 6, %v8997_v11  ;;  %v4600_v47 = vadd.s32 6, %v4072_v7  ;;  %v4983_v44 = vsel %vm4500_vm1, %v4820_v15, %v4982_v29  ;;  %v9088_v53 = vrot.slane %v2558_v28, %v8037_v31 }
 0x333   : > { %v4660_v27 = vmul.u32 16, %v9000_v0  ;;  %v4601_v10 = vadd.s32 6, %v4073_v3  ;;  %v4602_v56 = vadd.s32 6, %v4074_v51  ;;  %v4984_v46 = vsel %vm4502_vm2, %v4824_v33, %v4983_v44 }
 0x334   : > { %v4603_v42 = vadd.s32 6, %v4075_v32  ;;  %v4985_v17 = vsel %vm4504_vm4, %v4828_v19, %v4984_v46  ;;  %v9094_v41 = vrot.slane %v2910_v2, %v8037_v31  ;;  %v2556_v11 = vmax.f32 %v2524_v8, 0.0 }
 0x335   : > { %v4661_v26 = vmul.u32 16, %v9002_v34  ;;  %v4662_v36 = vmul.u32 16, %v9004_v23  ;;  %v5017_v12 = vadd.s32 %v4985_v17, %v8268_v35  ;;  %v2488_v0 = vmul.f32 %v8726_v43, %v5893_v38 }
 0x336   : > { %v4663_v55 = vmul.u32 16, %v4599_v52  ;;  %v4664_v62 = vmul.u32 16, %v4600_v47  ;;  %v2925_v58 = vcombine.high %v9088_v53, %v9088_v53  ;;  %v9103_v39 = vmul.f32 %v8726_v43, %v2402_v50 }
 0x337   : > { %v4665_v6 = vmul.u32 16, %v4601_v10  ;;  %v4666_v60 = vmul.u32 16, %v4602_v56  ;;  %v5073_v4 = vcombine.high %v5017_v12, %v5017_v12  ;;  %v5080_v59 = vrot.slane %v5017_v12, %v8037_v31 }
 0x338   : > { %v4667_v34 = vmul.u32 16, %v4603_v42  ;;  %v9108_v23 = vcombine.high %v9094_v41, %v9094_v41  ;;  %v3348_v48 = vrot.slane %v9088_v53, 7  ;;  %v2876_v22 = vcombine.high %v2556_v11, %v2556_v11 }
 0x339   : > { %v5087_v18 = vrot.slane %v5073_v4, %v8037_v31  ;;  %v5088_v13 = vcombine.high %v5080_v59, %v5080_v59  ;;  %v5170_v20 = vrot.slane %v5080_v59, 7  ;;  %v2527_v61 = vadd.f32 %v8789_v30, %v2488_v0 }
 0x33a   : > { %v5215_v54 = vadd.s32 %v5080_v59, %v4661_v26  ;;  %v3349_v57 = vrot.slane %v2925_v58, 7  ;;  %v3350_v16 = vrot.slane %v9094_v41, 7  ;;  %v2883_v28 = vrot.slane %v2556_v11, %v8037_v31  ;;  %v5896_v59 = vpop.f32.mrf.mxu1 }
 0x33b   : > { %v5089_v5 = vcombine.high %v5087_v18, %v5087_v18  ;;  %v5171_v9 = vrot.slane %v5088_v13, 7  ;;  %v5172_v24 = vrot.slane %v5087_v18, 7  ;;  %v5214_v45 = vadd.s32 %v5170_v20, %v4660_v27 }
 0x33c   : > { %v5217_v25 = vadd.s32 %v5088_v13, %v4663_v55  ;;  %v5219_v40 = vadd.s32 %v5087_v18, %v4665_v6  ;;  %v3351_v14 = vrot.slane %v9108_v23, 7  ;;  %vm9117_vm13 = vcmp.gt.f32.partialorder %v9088_v53, %v3348_v48 }
 0x33d   : > { %v2890_v7 = vrot.slane %v2876_v22, %v8037_v31  ;;  %v5173_v49 = vrot.slane %v5089_v5, 7  ;;  %v5216_v37 = vadd.s32 %v5171_v9, %v4662_v36  ;;  %v5218_v15 = vadd.s32 %v5172_v24, %v4664_v62 }
 0x33e   : > { %v5221_v38 = vadd.s32 %v5089_v5, %v4667_v34  ;;  %v5353_v3 = vrot.slane %v5214_v45, %v8057_v21  ;;  %v5357_v51 = vrot.slane %v5215_v54, %v8057_v21  ;;  %vm9124_vm6 = vcmp.gt.f32.partialorder %v2925_v58, %v3349_v57 }
 0x33f   : > { %vm9129_vm10 = vcmp.gt.f32.partialorder %v9094_v41, %v3350_v16  ;;  %v5220_v32 = vadd.s32 %v5173_v49, %v4666_v60  ;;  %v5361_v19 = vrot.slane %v5216_v37, %v8057_v21  ;;  %v5365_v29 = vrot.slane %v5217_v25, %v8057_v21  ;;  %v2415_v60 = vpop.f32.mrf.mxu1 }
 0x340   : > { %v5381_v2 = vrot.slane %v5221_v38, %v8057_v21  ;;  %vm10339_vm5 = vcmask 1042434   ;;  %v2891_v47 = vcombine.high %v2883_v28, %v2883_v28  ;;  %v2892_v44 = vcombine.high %v2890_v7, %v2890_v7 }
 0x341   : > { %v5528_v52 = vsel %vm10339_vm5, %v5357_v51, %v5353_v3  ;;  %v3340_v27 = vrot.slane %v2883_v28, 7  ;;  %v5369_v10 = vrot.slane %v5218_v15, %v8057_v21  ;;  %v5373_v56 = vrot.slane %v5219_v40, %v8057_v21 }
 0x342   : > { %v5529_v46 = vsel %vm10340_vm7, %v5361_v19, %v5528_v52  ;;  %5565 = vst [vmem:[%s8333_s12 + $0x1f] sm:$0x1] %v5381_v2  ;;  %v3342_v50 = vrot.slane %v2890_v7, 7  ;;  %v3341_v17 = vrot.slane %v2891_v47, 7  ;;  %v3343_v11 = vrot.slane %v2892_v44, 7 }
 0x343   : > { %v5530_v42 = vsel %vm10202_vm12, %v5365_v29, %v5529_v46  ;;  %vm9142_vm11 = vcmp.gt.f32.partialorder %v2883_v28, %v3340_v27  ;;  %v5377_v36 = vrot.slane %v5220_v32, %v8057_v21  ;;  %vm9149_vm15 = vcmp.gt.f32.partialorder %v9108_v23, %v3351_v14 }
 0x344   : > { %v5531_v12 = vsel %vm4500_vm1, %v5369_v10, %v5530_v42  ;;  %vm9153_vm8 = vcmp.gt.f32.partialorder %v2890_v7, %v3342_v50  ;;  %v3733_v6 = vsel %vm9124_vm6, %v2925_v58, %v3349_v57  ;;  %vm9160_vm9 = vcmp.gt.f32.partialorder %v2891_v47, %v3341_v17 }
 0x345   : > { %v5532_v62 = vsel %vm4502_vm2, %v5373_v56, %v5531_v12  ;;  %vm9164_vm0 = vcmp.gt.f32.partialorder %v2892_v44, %v3343_v11  ;;  %v3724_v22 = vsel %vm9142_vm11, %v2883_v28, %v3340_v27  ;;  %v3725_v18 = vsel %vm9160_vm9, %v2891_v47, %v3341_v17 }
 0x346   : > { %v5533_v34 = vsel %vm4504_vm4, %v5377_v36, %v5532_v62  ;;  %v3726_v58 = vsel %vm9153_vm8, %v2890_v7, %v3342_v50  ;;  %v3727_v13 = vsel %vm9164_vm0, %v2892_v44, %v3343_v11  ;;  %vm3949_vm3 = vcmp.gt.f32.partialorder %v3733_v6, %v3725_v18 }
 0x347   : > { %5564 = vst [vmem:[%s8333_s12 + $0x17] sm:$0xfe] %v5533_v34  ;;  %v2559_v20 = vmax.f32 %v2527_v61, 0.0  ;;  %v3732_v54 = vsel %vm9117_vm13, %v9088_v53, %v3348_v48  ;;  %v3734_v57 = vsel %vm9129_vm10, %v9094_v41, %v3350_v16  ;;  %v2525_v28 = vadd.f32 %v8789_v30, %v9103_v39 }
 0x348   : > { %v2491_v5 = vmul.f32 %v8726_v43, %v5896_v59  ;;  %v3735_v9 = vsel %vm9149_vm15, %v9108_v23, %v3351_v14  ;;  %v3860_v61 = vsel %vm9117_vm13, 1, %v6621_v63  ;;  %vm3948_vm14 = vcmp.gt.f32.partialorder %v3732_v54, %v3724_v22 }
 0x349   : > { %vm3950_vm5 = vcmp.gt.f32.partialorder %v3734_v57, %v3726_v58  ;;  %v3861_v53 = vsel %vm9124_vm6, 1, %v6621_v63  ;;  %v3853_v41 = vsel %vm9160_vm9, 1, %v6621_v63  ;;  %vm3951_vm7 = vcmp.gt.f32.partialorder %v3735_v9, %v3727_v13 }
 0x34a   : > { %v4013_v39 = vsel %vm3949_vm3, %v3733_v6, %v3725_v18  ;;  %v3862_v23 = vsel %vm9129_vm10, 1, %v6621_v63  ;;  %v3863_v48 = vsel %vm9149_vm15, 1, %v6621_v63  ;;  %v3852_v16 = vsel %vm9142_vm11, 1, %v6621_v63 }
 0x34b   : > { %v2927_v24 = vcombine.high %v2559_v20, %v2559_v20  ;;  %v3854_v45 = vsel %vm9153_vm8, 1, %v6621_v63  ;;  %v3855_v25 = vsel %vm9164_vm0, 1, %v6621_v63  ;;  %v4012_v40 = vsel %vm3948_vm14, %v3732_v54, %v3724_v22 }
 0x34c   : > { %v4014_v14 = vsel %vm3950_vm5, %v3734_v57, %v3726_v58  ;;  %v4015_v8 = vsel %vm3951_vm7, %v3735_v9, %v3727_v13  ;;  %v4076_v7 = vsel %vm3948_vm14, 1, %v6621_v63  ;;  %v4141_v49 = vsel %vm3949_vm3, %v3861_v53, %v3853_v41 }
 0x34d   : > { %v4373_v37 = vrot.slane %v4013_v39, %v8057_v21  ;;  %v4077_v15 = vsel %vm3949_vm3, 1, %v6621_v63  ;;  %v4078_v38 = vsel %vm3950_vm5, 1, %v6621_v63  ;;  %v9228_v3 = vsel %vm3951_vm7, 1, %v6621_v63 }
 0x34e   : > { %v4140_v51 = vsel %vm3948_vm14, %v3860_v61, %v3852_v16  ;;  %v4142_v1 = vsel %vm3950_vm5, %v3862_v23, %v3854_v45  ;;  %v9233_v33 = vsel %vm3951_vm7, %v3863_v48, %v3855_v25  ;;  %v4369_v32 = vrot.slane %v4012_v40, %v8057_v21 }
 0x34f   : > { %v4377_v19 = vrot.slane %v4014_v14, %v8057_v21  ;;  %v4836_v29 = vrot.slane %v4141_v49, %v8057_v21  ;;  %v2934_v2 = vrot.slane %v2559_v20, %v8037_v31  ;;  %v2941_v52 = vrot.slane %v2927_v24, %v8037_v31 }
 0x350   : > { %v2557_v47 = vmax.f32 %v2525_v28, 0.0  ;;  %v4381_v44 = vrot.slane %v4015_v8, %v8057_v21  ;;  %vm10351_vm13 = vcmask 1042434   ;;  %v9242_v10 = vadd.s32 8, %v4076_v7 }
 0x351   : > { %v4524_v27 = vsel %vm10351_vm13, %v4373_v37, %v4369_v32  ;;  %v4832_v56 = vrot.slane %v4140_v51, %v8057_v21  ;;  %v2942_v46 = vcombine.high %v2934_v2, %v2934_v2  ;;  %v2943_v50 = vcombine.high %v2941_v52, %v2941_v52  ;;  %vm10360_vm9 = vmmov %vm10351_vm13 }
 0x352   : > { %v3352_v42 = vrot.slane %v2934_v2, 7  ;;  %v3354_v17 = vrot.slane %v2941_v52, 7  ;;  %v9245_v11 = vadd.s32 8, %v4077_v15  ;;  %v4840_v26 = vrot.slane %v4142_v1, %v8057_v21 }
 0x353   : > { %v2893_v36 = vcombine.high %v2557_v47, %v2557_v47  ;;  %v2900_v12 = vrot.slane %v2557_v47, %v8037_v31  ;;  %vm10352_vm6 = vcmask 1043459   ;;  %vm10353_vm10 = vcmask 1041409  }
 0x354   : > { %v4525_v0 = vsel %vm10352_vm6, %v4377_v19, %v4524_v27  ;;  %v4986_v55 = vsel %vm10353_vm10, %v4836_v29, %v4832_v56  ;;  %v3353_v62 = vrot.slane %v2942_v46, 7  ;;  %v3355_v6 = vrot.slane %v2943_v50, 7 }
 0x355   : > { %v9251_v4 = vadd.s32 8, %v4078_v38  ;;  %v4844_v59 = vrot.slane %v9233_v33, %v8057_v21  ;;  %vm9255_vm11 = vcmp.gt.f32.partialorder %v2934_v2, %v3352_v42  ;;  %v2530_v22 = vadd.f32 %v8789_v30, %v2491_v5 }
 0x356   : > { %vm9260_vm15 = vcmp.gt.f32.partialorder %v2942_v46, %v3353_v62  ;;  %vm9264_vm8 = vcmp.gt.f32.partialorder %v2941_v52, %v3354_v17  ;;  %v2907_v13 = vrot.slane %v2893_v36, %v8037_v31  ;;  %v2908_v20 = vcombine.high %v2900_v12, %v2900_v12 }
 0x357   : > { %v4987_v54 = vsel %vm10360_vm9, %v4840_v26, %v4986_v55  ;;  %vm9270_vm0 = vcmp.gt.f32.partialorder %v2943_v50, %v3355_v6  ;;  %v4526_v28 = vsel %vm10202_vm12, %v4381_v44, %v4525_v0  ;;  %v2489_v5 = vmul.f32 %v8726_v43, %v2415_v60 }
 0x358   : > { %v2909_v9 = vcombine.high %v2907_v13, %v2907_v13  ;;  %v3344_v61 = vrot.slane %v2900_v12, 7  ;;  %v3345_v53 = vrot.slane %v2908_v20, 7  ;;  %v3346_v41 = vrot.slane %v2907_v13, 7 }
 0x359   : > { %v3736_v39 = vsel %vm9255_vm11, %v2934_v2, %v3352_v42  ;;  %v3737_v23 = vsel %vm9260_vm15, %v2942_v46, %v3353_v62  ;;  %v3738_v48 = vsel %vm9264_vm8, %v2941_v52, %v3354_v17  ;;  %v2562_v16 = vmax.f32 %v2530_v22, 0.0 }
 0x35a   : > { %v3347_v24 = vrot.slane %v2909_v9, 7  ;;  %vm3600_vm3 = vcmp.gt.f32.partialorder %v2900_v12, %v3344_v61  ;;  %vm3601_vm14 = vcmp.gt.f32.partialorder %v2908_v20, %v3345_v53  ;;  %vm3602_vm5 = vcmp.gt.f32.partialorder %v2907_v13, %v3346_v41 }
 0x35b   : > { %v3739_v43 = vsel %vm9270_vm0, %v2943_v50, %v3355_v6  ;;  %v3728_v45 = vsel %vm3600_vm3, %v2900_v12, %v3344_v61  ;;  %v3729_v25 = vsel %vm3601_vm14, %v2908_v20, %v3345_v53  ;;  %v3730_v40 = vsel %vm3602_vm5, %v2907_v13, %v3346_v41 }
 0x35c   : > { %vm3603_vm7 = vcmp.gt.f32.partialorder %v2909_v9, %v3347_v24  ;;  %v3856_v14 = vsel %vm3600_vm3, 1, %v6621_v63  ;;  %v3857_v8 = vsel %vm3601_vm14, 1, %v6621_v63  ;;  %vm3952_vm13 = vcmp.gt.f32.partialorder %v3736_v39, %v3728_v45 }
 0x35d   : > { %v3731_v7 = vsel %vm3603_vm7, %v2909_v9, %v3347_v24  ;;  %v3858_v49 = vsel %vm3602_vm5, 1, %v6621_v63  ;;  %vm3953_vm6 = vcmp.gt.f32.partialorder %v3737_v23, %v3729_v25  ;;  %vm3954_vm10 = vcmp.gt.f32.partialorder %v3738_v48, %v3730_v40 }
 0x35e   : > { %vm3955_vm9 = vcmp.gt.f32.partialorder %v3739_v43, %v3731_v7  ;;  %v4016_v37 = vsel %vm3952_vm13, %v3736_v39, %v3728_v45  ;;  %v4017_v15 = vsel %vm3953_vm6, %v3737_v23, %v3729_v25  ;;  %v4018_v38 = vsel %vm3954_vm10, %v3738_v48, %v3730_v40  ;;  %v9358_v40 = vld [vmem:[%s10183_s5] ss:$0 sm:$0xff] }
 0x35f   : > { %v3864_v51 = vsel %vm9255_vm11, 1, %v6621_v63  ;;  %v3865_v1 = vsel %vm9260_vm15, 1, %v6621_v63  ;;  %v3859_v33 = vsel %vm3603_vm7, 1, %v6621_v63  ;;  %v4019_v32 = vsel %vm3955_vm9, %v3739_v43, %v3731_v7 }
 0x360   : > { %v3866_v19 = vsel %vm9264_vm8, 1, %v6621_v63  ;;  %v3867_v29 = vsel %vm9270_vm0, 1, %v6621_v63  ;;  %v4144_v2 = vsel %vm3952_vm13, %v3864_v51, %v3856_v14  ;;  %v4145_v52 = vsel %vm3953_vm6, %v3865_v1, %v3857_v8 }
 0x361   : > { %v4146_v47 = vsel %vm3954_vm10, %v3866_v19, %v3858_v49  ;;  %v4385_v44 = vrot.slane %v4016_v37, %v8057_v21  ;;  %v4389_v27 = vrot.slane %v4017_v15, %v8057_v21  ;;  %v4393_v56 = vrot.slane %v4018_v38, %v8057_v21 }
 0x362   : > { %v4147_v46 = vsel %vm3955_vm9, %v3867_v29, %v3859_v33  ;;  %v4397_v50 = vrot.slane %v4019_v32, %v8057_v21  ;;  %vm10363_vm11 = vcmask 1043459   ;;  %v2978_v17 = vcombine.high %v2562_v16, %v2562_v16 }
 0x363   : > { %v4988_v42 = vsel %vm10363_vm11, %v4844_v59, %v4987_v54  ;;  %v4527_v26 = vsel %vm4500_vm1, %v4385_v44, %v4526_v28  ;;  %v4848_v36 = vrot.slane %v4144_v2, %v8057_v21  ;;  %v4852_v12 = vrot.slane %v4145_v52, %v8057_v21  ;;  %vm10371_vm14 = vmmov %vm10363_vm11 }
 0x364   : > { %v2528_v0 = vadd.f32 %v8789_v30, %v2489_v5  ;;  %v4080_v55 = vsel %vm3952_vm13, 1, %v6621_v63  ;;  %v4528_v62 = vsel %vm4502_vm2, %v4389_v27, %v4527_v26  ;;  %4573 = vst [vmem:[%s8253_s20 + $0x27] sm:$0x1] %v4397_v50  ;;  %v4856_v6 = vrot.slane %v4146_v47, %v8057_v21 }
 0x365   : > { %v9323_v60 = vrot.slane %v2562_v16, %v8037_v31  ;;  %v4081_v59 = vsel %vm3953_vm6, 1, %v6621_v63  ;;  %v4082_v34 = vsel %vm3954_vm10, 1, %v6621_v63  ;;  %v4529_v22 = vsel %vm4504_vm4, %v4393_v56, %v4528_v62 }
 0x366   : > { %v4860_v30 = vrot.slane %v4147_v46, %v8057_v21  ;;  %v4607_v18 = vadd.s32 8, %v9228_v3  ;;  %v4668_v58 = vmul.u32 16, %v9242_v10  ;;  %v4083_v13 = vsel %vm3955_vm9, 1, %v6621_v63  ;;  %4572 = vst [vmem:[%s8253_s20 + $0x1f] sm:$0xfe] %v4529_v22  ;;  %v5897_v10 = vpop.f32.mrf.mxu1 }
 0x367   : > { %v4989_v20 = vsel %vm10202_vm12, %v4848_v36, %v4988_v42  ;;  %v4608_v54 = vadd.s32 8, %v4080_v55  ;;  %v9339_v28 = vrot.slane %v2978_v17, %v8037_v31  ;;  %v2560_v5 = vmax.f32 %v2528_v0, 0.0 }
 0x368   : > { %v4990_v57 = vsel %vm4500_vm1, %v4852_v12, %v4989_v20  ;;  %v4669_v9 = vmul.u32 16, %v9245_v11  ;;  %v4609_v61 = vadd.s32 8, %v4081_v59  ;;  %v4610_v53 = vadd.s32 8, %v4082_v34 }
 0x369   : > { %v4991_v3 = vsel %vm4502_vm2, %v4856_v6, %v4990_v57  ;;  %v4611_v41 = vadd.s32 8, %v4083_v13  ;;  %v9346_v23 = vcombine.high %v9323_v60, %v9323_v60  ;;  %v2944_v48 = vcombine.high %v2560_v5, %v2560_v5 }
 0x36a   : > { %v4992_v39 = vsel %vm4504_vm4, %v4860_v30, %v4991_v3  ;;  %v4670_v16 = vmul.u32 16, %v9251_v4  ;;  %v4671_v24 = vmul.u32 16, %v4607_v18  ;;  %v9352_v11 = vcombine.high %v9339_v28, %v9339_v28 }
 0x36b   : > { %v5018_v43 = vadd.s32 %v4992_v39, %v8268_v35  ;;  %v4672_v45 = vmul.u32 16, %v4608_v54  ;;  %v2951_v25 = vrot.slane %v2560_v5, %v8037_v31  ;;  %v9361_v14 = vmul.f32 %v9358_v40, %v5897_v10 }
 0x36c   : > { %v4673_v8 = vmul.u32 16, %v4609_v61  ;;  %v3364_v49 = vrot.slane %v9323_v60, 7  ;;  %v4674_v37 = vmul.u32 16, %v4610_v53  ;;  %v3365_v38 = vrot.slane %v9346_v23, 7 }
 0x36d   : > { %v5090_v4 = vcombine.high %v5018_v43, %v5018_v43  ;;  %v5097_v7 = vrot.slane %v5018_v43, %v8037_v31  ;;  %v4675_v15 = vmul.u32 16, %v4611_v41  ;;  %v2958_v51 = vrot.slane %v2944_v48, %v8037_v31 }
 0x36e   : > { %v3366_v19 = vrot.slane %v9339_v28, 7  ;;  %v3367_v2 = vrot.slane %v9352_v11, 7  ;;  %v2959_v52 = vcombine.high %v2951_v25, %v2951_v25  ;;  %vm9373_vm15 = vcmp.gt.f32.partialorder %v9323_v60, %v3364_v49 }
 0x36f   : > { %v5104_v1 = vrot.slane %v5090_v4, %v8037_v31  ;;  %v5105_v33 = vcombine.high %v5097_v7, %v5097_v7  ;;  %v5174_v32 = vrot.slane %v5097_v7, 7  ;;  %v5223_v29 = vadd.s32 %v5097_v7, %v4669_v9 }
 0x370   : > { %v2960_v47 = vcombine.high %v2958_v51, %v2958_v51  ;;  %v3356_v17 = vrot.slane %v2951_v25, 7  ;;  %v3357_v26 = vrot.slane %v2959_v52, 7  ;;  %v3358_v36 = vrot.slane %v2958_v51, 7 }
 0x371   : > { %v5106_v44 = vcombine.high %v5104_v1, %v5104_v1  ;;  %v5175_v27 = vrot.slane %v5105_v33, 7  ;;  %v5176_v56 = vrot.slane %v5104_v1, 7  ;;  %v5222_v46 = vadd.s32 %v5174_v32, %v4668_v58 }
 0x372   : > { %v5225_v42 = vadd.s32 %v5105_v33, %v4671_v24  ;;  %v5227_v6 = vadd.s32 %v5104_v1, %v4673_v8  ;;  %v5389_v34 = vrot.slane %v5223_v29, %v8057_v21  ;;  %v3359_v22 = vrot.slane %v2960_v47, 7  ;;  %v9437_v33 = vld [vmem:[%s10184_s6] ss:$0 sm:$0xff] }
 0x373   : > { %v5177_v12 = vrot.slane %v5106_v44, 7  ;;  %v5224_v0 = vadd.s32 %v5175_v27, %v4670_v16  ;;  %v5226_v55 = vadd.s32 %v5176_v56, %v4672_v45  ;;  %v5229_v62 = vadd.s32 %v5106_v44, %v4675_v15  ;;  %v2418_v16 = vpop.f32.mrf.mxu1 }
 0x374   : > { %v5385_v59 = vrot.slane %v5222_v46, %v8057_v21  ;;  %vm9382_vm8 = vcmp.gt.f32.partialorder %v9346_v23, %v3365_v38  ;;  %v5397_v20 = vrot.slane %v5225_v42, %v8057_v21  ;;  %vm10368_vm0 = vcmask 1042434  }
 0x375   : > { %v5228_v30 = vadd.s32 %v5177_v12, %v4674_v37  ;;  %v5393_v18 = vrot.slane %v5224_v0, %v8057_v21  ;;  %v5413_v58 = vrot.slane %v5229_v62, %v8057_v21  ;;  %v5401_v54 = vrot.slane %v5226_v55, %v8057_v21 }
 0x376   : > { %v5534_v57 = vsel %vm10368_vm0, %v5389_v34, %v5385_v59  ;;  %vm9389_vm3 = vcmp.gt.f32.partialorder %v2959_v52, %v3357_v26  ;;  %vm9395_vm5 = vcmp.gt.f32.partialorder %v2951_v25, %v3356_v17  ;;  %vm9399_vm7 = vcmp.gt.f32.partialorder %v2958_v51, %v3358_v36 }
 0x377   : > { %v5535_v9 = vsel %vm10371_vm14, %v5393_v18, %v5534_v57  ;;  %5567 = vst [vmem:[%s8333_s12 + $0x27] sm:$0x1] %v5413_v58  ;;  %vm9403_vm13 = vcmp.gt.f32.partialorder %v2960_v47, %v3359_v22  ;;  %v5405_v10 = vrot.slane %v5227_v6, %v8057_v21  ;;  %vm9410_vm6 = vcmp.gt.f32.partialorder %v9339_v28, %v3366_v19 }
 0x378   : > { %v5536_v41 = vsel %vm10202_vm12, %v5397_v20, %v5535_v9  ;;  %v3741_v48 = vsel %vm9389_vm3, %v2959_v52, %v3357_v26  ;;  %v5409_v24 = vrot.slane %v5228_v30, %v8057_v21  ;;  %vm9419_vm10 = vcmp.gt.f32.partialorder %v9352_v11, %v3367_v2 }
 0x379   : > { %v5537_v43 = vsel %vm4500_vm1, %v5401_v54, %v5536_v41  ;;  %v3749_v8 = vsel %vm9382_vm8, %v9346_v23, %v3365_v38  ;;  %v3740_v7 = vsel %vm9395_vm5, %v2951_v25, %v3356_v17  ;;  %v3742_v37 = vsel %vm9399_vm7, %v2958_v51, %v3358_v36  ;;  %v5900_v36 = vpop.f32.mrf.mxu1 }
 0x37a   : > { %v5538_v4 = vsel %vm4502_vm2, %v5405_v10, %v5537_v43  ;;  %v3743_v15 = vsel %vm9403_vm13, %v2960_v47, %v3359_v22  ;;  %vm3957_vm9 = vcmp.gt.f32.partialorder %v3749_v8, %v3741_v48  ;;  %v2531_v23 = vadd.f32 %v9437_v33, %v9361_v14 }
 0x37b   : > { %v5539_v1 = vsel %vm4504_vm4, %v5409_v24, %v5538_v4  ;;  %v2490_v38 = vmul.f32 %v9358_v40, %v2418_v16  ;;  %v3748_v25 = vsel %vm9373_vm15, %v9323_v60, %v3364_v49  ;;  %v3750_v51 = vsel %vm9410_vm6, %v9339_v28, %v3366_v19 }
 0x37c   : > { %5566 = vst [vmem:[%s8333_s12 + $0x1f] sm:$0xfe] %v5539_v1  ;;  %v3751_v32 = vsel %vm9419_vm10, %v9352_v11, %v3367_v2  ;;  %v3869_v14 = vsel %vm9389_vm3, 1, %v6621_v63  ;;  %v3876_v29 = vsel %vm9373_vm15, 1, %v6621_v63  ;;  %vm3956_vm11 = vcmp.gt.f32.partialorder %v3748_v25, %v3740_v7 }
 0x37d   : > { %vm3958_vm0 = vcmp.gt.f32.partialorder %v3750_v51, %v3742_v37  ;;  %vm3959_vm14 = vcmp.gt.f32.partialorder %v3751_v32, %v3743_v15  ;;  %v3877_v60 = vsel %vm9382_vm8, 1, %v6621_v63  ;;  %v3878_v28 = vsel %vm9410_vm6, 1, %v6621_v63 }
 0x37e   : > { %v3868_v11 = vsel %vm9395_vm5, 1, %v6621_v63  ;;  %v4021_v49 = vsel %vm3957_vm9, %v3749_v8, %v3741_v48  ;;  %v3879_v19 = vsel %vm9419_vm10, 1, %v6621_v63  ;;  %v3870_v2 = vsel %vm9399_vm7, 1, %v6621_v63 }
 0x37f   : > { %v3871_v52 = vsel %vm9403_vm13, 1, %v6621_v63  ;;  %v4149_v47 = vsel %vm3957_vm9, %v3877_v60, %v3869_v14  ;;  %v4020_v44 = vsel %vm3956_vm11, %v3748_v25, %v3740_v7  ;;  %v4022_v27 = vsel %vm3958_vm0, %v3750_v51, %v3742_v37 }
 0x380   : > { %v4023_v56 = vsel %vm3959_vm14, %v3751_v32, %v3743_v15  ;;  %v4084_v46 = vsel %vm3956_vm11, 1, %v6621_v63  ;;  %v4085_v50 = vsel %vm3957_vm9, 1, %v6621_v63  ;;  %v4086_v42 = vsel %vm3958_vm0, 1, %v6621_v63  ;;  %v2431_v15 = vpop.f32.mrf.mxu1 }
 0x381   : > { %v4148_v17 = vsel %vm3956_vm11, %v3876_v29, %v3868_v11  ;;  %v4405_v26 = vrot.slane %v4021_v49, %v8057_v21  ;;  %v4087_v12 = vsel %vm3959_vm14, 1, %v6621_v63  ;;  %v4150_v0 = vsel %vm3958_vm0, %v3878_v28, %v3870_v2 }
 0x382   : > { %v9495_v55 = vsel %vm3959_vm14, %v3879_v19, %v3871_v52  ;;  %v4868_v62 = vrot.slane %v4149_v47, %v8057_v21  ;;  %v4401_v6 = vrot.slane %v4020_v44, %v8057_v21  ;;  %v4409_v59 = vrot.slane %v4022_v27, %v8057_v21 }
 0x383   : > { %v2563_v34 = vmax.f32 %v2531_v23, 0.0  ;;  %v2529_v22 = vadd.f32 %v9437_v33, %v2490_v38  ;;  %v4413_v30 = vrot.slane %v4023_v56, %v8057_v21  ;;  %v9502_v18 = vadd.s32 10, %v4084_v46 }
 0x384   : > { %v4864_v58 = vrot.slane %v4148_v17, %v8057_v21  ;;  %v2495_v13 = vmul.f32 %v9358_v40, %v5900_v36  ;;  %vm10382_vm15 = vcmask 1042434   ;;  %v9508_v9 = vadd.s32 10, %v4085_v50 }
 0x385   : > { %v4530_v20 = vsel %vm10382_vm15, %v4405_v26, %v4401_v6  ;;  %v2995_v54 = vcombine.high %v2563_v34, %v2563_v34  ;;  %v3002_v57 = vrot.slane %v2563_v34, %v8037_v31  ;;  %v2561_v5 = vmax.f32 %v2529_v22, 0.0  ;;  %vm10387_vm7 = vmmov %vm10382_vm15 }
 0x386   : > { %v9510_v61 = vadd.s32 10, %v4086_v42  ;;  %v4872_v53 = vrot.slane %v4150_v0, %v8057_v21  ;;  %vm10383_vm8 = vcmask 1041409   ;;  %vm10384_vm3 = vcmask 1043459  }
 0x387   : > { %v4993_v3 = vsel %vm10383_vm8, %v4868_v62, %v4864_v58  ;;  %v3009_v10 = vrot.slane %v2995_v54, %v8037_v31  ;;  %v3010_v41 = vcombine.high %v3002_v57, %v3002_v57  ;;  %v3368_v39 = vrot.slane %v3002_v57, 7 }
 0x388   : > { %v2961_v48 = vcombine.high %v2561_v5, %v2561_v5  ;;  %v4531_v16 = vsel %vm10384_vm3, %v4409_v59, %v4530_v20  ;;  %v9516_v24 = vadd.s32 10, %v4087_v12  ;;  %v2968_v43 = vrot.slane %v2561_v5, %v8037_v31 }
 0x389   : > { %v2534_v45 = vadd.f32 %v9437_v33, %v2495_v13  ;;  %v3011_v8 = vcombine.high %v3009_v10, %v3009_v10  ;;  %v3369_v4 = vrot.slane %v3010_v41, 7  ;;  %v3370_v7 = vrot.slane %v3009_v10, 7 }
 0x38a   : > { %vm9520_vm5 = vcmp.gt.f32.partialorder %v3002_v57, %v3368_v39  ;;  %v4876_v1 = vrot.slane %v9495_v55, %v8057_v21  ;;  %v4994_v23 = vsel %vm10387_vm7, %v4872_v53, %v4993_v3  ;;  %v2975_v38 = vrot.slane %v2961_v48, %v8037_v31 }
 0x38b   : > { %v2976_v25 = vcombine.high %v2968_v43, %v2968_v43  ;;  %v3371_v51 = vrot.slane %v3011_v8, 7  ;;  %vm9528_vm13 = vcmp.gt.f32.partialorder %v3010_v41, %v3369_v4  ;;  %vm9532_vm6 = vcmp.gt.f32.partialorder %v3009_v10, %v3370_v7 }
 0x38c   : > { %v3360_v29 = vrot.slane %v2968_v43, 7  ;;  %v3752_v60 = vsel %vm9520_vm5, %v3002_v57, %v3368_v39  ;;  %v4532_v28 = vsel %vm10202_vm12, %v4413_v30, %v4531_v16  ;;  %v9539_v11 = vmax.f32 %v2534_v45, 0.0  ;;  %v5901_v45 = vpop.f32.mrf.mxu1 }
 0x38d   : > { %v2493_v49 = vmul.f32 %v9358_v40, %v2431_v15  ;;  %vm9542_vm10 = vcmp.gt.f32.partialorder %v3011_v8, %v3371_v51  ;;  %v2977_v2 = vcombine.high %v2975_v38, %v2975_v38  ;;  %v3361_v52 = vrot.slane %v2976_v25, 7 }
 0x38e   : > { %v3362_v47 = vrot.slane %v2975_v38, 7  ;;  %v3753_v44 = vsel %vm9528_vm13, %v3010_v41, %v3369_v4  ;;  %v3754_v27 = vsel %vm9532_vm6, %v3009_v10, %v3370_v7  ;;  %v3880_v56 = vsel %vm9520_vm5, 1, %v6621_v63 }
 0x38f   : > { %vm3616_vm9 = vcmp.gt.f32.partialorder %v2968_v43, %v3360_v29  ;;  %v3363_v46 = vrot.slane %v2977_v2, 7  ;;  %vm3617_vm11 = vcmp.gt.f32.partialorder %v2976_v25, %v3361_v52  ;;  %v3755_v42 = vsel %vm9542_vm10, %v3011_v8, %v3371_v51 }
 0x390   : > { %vm3618_vm0 = vcmp.gt.f32.partialorder %v2975_v38, %v3362_v47  ;;  %v3744_v50 = vsel %vm3616_vm9, %v2968_v43, %v3360_v29  ;;  %v3745_v17 = vsel %vm3617_vm11, %v2976_v25, %v3361_v52  ;;  %v3872_v36 = vsel %vm3616_vm9, 1, %v6621_v63 }
 0x391   : > { %v3746_v26 = vsel %vm3618_vm0, %v2975_v38, %v3362_v47  ;;  %vm3619_vm14 = vcmp.gt.f32.partialorder %v2977_v2, %v3363_v46  ;;  %v3873_v12 = vsel %vm3617_vm11, 1, %v6621_v63  ;;  %vm3960_vm15 = vcmp.gt.f32.partialorder %v3752_v60, %v3744_v50 }
 0x392   : > { %vm3961_vm8 = vcmp.gt.f32.partialorder %v3753_v44, %v3745_v17  ;;  %v3747_v0 = vsel %vm3619_vm14, %v2977_v2, %v3363_v46  ;;  %v3874_v55 = vsel %vm3618_vm0, 1, %v6621_v63  ;;  %v3875_v62 = vsel %vm3619_vm14, 1, %v6621_v63 }
 0x393   : > { %vm3962_vm3 = vcmp.gt.f32.partialorder %v3754_v27, %v3746_v26  ;;  %vm3963_vm5 = vcmp.gt.f32.partialorder %v3755_v42, %v3747_v0  ;;  %v4024_v6 = vsel %vm3960_vm15, %v3752_v60, %v3744_v50  ;;  %v4025_v59 = vsel %vm3961_vm8, %v3753_v44, %v3745_v17 }
 0x394   : > { %v4026_v34 = vsel %vm3962_vm3, %v3754_v27, %v3746_v26  ;;  %v3881_v22 = vsel %vm9528_vm13, 1, %v6621_v63  ;;  %v3882_v30 = vsel %vm9532_vm6, 1, %v6621_v63  ;;  %v3883_v58 = vsel %vm9542_vm10, 1, %v6621_v63 }
 0x395   : > { %v4027_v13 = vsel %vm3963_vm5, %v3755_v42, %v3747_v0  ;;  %v4152_v20 = vsel %vm3960_vm15, %v3880_v56, %v3872_v36  ;;  %v4153_v54 = vsel %vm3961_vm8, %v3881_v22, %v3873_v12  ;;  %v4154_v57 = vsel %vm3962_vm3, %v3882_v30, %v3874_v55 }
 0x396   : > { %v4155_v5 = vsel %vm3963_vm5, %v3883_v58, %v3875_v62  ;;  %v4417_v53 = vrot.slane %v4024_v6, %v8057_v21  ;;  %v4421_v3 = vrot.slane %v4025_v59, %v8057_v21  ;;  %v4425_v10 = vrot.slane %v4026_v34, %v8057_v21 }
 0x397   : > { %v4429_v41 = vrot.slane %v4027_v13, %v8057_v21  ;;  %v4676_v39 = vmul.u32 16, %v9502_v18  ;;  %vm10394_vm7 = vcmask 1043459   ;;  %v3046_v16 = vcombine.high %v9539_v11, %v9539_v11 }
 0x398   : > { %v4995_v48 = vsel %vm10394_vm7, %v4876_v1, %v4994_v23  ;;  %v2532_v43 = vadd.f32 %v9437_v33, %v2493_v49  ;;  %v4533_v8 = vsel %vm4500_vm1, %v4417_v53, %v4532_v28  ;;  %v4880_v4 = vrot.slane %v4152_v20, %v8057_v21  ;;  %v2434_v49 = vpop.f32.mrf.mxu1  ;;  %vm10398_vm10 = vmmov %vm10394_vm7 }
 0x399   : > { %4575 = vst [vmem:[%s8253_s20 + $0x2f] sm:$0x1] %v4429_v41  ;;  %v4884_v7 = vrot.slane %v4153_v54, %v8057_v21  ;;  %v4888_v37 = vrot.slane %v4154_v57, %v8057_v21  ;;  %v4088_v18 = vsel %vm3960_vm15, 1, %v6621_v63  ;;  %v4089_v15 = vsel %vm3961_vm8, 1, %v6621_v63 }
 0x39a   : > { %v4534_v1 = vsel %vm4502_vm2, %v4421_v3, %v4533_v8  ;;  %v4892_v23 = vrot.slane %v4155_v5, %v8057_v21  ;;  %v4090_v38 = vsel %vm3962_vm3, 1, %v6621_v63  ;;  %v4091_v25 = vsel %vm3963_vm5, 1, %v6621_v63 }
 0x39b   : > { %v4535_v51 = vsel %vm4504_vm4, %v4425_v10, %v4534_v1  ;;  %v4996_v32 = vsel %vm10202_vm12, %v4880_v4, %v4995_v48  ;;  %v9606_v29 = vrot.slane %v9539_v11, %v8037_v31  ;;  %v2564_v60 = vmax.f32 %v2532_v43, 0.0 }
 0x39c   : > { %4574 = vst [vmem:[%s8253_s20 + $0x27] sm:$0xfe] %v4535_v51  ;;  %v4997_v14 = vsel %vm4500_vm1, %v4884_v7, %v4996_v32  ;;  %v2496_v28 = vmul.f32 %v9358_v40, %v5901_v45  ;;  %v4677_v19 = vmul.u32 16, %v9508_v9  ;;  %v4616_v2 = vadd.s32 10, %v4088_v18 }
 0x39d   : > { %v4617_v52 = vadd.s32 10, %v4089_v15  ;;  %v4998_v47 = vsel %vm4502_vm2, %v4888_v37, %v4997_v14  ;;  %v4618_v44 = vadd.s32 10, %v4090_v38  ;;  %v4619_v27 = vadd.s32 10, %v4091_v25 }
 0x39e   : > { %v4999_v56 = vsel %vm4504_vm4, %v4892_v23, %v4998_v47  ;;  %v9613_v46 = vrot.slane %v3046_v16, %v8037_v31  ;;  %v4678_v11 = vmul.u32 16, %v9510_v61  ;;  %v4679_v50 = vmul.u32 16, %v9516_v24 }
 0x39f   : > { %v5019_v42 = vadd.s32 %v4999_v56, %v8268_v35  ;;  %v9619_v17 = vmul.f32 %v9358_v40, %v2434_v49  ;;  %v9623_v9 = vcombine.high %v9606_v29, %v9606_v29  ;;  %v3012_v26 = vcombine.high %v2564_v60, %v2564_v60 }
 0x3a0   : > { %v3019_v36 = vrot.slane %v2564_v60, %v8037_v31  ;;  %v9627_v12 = vadd.f32 %v9437_v33, %v2496_v28  ;;  %v4680_v0 = vmul.u32 16, %v4616_v2  ;;  %v4681_v55 = vmul.u32 16, %v4617_v52 }
 0x3a1   : > { %v5107_v61 = vcombine.high %v5019_v42, %v5019_v42  ;;  %v5114_v24 = vrot.slane %v5019_v42, %v8037_v31  ;;  %v4682_v62 = vmul.u32 16, %v4618_v44  ;;  %v4683_v6 = vmul.u32 16, %v4619_v27 }
 0x3a2   : > { %v9632_v59 = vcombine.high %v9613_v46, %v9613_v46  ;;  %v3380_v34 = vrot.slane %v9606_v29, 7  ;;  %v3382_v13 = vrot.slane %v9613_v46, 7  ;;  %v3381_v54 = vrot.slane %v9623_v9, 7 }
 0x3a3   : > { %v5121_v22 = vrot.slane %v5107_v61, %v8037_v31  ;;  %v5122_v30 = vcombine.high %v5114_v24, %v5114_v24  ;;  %v5178_v58 = vrot.slane %v5114_v24, 7  ;;  %v5231_v20 = vadd.s32 %v5114_v24, %v4677_v19 }
 0x3a4   : > { %v3026_v57 = vrot.slane %v3012_v26, %v8037_v31  ;;  %v3027_v5 = vcombine.high %v3019_v36, %v3019_v36  ;;  %v3383_v16 = vrot.slane %v9632_v59, 7  ;;  %vm9641_vm13 = vcmp.gt.f32.partialorder %v9606_v29, %v3380_v34 }
 0x3a5   : > { %v5123_v53 = vcombine.high %v5121_v22, %v5121_v22  ;;  %v5179_v3 = vrot.slane %v5122_v30, 7  ;;  %v5180_v10 = vrot.slane %v5121_v22, 7  ;;  %v5230_v41 = vadd.s32 %v5178_v58, %v4676_v39 }
 0x3a6   : > { %v5233_v48 = vadd.s32 %v5122_v30, %v4679_v50  ;;  %v3372_v45 = vrot.slane %v3019_v36, 7  ;;  %v5235_v18 = vadd.s32 %v5121_v22, %v4681_v55  ;;  %v5421_v1 = vrot.slane %v5231_v20, %v8057_v21 }
 0x3a7   : > { %v5181_v8 = vrot.slane %v5123_v53, 7  ;;  %v5232_v4 = vadd.s32 %v5179_v3, %v4678_v11  ;;  %v5234_v7 = vadd.s32 %v5180_v10, %v4680_v0  ;;  %v5237_v37 = vadd.s32 %v5123_v53, %v4683_v6 }
 0x3a8   : > { %v5417_v15 = vrot.slane %v5230_v41, %v8057_v21  ;;  %v3028_v39 = vcombine.high %v3026_v57, %v3026_v57  ;;  %v5429_v25 = vrot.slane %v5233_v48, %v8057_v21  ;;  %vm10397_vm6 = vcmask 1042434  }
 0x3a9   : > { %v5236_v23 = vadd.s32 %v5181_v8, %v4682_v62  ;;  %v5425_v38 = vrot.slane %v5232_v4, %v8057_v21  ;;  %v5445_v51 = vrot.slane %v5237_v37, %v8057_v21  ;;  %v3373_v14 = vrot.slane %v3027_v5, 7 }
 0x3aa   : > { %v5540_v32 = vsel %vm10397_vm6, %v5421_v1, %v5417_v15  ;;  %v3374_v60 = vrot.slane %v3026_v57, 7  ;;  %v3375_v28 = vrot.slane %v3028_v39, 7  ;;  %v5433_v49 = vrot.slane %v5234_v7, %v8057_v21 }
 0x3ab   : > { %v5541_v19 = vsel %vm10398_vm10, %v5425_v38, %v5540_v32  ;;  %5569 = vst [vmem:[%s8333_s12 + $0x2f] sm:$0x1] %v5445_v51  ;;  %vm9655_vm9 = vcmp.gt.f32.partialorder %v9623_v9, %v3381_v54  ;;  %vm9659_vm11 = vcmp.gt.f32.partialorder %v3019_v36, %v3372_v45  ;;  %v5437_v47 = vrot.slane %v5235_v18, %v8057_v21 }
 0x3ac   : > { %v5542_v44 = vsel %vm10202_vm12, %v5429_v25, %v5541_v19  ;;  %vm9665_vm0 = vcmp.gt.f32.partialorder %v3027_v5, %v3373_v14  ;;  %vm9669_vm14 = vcmp.gt.f32.partialorder %v3026_v57, %v3374_v60  ;;  %v5441_v11 = vrot.slane %v5236_v23, %v8057_v21 }
 0x3ad   : > { %v5543_v50 = vsel %vm4500_vm1, %v5433_v49, %v5542_v44  ;;  %vm9675_vm15 = vcmp.gt.f32.partialorder %v3028_v39, %v3375_v28  ;;  %v3757_v26 = vsel %vm9665_vm0, %v3027_v5, %v3373_v14  ;;  %vm9683_vm8 = vcmp.gt.f32.partialorder %v9613_v46, %v3382_v13  ;;  %v5904_v49 = vpop.f32.mrf.mxu1 }
 0x3ae   : > { %v5544_v0 = vsel %vm4502_vm2, %v5437_v47, %v5543_v50  ;;  %v3756_v61 = vsel %vm9659_vm11, %v3019_v36, %v3372_v45  ;;  %vm9691_vm3 = vcmp.gt.f32.partialorder %v9632_v59, %v3383_v16  ;;  %v3765_v6 = vsel %vm9655_vm9, %v9623_v9, %v3381_v54 }
 0x3af   : > { %v5545_v24 = vsel %vm4504_vm4, %v5441_v11, %v5544_v0  ;;  %v3758_v22 = vsel %vm9669_vm14, %v3026_v57, %v3374_v60  ;;  %v3764_v30 = vsel %vm9641_vm13, %v9606_v29, %v3380_v34  ;;  %v3759_v36 = vsel %vm9675_vm15, %v3028_v39, %v3375_v28 }
 0x3b0   : > { %5568 = vst [vmem:[%s8333_s12 + $0x27] sm:$0xfe] %v5545_v24  ;;  %vm3965_vm5 = vcmp.gt.f32.partialorder %v3765_v6, %v3757_v26  ;;  %v2567_v58 = vmax.f32 %v9627_v12, 0.0  ;;  %v3766_v20 = vsel %vm9683_vm8, %v9613_v46, %v3382_v13  ;;  %vm3964_vm7 = vcmp.gt.f32.partialorder %v3764_v30, %v3756_v61 }
 0x3b1   : > { %v2533_v9 = vadd.f32 %v9437_v33, %v9619_v17  ;;  %v3767_v54 = vsel %vm9691_vm3, %v9632_v59, %v3383_v16  ;;  %v3885_v29 = vsel %vm9665_vm0, 1, %v6621_v63  ;;  %vm3966_vm6 = vcmp.gt.f32.partialorder %v3766_v20, %v3758_v22 }
 0x3b2   : > { %v4029_v34 = vsel %vm3965_vm5, %v3765_v6, %v3757_v26  ;;  %v3892_v12 = vsel %vm9641_vm13, 1, %v6621_v63  ;;  %v3893_v46 = vsel %vm9655_vm9, 1, %v6621_v63  ;;  %v3884_v17 = vsel %vm9659_vm11, 1, %v6621_v63 }
 0x3b3   : > { %vm3967_vm10 = vcmp.gt.f32.partialorder %v3767_v54, %v3759_v36  ;;  %v3894_v59 = vsel %vm9683_vm8, 1, %v6621_v63  ;;  %v3886_v13 = vsel %vm9669_vm14, 1, %v6621_v63  ;;  %v4028_v57 = vsel %vm3964_vm7, %v3764_v30, %v3756_v61 }
 0x3b4   : > { %v3063_v5 = vcombine.high %v2567_v58, %v2567_v58  ;;  %v3895_v53 = vsel %vm9691_vm3, 1, %v6621_v63  ;;  %v4030_v3 = vsel %vm3966_vm6, %v3766_v20, %v3758_v22  ;;  %v4157_v10 = vsel %vm3965_vm5, %v3893_v46, %v3885_v29 }
 0x3b5   : > { %v4437_v41 = vrot.slane %v4029_v34, %v8057_v21  ;;  %v3887_v48 = vsel %vm9675_vm15, 1, %v6621_v63  ;;  %v4031_v16 = vsel %vm3967_vm10, %v3767_v54, %v3759_v36  ;;  %v4092_v43 = vsel %vm3964_vm7, 1, %v6621_v63 }
 0x3b6   : > { %v4156_v45 = vsel %vm3964_vm7, %v3892_v12, %v3884_v17  ;;  %v9750_v8 = vsel %vm3965_vm5, 1, %v6621_v63  ;;  %v9754_v4 = vsel %vm3966_vm6, 1, %v6621_v63  ;;  %v4158_v7 = vsel %vm3966_vm6, %v3894_v59, %v3886_v13 }
 0x3b7   : > { %v4433_v37 = vrot.slane %v4028_v57, %v8057_v21  ;;  %v4441_v18 = vrot.slane %v4030_v3, %v8057_v21  ;;  %v4900_v15 = vrot.slane %v4157_v10, %v8057_v21  ;;  %v3070_v1 = vrot.slane %v2567_v58, %v8037_v31 }
 0x3b8   : > { %v3077_v39 = vrot.slane %v3063_v5, %v8037_v31  ;;  %v9763_v23 = vsel %vm3967_vm10, %v3895_v53, %v3887_v48  ;;  %vm10413_vm13 = vcmask 1042434   ;;  %v4896_v25 = vrot.slane %v4156_v45, %v8057_v21 }
 0x3b9   : > { %v4536_v38 = vsel %vm10413_vm13, %v4437_v41, %v4433_v37  ;;  %v2565_v51 = vmax.f32 %v2533_v9, 0.0  ;;  %v3078_v32 = vcombine.high %v3070_v1, %v3070_v1  ;;  %v3384_v60 = vrot.slane %v3070_v1, 7  ;;  %vm10422_vm8 = vmmov %vm10413_vm13 }
 0x3ba   : > { %v3079_v14 = vcombine.high %v3077_v39, %v3077_v39  ;;  %v3386_v28 = vrot.slane %v3077_v39, 7  ;;  %v4445_v19 = vrot.slane %v4031_v16, %v8057_v21  ;;  %v4904_v2 = vrot.slane %v4158_v7, %v8057_v21 }
 0x3bb   : > { %v3029_v52 = vcombine.high %v2565_v51, %v2565_v51  ;;  %v3036_v47 = vrot.slane %v2565_v51, %v8037_v31  ;;  %vm10414_vm9 = vcmask 1043459   ;;  %vm10415_vm11 = vcmask 1041409  }
 0x3bc   : > { %v4537_v44 = vsel %vm10414_vm9, %v4441_v18, %v4536_v38  ;;  %v5000_v27 = vsel %vm10415_vm11, %v4900_v15, %v4896_v25  ;;  %v3385_v56 = vrot.slane %v3078_v32, 7  ;;  %v3387_v11 = vrot.slane %v3079_v14, 7  ;;  %v2447_v38 = vpop.f32.mrf.mxu1 }
 0x3bd   : > { %v9774_v50 = vsel %vm3967_vm10, 1, %v6621_v63  ;;  %v9776_v42 = vadd.s32 12, %v4092_v43  ;;  %vm9778_vm0 = vcmp.gt.f32.partialorder %v3070_v1, %v3384_v60  ;;  %v2499_v0 = vmul.f32 %v9358_v40, %v5904_v49 }
 0x3be   : > { %vm9783_vm14 = vcmp.gt.f32.partialorder %v3078_v32, %v3385_v56  ;;  %vm9787_vm15 = vcmp.gt.f32.partialorder %v3077_v39, %v3386_v28  ;;  %v3043_v24 = vrot.slane %v3029_v52, %v8037_v31  ;;  %v3044_v62 = vcombine.high %v3036_v47, %v3036_v47  ;;  %v5905_v26 = vpop.f32.mrf.mxu1 }
 0x3bf   : > { %v4908_v6 = vrot.slane %v9763_v23, %v8057_v21  ;;  %v5001_v22 = vsel %vm10422_vm8, %v4904_v2, %v5000_v27  ;;  %vm9795_vm3 = vcmp.gt.f32.partialorder %v3079_v14, %v3387_v11  ;;  %v4538_v36 = vsel %vm10202_vm12, %v4445_v19, %v4537_v44 }
 0x3c0   : > { %v3045_v58 = vcombine.high %v3043_v24, %v3043_v24  ;;  %v3376_v20 = vrot.slane %v3036_v47, 7  ;;  %v3377_v9 = vrot.slane %v3044_v62, 7  ;;  %v3378_v54 = vrot.slane %v3043_v24, 7 }
 0x3c1   : > { %v3768_v29 = vsel %vm9778_vm0, %v3070_v1, %v3384_v60  ;;  %v3769_v34 = vsel %vm9783_vm14, %v3078_v32, %v3385_v56  ;;  %v3770_v12 = vsel %vm9787_vm15, %v3077_v39, %v3386_v28  ;;  %v2538_v46 = vadd.f32 %v9437_v33, %v2499_v0 }
 0x3c2   : > { %v3379_v17 = vrot.slane %v3045_v58, 7  ;;  %vm3632_vm5 = vcmp.gt.f32.partialorder %v3036_v47, %v3376_v20  ;;  %vm3633_vm7 = vcmp.gt.f32.partialorder %v3044_v62, %v3377_v9  ;;  %vm3634_vm6 = vcmp.gt.f32.partialorder %v3043_v24, %v3378_v54 }
 0x3c3   : > { %v3771_v59 = vsel %vm9795_vm3, %v3079_v14, %v3387_v11  ;;  %v3760_v13 = vsel %vm3632_vm5, %v3036_v47, %v3376_v20  ;;  %v3761_v57 = vsel %vm3633_vm7, %v3044_v62, %v3377_v9  ;;  %v3762_v5 = vsel %vm3634_vm6, %v3043_v24, %v3378_v54 }
 0x3c4   : > { %vm3635_vm10 = vcmp.gt.f32.partialorder %v3045_v58, %v3379_v17  ;;  %v3888_v53 = vsel %vm3632_vm5, 1, %v6621_v63  ;;  %v3889_v3 = vsel %vm3633_vm7, 1, %v6621_v63  ;;  %vm3968_vm13 = vcmp.gt.f32.partialorder %v3768_v29, %v3760_v13 }
 0x3c5   : > { %v3763_v10 = vsel %vm3635_vm10, %v3045_v58, %v3379_v17  ;;  %v3890_v41 = vsel %vm3634_vm6, 1, %v6621_v63  ;;  %vm3969_vm9 = vcmp.gt.f32.partialorder %v3769_v34, %v3761_v57  ;;  %vm3970_vm11 = vcmp.gt.f32.partialorder %v3770_v12, %v3762_v5 }
 0x3c6   : > { %vm3971_vm8 = vcmp.gt.f32.partialorder %v3771_v59, %v3763_v10  ;;  %v4032_v48 = vsel %vm3968_vm13, %v3768_v29, %v3760_v13  ;;  %v4033_v16 = vsel %vm3969_vm9, %v3769_v34, %v3761_v57  ;;  %v4034_v43 = vsel %vm3970_vm11, %v3770_v12, %v3762_v5  ;;  %v2450_v5 = vpop.f32.mrf.mxu1 }
 0x3c7   : > { %v3896_v45 = vsel %vm9778_vm0, 1, %v6621_v63  ;;  %v3897_v7 = vsel %vm9783_vm14, 1, %v6621_v63  ;;  %v3891_v37 = vsel %vm3635_vm10, 1, %v6621_v63  ;;  %v4035_v18 = vsel %vm3971_vm8, %v3771_v59, %v3763_v10 }
 0x3c8   : > { %v3898_v15 = vsel %vm9787_vm15, 1, %v6621_v63  ;;  %v3899_v1 = vsel %vm9795_vm3, 1, %v6621_v63  ;;  %v4160_v39 = vsel %vm3968_vm13, %v3896_v45, %v3888_v53  ;;  %v4161_v23 = vsel %vm3969_vm9, %v3897_v7, %v3889_v3 }
 0x3c9   : > { %v4162_v25 = vsel %vm3970_vm11, %v3898_v15, %v3890_v41  ;;  %v4449_v51 = vrot.slane %v4032_v48, %v8057_v21  ;;  %v4453_v32 = vrot.slane %v4033_v16, %v8057_v21  ;;  %v4457_v14 = vrot.slane %v4034_v43, %v8057_v21 }
 0x3ca   : > { %v4621_v60 = vadd.s32 12, %v9750_v8  ;;  %v4163_v28 = vsel %vm3971_vm8, %v3899_v1, %v3891_v37  ;;  %v4461_v49 = vrot.slane %v4035_v18, %v8057_v21  ;;  %vm10425_vm0 = vcmask 1043459  }
 0x3cb   : > { %v5002_v19 = vsel %vm10425_vm0, %v4908_v6, %v5001_v22  ;;  %v4539_v2 = vsel %vm4500_vm1, %v4449_v51, %v4538_v36  ;;  %v4912_v52 = vrot.slane %v4160_v39, %v8057_v21  ;;  %v4916_v47 = vrot.slane %v4161_v23, %v8057_v21  ;;  %vm10429_vm3 = vmmov %vm10425_vm0 }
 0x3cc   : > { %v2570_v44 = vmax.f32 %v2538_v46, 0.0  ;;  %v4622_v27 = vadd.s32 12, %v9754_v4  ;;  %v4540_v56 = vsel %vm4502_vm2, %v4453_v32, %v4539_v2  ;;  %4577 = vst [vmem:[%s8253_s20 + $0x37] sm:$0x1] %v4461_v49  ;;  %v4920_v8 = vrot.slane %v4162_v25, %v8057_v21 }
 0x3cd   : > { %v2497_v11 = vmul.f32 %v9358_v40, %v2447_v38  ;;  %v4096_v0 = vsel %vm3968_vm13, 1, %v6621_v63  ;;  %v4097_v55 = vsel %vm3969_vm9, 1, %v6621_v63  ;;  %v4541_v61 = vsel %vm4504_vm4, %v4457_v14, %v4540_v56 }
 0x3ce   : > { %v4924_v24 = vrot.slane %v4163_v28, %v8057_v21  ;;  %v4623_v4 = vadd.s32 12, %v9774_v50  ;;  %v4098_v62 = vsel %vm3970_vm11, 1, %v6621_v63  ;;  %v4099_v6 = vsel %vm3971_vm8, 1, %v6621_v63  ;;  %4576 = vst [vmem:[%s8253_s20 + $0x2f] sm:$0xfe] %v4541_v61 }
 0x3cf   : > { %v5003_v22 = vsel %vm10202_vm12, %v4912_v52, %v5002_v19  ;;  %v3114_v36 = vcombine.high %v2570_v44, %v2570_v44  ;;  %v9862_v58 = vrot.slane %v2570_v44, %v8037_v31  ;;  %v2500_v20 = vmul.f32 %v9358_v40, %v5905_v26 }
 0x3d0   : > { %v5004_v30 = vsel %vm4500_vm1, %v4916_v47, %v5003_v22  ;;  %v4684_v9 = vmul.u32 16, %v9776_v42  ;;  %v4624_v50 = vadd.s32 12, %v4096_v0  ;;  %v4625_v54 = vadd.s32 12, %v4097_v55 }
 0x3d1   : > { %v5005_v29 = vsel %vm4502_vm2, %v4920_v8, %v5004_v30  ;;  %v4626_v34 = vadd.s32 12, %v4098_v62  ;;  %v4627_v12 = vadd.s32 12, %v4099_v6  ;;  %v2536_v17 = vadd.f32 %v9437_v33, %v2497_v11 }
 0x3d2   : > { %v5006_v46 = vsel %vm4504_vm4, %v4924_v24, %v5005_v29  ;;  %v4685_v59 = vmul.u32 16, %v4621_v60  ;;  %v4686_v13 = vmul.u32 16, %v4622_v27  ;;  %v9871_v3 = vrot.slane %v3114_v36, %v8037_v31 }
 0x3d3   : > { %v5020_v57 = vadd.s32 %v5006_v46, %v8268_v35  ;;  %v4687_v53 = vmul.u32 16, %v4623_v4  ;;  %v9875_v42 = vcombine.high %v9862_v58, %v9862_v58  ;;  %v2539_v10 = vadd.f32 %v9437_v33, %v2500_v20 }
 0x3d4   : > { %v4688_v41 = vmul.u32 16, %v4624_v50  ;;  %v4689_v48 = vmul.u32 16, %v4625_v54  ;;  %v2568_v37 = vmax.f32 %v2536_v17, 0.0  ;;  %v2498_v18 = vmul.f32 %v9358_v40, %v2450_v5 }
 0x3d5   : > { %v5124_v16 = vcombine.high %v5020_v57, %v5020_v57  ;;  %v5131_v43 = vrot.slane %v5020_v57, %v8037_v31  ;;  %v4690_v45 = vmul.u32 16, %v4626_v34  ;;  %v4691_v7 = vmul.u32 16, %v4627_v12 }
 0x3d6   : > { %v3396_v23 = vrot.slane %v9862_v58, 7  ;;  %v9884_v25 = vcombine.high %v9871_v3, %v9871_v3  ;;  %v3397_v51 = vrot.slane %v9875_v42, 7  ;;  %v9887_v32 = vmax.f32 %v2539_v10, 0.0 }
 0x3d7   : > { %v5138_v15 = vrot.slane %v5124_v16, %v8037_v31  ;;  %v5139_v1 = vcombine.high %v5131_v43, %v5131_v43  ;;  %v5182_v39 = vrot.slane %v5131_v43, 7  ;;  %v5239_v38 = vadd.s32 %v5131_v43, %v4685_v59 }
 0x3d8   : > { %v3080_v2 = vcombine.high %v2568_v37, %v2568_v37  ;;  %v3087_v52 = vrot.slane %v2568_v37, %v8037_v31  ;;  %v3398_v26 = vrot.slane %v9871_v3, 7  ;;  %vm9894_vm14 = vcmp.gt.f32.partialorder %v9862_v58, %v3396_v23 }
 0x3d9   : > { %v5140_v14 = vcombine.high %v5138_v15, %v5138_v15  ;;  %v5183_v60 = vrot.slane %v5139_v1, 7  ;;  %v5184_v28 = vrot.slane %v5138_v15, 7  ;;  %v5238_v49 = vadd.s32 %v5182_v39, %v4684_v9 }
 0x3da   : > { %v5241_v40 = vadd.s32 %v5139_v1, %v4687_v53  ;;  %v5243_v19 = vadd.s32 %v5138_v15, %v4689_v48  ;;  %v5453_v11 = vrot.slane %v5239_v38, %v8057_v21  ;;  %vm10428_vm15 = vcmask 1042434  }
 0x3db   : > { %v5185_v47 = vrot.slane %v5140_v14, 7  ;;  %v5240_v44 = vadd.s32 %v5183_v60, %v4686_v13  ;;  %v5242_v27 = vadd.s32 %v5184_v28, %v4688_v41  ;;  %v5245_v56 = vadd.s32 %v5140_v14, %v4691_v7 }
 0x3dc   : > { %v5449_v8 = vrot.slane %v5238_v49, %v8057_v21  ;;  %v5461_v24 = vrot.slane %v5241_v40, %v8057_v21  ;;  %v3094_v6 = vrot.slane %v3080_v2, %v8037_v31  ;;  %v3095_v22 = vcombine.high %v3087_v52, %v3087_v52 }
 0x3dd   : > { %v5244_v55 = vadd.s32 %v5185_v47, %v4690_v45  ;;  %v5457_v61 = vrot.slane %v5240_v44, %v8057_v21  ;;  %v5477_v4 = vrot.slane %v5245_v56, %v8057_v21  ;;  %v3388_v30 = vrot.slane %v3087_v52, 7 }
 0x3de   : > { %v5546_v62 = vsel %vm10428_vm15, %v5453_v11, %v5449_v8  ;;  %v5465_v36 = vrot.slane %v5242_v27, %v8057_v21  ;;  %v5469_v20 = vrot.slane %v5243_v19, %v8057_v21  ;;  %v3399_v50 = vrot.slane %v9884_v25, 7 }
 0x3df   : > { %v5547_v9 = vsel %vm10429_vm3, %v5457_v61, %v5546_v62  ;;  %5571 = vst [vmem:[%s8333_s12 + $0x37] sm:$0x1] %v5477_v4  ;;  %v3096_v29 = vcombine.high %v3094_v6, %v3094_v6  ;;  %v3389_v34 = vrot.slane %v3095_v22, 7  ;;  %v3390_v12 = vrot.slane %v3094_v6, 7 }
 0x3e0   : > { %v5548_v54 = vsel %vm10202_vm12, %v5461_v24, %v5547_v9  ;;  %v5473_v46 = vrot.slane %v5244_v55, %v8057_v21  ;;  %vm9912_vm5 = vcmp.gt.f32.partialorder %v9875_v42, %v3397_v51  ;;  %vm9916_vm7 = vcmp.gt.f32.partialorder %v3087_v52, %v3388_v30 }
 0x3e1   : > { %v5549_v17 = vsel %vm4500_vm1, %v5465_v36, %v5548_v54  ;;  %v3391_v5 = vrot.slane %v3096_v29, 7  ;;  %vm9921_vm6 = vcmp.gt.f32.partialorder %v3095_v22, %v3389_v34  ;;  %vm9925_vm10 = vcmp.gt.f32.partialorder %v3094_v6, %v3390_v12 }
 0x3e2   : > { %v5550_v57 = vsel %vm4502_vm2, %v5469_v20, %v5549_v17  ;;  %v9932_v48 = vsel %vm9916_vm7, %v3087_v52, %v3388_v30  ;;  %v9936_v16 = vsel %vm9921_vm6, %v3095_v22, %v3389_v34  ;;  %vm9940_vm13 = vcmp.gt.f32.partialorder %v9871_v3, %v3398_v26 }
 0x3e3   : > { %v5551_v41 = vsel %vm4504_vm4, %v5473_v46, %v5550_v57  ;;  %v9947_v45 = vsel %vm9912_vm5, %v9875_v42, %v3397_v51  ;;  %v3131_v7 = vcombine.high %v9887_v32, %v9887_v32  ;;  %v2537_v37 = vadd.f32 %v9437_v33, %v2498_v18 }
 0x3e4   : > { %5570 = vst [vmem:[%s8333_s12 + $0x2f] sm:$0xfe] %v5551_v41  ;;  %v9955_v15 = vsel %vm9894_vm14, %v9862_v58, %v3396_v23  ;;  %vm9957_vm9 = vcmp.gt.f32.partialorder %v3096_v29, %v3391_v5  ;;  %v9963_v39 = vsel %vm9925_vm10, %v3094_v6, %v3390_v12  ;;  %vm10201_vm11 = vcmp.gt.f32.partialorder %v9947_v45, %v9936_v16 }
 0x3e5   : > { %vm9968_vm8 = vcmp.gt.f32.partialorder %v9884_v25, %v3399_v50  ;;  %vm3972_vm0 = vcmp.gt.f32.partialorder %v9955_v15, %v9932_v48  ;;  %v9977_v33 = vsel %vm9940_vm13, %v9871_v3, %v3398_v26  ;;  %v3901_v58 = vsel %vm9921_vm6, 1, %v6621_v63 }
 0x3e6   : > { %v4037_v18 = vsel %vm10201_vm11, %v9947_v45, %v9936_v16  ;;  %v3138_v23 = vrot.slane %v9887_v32, %v8037_v31  ;;  %v9991_v38 = vsel %vm9957_vm9, %v3096_v29, %v3391_v5  ;;  %vm10200_vm15 = vcmp.gt.f32.partialorder %v9977_v33, %v9963_v39 }
 0x3e7   : > { %v3145_v3 = vrot.slane %v3131_v7, %v8037_v31  ;;  %v3909_v51 = vsel %vm9912_vm5, 1, %v6621_v63  ;;  %v3900_v14 = vsel %vm9916_vm7, 1, %v6621_v63  ;;  %v4036_v32 = vsel %vm3972_vm0, %v9955_v15, %v9932_v48 }
 0x3e8   : > { %v2569_v60 = vmax.f32 %v2537_v37, 0.0  ;;  %v10010_v28 = vsel %vm9968_vm8, %v9884_v25, %v3399_v50  ;;  %v3902_v49 = vsel %vm9925_vm10, 1, %v6621_v63  ;;  %v4165_v40 = vsel %vm10201_vm11, %v3909_v51, %v3901_v58 }
 0x3e9   : > { %v4469_v19 = vrot.slane %v4037_v18, %v8057_v21  ;;  %v3908_v2 = vsel %vm9894_vm14, 1, %v6621_v63  ;;  %vm10199_vm3 = vcmp.gt.f32.partialorder %v10010_v28, %v9991_v38  ;;  %v4038_v25 = vsel %vm10200_vm15, %v9977_v33, %v9963_v39 }
 0x3ea   : > { %v3146_v52 = vcombine.high %v3138_v23, %v3138_v23  ;;  %v3910_v47 = vsel %vm9940_vm13, 1, %v6621_v63  ;;  %v4164_v44 = vsel %vm3972_vm0, %v3908_v2, %v3900_v14  ;;  %v4465_v27 = vrot.slane %v4036_v32, %v8057_v21 }
 0x3eb   : > { %v3147_v56 = vcombine.high %v3145_v3, %v3145_v3  ;;  %v3903_v8 = vsel %vm9957_vm9, 1, %v6621_v63  ;;  %v4166_v11 = vsel %vm10200_vm15, %v3910_v47, %v3902_v49  ;;  %v4932_v26 = vrot.slane %v4165_v40, %v8057_v21 }
 0x3ec   : > { %v4039_v0 = vsel %vm10199_vm3, %v10010_v28, %v9991_v38  ;;  %v4473_v55 = vrot.slane %v4038_v25, %v8057_v21  ;;  %vm10444_vm14 = vcmask 1042434   ;;  %v3400_v24 = vrot.slane %v3138_v23, 7 }
 0x3ed   : > { %v4542_v61 = vsel %vm10444_vm14, %v4469_v19, %v4465_v27  ;;  %v4928_v4 = vrot.slane %v4164_v44, %v8057_v21  ;;  %v3401_v62 = vrot.slane %v3146_v52, 7  ;;  %v3097_v6 = vcombine.high %v2569_v60, %v2569_v60  ;;  %vm10451_vm13 = vmmov %vm10444_vm14 }
 0x3ee   : > { %v3104_v22 = vrot.slane %v2569_v60, %v8037_v31  ;;  %v3911_v30 = vsel %vm9968_vm8, 1, %v6621_v63  ;;  %v4936_v36 = vrot.slane %v4166_v11, %v8057_v21  ;;  %v3402_v20 = vrot.slane %v3145_v3, 7 }
 0x3ef   : > { %v3403_v9 = vrot.slane %v3147_v56, 7  ;;  %v4167_v50 = vsel %vm10199_vm3, %v3911_v30, %v3903_v8  ;;  %vm10445_vm5 = vcmask 1041409   ;;  %v4477_v29 = vrot.slane %v4039_v0, %v8057_v21 }
 0x3f0   : > { %v5007_v54 = vsel %vm10445_vm5, %v4932_v26, %v4928_v4  ;;  %vm10446_vm7 = vcmask 1043459   ;;  %vm10062_vm6 = vcmp.gt.f32.partialorder %v3138_v23, %v3400_v24  ;;  %vm10066_vm10 = vcmp.gt.f32.partialorder %v3146_v52, %v3401_v62 }
 0x3f1   : > { %v4543_v34 = vsel %vm10446_vm7, %v4473_v55, %v4542_v61  ;;  %v3111_v17 = vrot.slane %v3097_v6, %v8037_v31  ;;  %v3112_v59 = vcombine.high %v3104_v22, %v3104_v22  ;;  %v3392_v13 = vrot.slane %v3104_v22, 7 }
 0x3f2   : > { %v4940_v57 = vrot.slane %v4167_v50, %v8057_v21  ;;  %v5008_v5 = vsel %vm10451_vm13, %v4936_v36, %v5007_v54  ;;  %vm10073_vm9 = vcmp.gt.f32.partialorder %v3145_v3, %v3402_v20  ;;  %vm10077_vm8 = vcmp.gt.f32.partialorder %v3147_v56, %v3403_v9 }
 0x3f3   : > { %v3113_v41 = vcombine.high %v3111_v17, %v3111_v17  ;;  %v3393_v43 = vrot.slane %v3112_v59, 7  ;;  %v3394_v7 = vrot.slane %v3111_v17, 7  ;;  %vm3648_vm14 = vcmp.gt.f32.partialorder %v3104_v22, %v3392_v13 }
 0x3f4   : > { %v3784_v37 = vsel %vm10062_vm6, %v3138_v23, %v3400_v24  ;;  %v3785_v1 = vsel %vm10066_vm10, %v3146_v52, %v3401_v62  ;;  %v3776_v42 = vsel %vm3648_vm14, %v3104_v22, %v3392_v13  ;;  %v4544_v58 = vsel %vm10202_vm12, %v4477_v29, %v4543_v34 }
 0x3f5   : > { %v3395_v18 = vrot.slane %v3113_v41, 7  ;;  %vm3649_vm5 = vcmp.gt.f32.partialorder %v3112_v59, %v3393_v43  ;;  %vm3650_vm7 = vcmp.gt.f32.partialorder %v3111_v17, %v3394_v7  ;;  %vm3976_vm13 = vcmp.gt.f32.partialorder %v3784_v37, %v3776_v42 }
 0x3f6   : > { %v3786_v51 = vsel %vm10073_vm9, %v3145_v3, %v3402_v20  ;;  %v3787_v14 = vsel %vm10077_vm8, %v3147_v56, %v3403_v9  ;;  %v3777_v32 = vsel %vm3649_vm5, %v3112_v59, %v3393_v43  ;;  %v3778_v60 = vsel %vm3650_vm7, %v3111_v17, %v3394_v7 }
 0x3f7   : > { %vm3651_vm3 = vcmp.gt.f32.partialorder %v3113_v41, %v3395_v18  ;;  %v3904_v23 = vsel %vm3648_vm14, 1, %v6621_v63  ;;  %vm3977_vm15 = vcmp.gt.f32.partialorder %v3785_v1, %v3777_v32  ;;  %vm3978_vm11 = vcmp.gt.f32.partialorder %v3786_v51, %v3778_v60 }
 0x3f8   : > { %v3779_v49 = vsel %vm3651_vm3, %v3113_v41, %v3395_v18  ;;  %v3905_v40 = vsel %vm3649_vm5, 1, %v6621_v63  ;;  %v4040_v19 = vsel %vm3976_vm13, %v3784_v37, %v3776_v42  ;;  %v4041_v2 = vsel %vm3977_vm15, %v3785_v1, %v3777_v32 }
 0x3f9   : > { %v3912_v3 = vsel %vm10062_vm6, 1, %v6621_v63  ;;  %v3906_v25 = vsel %vm3650_vm7, 1, %v6621_v63  ;;  %vm3979_vm12 = vcmp.gt.f32.partialorder %v3787_v14, %v3779_v49  ;;  %v4042_v52 = vsel %vm3978_vm11, %v3786_v51, %v3778_v60 }
 0x3fa   : > { %v3913_v47 = vsel %vm10066_vm10, 1, %v6621_v63  ;;  %v3907_v44 = vsel %vm3651_vm3, 1, %v6621_v63  ;;  %v4043_v27 = vsel %vm3979_vm12, %v3787_v14, %v3779_v49  ;;  %v4168_v56 = vsel %vm3976_vm13, %v3912_v3, %v3904_v23 }
 0x3fb   : > { %v3914_v8 = vsel %vm10073_vm9, 1, %v6621_v63  ;;  %v4169_v11 = vsel %vm3977_vm15, %v3913_v47, %v3905_v40  ;;  %v4481_v26 = vrot.slane %v4040_v19, %v8057_v21  ;;  %v4485_v0 = vrot.slane %v4041_v2, %v8057_v21 }
 0x3fc   : > { %v3915_v55 = vsel %vm10077_vm8, 1, %v6621_v63  ;;  %v4170_v61 = vsel %vm3978_vm11, %v3914_v8, %v3906_v25  ;;  %v4489_v24 = vrot.slane %v4042_v52, %v8057_v21  ;;  %v4493_v4 = vrot.slane %v4043_v27, %v8057_v21 }
 0x3fd   : > { %v4171_v62 = vsel %vm3979_vm12, %v3915_v55, %v3907_v44  ;;  %v4545_v6 = vsel %vm4500_vm1, %v4481_v26, %v4544_v58  ;;  %v4944_v22 = vrot.slane %v4168_v56, %v8057_v21  ;;  %vm10456_vm3 = vcmask 1043459  }
 0x3fe   : > { %v5009_v30 = vsel %vm10456_vm3, %v4940_v57, %v5008_v5  ;;  %v4546_v36 = vsel %vm4502_vm2, %v4485_v0, %v4545_v6  ;;  %4579 = vst [vmem:[%s8253_s20 + $0x3f] sm:$0x1] %v4493_v4  ;;  %v4948_v20 = vrot.slane %v4169_v11, %v8057_v21  ;;  %v4100_v9 = vsel %vm3972_vm0, 1, %v6621_v63 }
 0x3ff   : > { %v4547_v50 = vsel %vm4504_vm4, %v4489_v24, %v4546_v36  ;;  %v4952_v54 = vrot.slane %v4170_v61, %v8057_v21  ;;  %vm10457_vm6 = vcmp.gt.f32.partialorder %v9947_v45, %v9936_v16  ;;  %vm10458_vm10 = vcmp.gt.f32.partialorder %v9977_v33, %v9963_v39 }
 0x400   : > { %v4101_v29 = vsel %vm10457_vm6, 1, %v6621_v63  ;;  %v4102_v34 = vsel %vm10458_vm10, 1, %v6621_v63  ;;  %4578 = vst [vmem:[%s8253_s20 + $0x37] sm:$0xfe] %v4547_v50  ;;  %v4956_v12 = vrot.slane %v4171_v62, %v8057_v21  ;;  %vm10459_vm9 = vcmask 1044484  }
 0x401   : > { %v5010_v48 = vsel %vm10459_vm9, %v4944_v22, %v5009_v30  ;;  %vm10460_vm0 = vcmp.gt.f32.partialorder %v10010_v28, %v9991_v38  ;;  %v4628_v17 = vadd.s32 14, %v4100_v9  ;;  %v4104_v16 = vsel %vm3976_vm13, 1, %v6621_v63 }
 0x402   : > { %v4103_v15 = vsel %vm10460_vm0, 1, %v6621_v63  ;;  %v5011_v46 = vsel %vm4500_vm1, %v4948_v20, %v5010_v48  ;;  %v4107_v45 = vsel %vm3979_vm12, 1, %v6621_v63  ;;  %v4629_v33 = vadd.s32 14, %v4101_v29 }
 0x403   : > { %v5012_v39 = vsel %vm4502_vm2, %v4952_v54, %v5011_v46  ;;  %v4630_v59 = vadd.s32 14, %v4102_v34  ;;  %v4631_v57 = vadd.s32 14, %v4103_v15  ;;  %v4105_v38 = vsel %vm3977_vm15, 1, %v6621_v63  ;;  %vm10463_vm15 = vmmov %vm10459_vm9 }
 0x404   : > { %v5013_v13 = vsel %vm4504_vm4, %v4956_v12, %v5012_v39  ;;  %v4106_v28 = vsel %vm3978_vm11, 1, %v6621_v63  ;;  %v4632_v53 = vadd.s32 14, %v4104_v16  ;;  %v4635_v10 = vadd.s32 14, %v4107_v45  ;;  %vm10462_vm11 = vmmov %vm10456_vm3 }
 0x405   : > { %v5021_v5 = vadd.s32 %v5013_v13, %v8268_v35  ;;  %v4692_v41 = vmul.u32 16, %v4628_v17  ;;  %v4693_v37 = vmul.u32 16, %v4629_v33  ;;  %v4633_v58 = vadd.s32 14, %v4105_v38 }
 0x406   : > { %v4694_v42 = vmul.u32 16, %v4630_v59  ;;  %v4634_v18 = vadd.s32 14, %v4106_v28  ;;  %v4695_v14 = vmul.u32 16, %v4631_v57  ;;  %vm10461_vm12 = vcmask 1042434  }
 0x407   : > { %v5141_v43 = vcombine.high %v5021_v5, %v5021_v5  ;;  %v5148_v7 = vrot.slane %v5021_v5, %v8037_v31  ;;  %v4696_v49 = vmul.u32 16, %v4632_v53  ;;  %v4699_v51 = vmul.u32 16, %v4635_v10 }
 0x408   : > { %v4697_v2 = vmul.u32 16, %v4633_v58  ;;  %v4698_v3 = vmul.u32 16, %v4634_v18 }
 0x409   : > { %v5155_v23 = vrot.slane %v5141_v43, %v8037_v31  ;;  %v5156_v1 = vcombine.high %v5148_v7, %v5148_v7  ;;  %v5186_v32 = vrot.slane %v5148_v7, 7  ;;  %v5247_v63 = vadd.s32 %v5148_v7, %v4693_v37 }
 0x40b   : > { %v5157_v60 = vcombine.high %v5155_v23, %v5155_v23  ;;  %v5187_v35 = vrot.slane %v5156_v1, 7  ;;  %v5188_v40 = vrot.slane %v5155_v23, 7  ;;  %v5246_v19 = vadd.s32 %v5186_v32, %v4692_v41 }
 0x40c   : > { %v5249_v25 = vadd.s32 %v5156_v1, %v4695_v14  ;;  %v5251_v56 = vadd.s32 %v5155_v23, %v4697_v2  ;;  %v5485_v8 = vrot.slane %v5247_v63, %v8057_v21 }
 0x40d   : > { %v5189_v52 = vrot.slane %v5157_v60, 7  ;;  %v5248_v47 = vadd.s32 %v5187_v35, %v4694_v42  ;;  %v5250_v44 = vadd.s32 %v5188_v40, %v4696_v49  ;;  %v5253_v27 = vadd.s32 %v5157_v60, %v4699_v51 }
 0x40e   : > { %v5481_v31 = vrot.slane %v5246_v19, %v8057_v21  ;;  %v5493_v55 = vrot.slane %v5249_v25, %v8057_v21  ;;  %v5501_v62 = vrot.slane %v5251_v56, %v8057_v21 }
 0x40f   : > { %v5252_v11 = vadd.s32 %v5189_v52, %v4698_v3  ;;  %v5489_v26 = vrot.slane %v5248_v47, %v8057_v21  ;;  %v5509_v0 = vrot.slane %v5253_v27, %v8057_v21  ;;  %v5497_v24 = vrot.slane %v5250_v44, %v8057_v21 }
 0x410   : > { %v5552_v61 = vsel %vm10461_vm12, %v5485_v8, %v5481_v31 }
 0x411   : > { %v5553_v4 = vsel %vm10462_vm11, %v5489_v26, %v5552_v61  ;;  %5573 = vst [vmem:[%s8333_s12 + $0x3f] sm:$0x1] %v5509_v0  ;;  %v5505_v22 = vrot.slane %v5252_v11, %v8057_v21 }
 0x412   : > { %v5554_v6 = vsel %vm10463_vm15, %v5493_v55, %v5553_v4 }
 0x413   : > { %v5555_v30 = vsel %vm4500_vm1, %v5497_v24, %v5554_v6 }
 0x414   : > { %v5556_v36 = vsel %vm4502_vm2, %v5501_v62, %v5555_v30 }
 0x415   : > { %v5557_v20 = vsel %vm4504_vm4, %v5505_v22, %v5556_v36 }
 0x416   : > { %5572 = vst [vmem:[%s8333_s12 + $0x37] sm:$0xfe] %v5557_v20 }
 0x417 PF: > { %s19_s27 = sadd.s32 1, %s6609_s27  }
 0x418   : > { %p16_p4 = scmp.ge.s32.totalorder %s19_s27, 4  }
 0x41a   :  { %18 = sbr.rel (!%p16_p4) target bundleno = 1 (0x1), region = 90 }

</bundles_post_ra>
